<compile_context>
chip_gen: v5e
topology: v5e:2x2
jax: 0.10.0
libtpu: 0.0.40
codegen_flags: <defaults>
</compile_context>

<pallas_src>
import functools

import jax
import jax.numpy as jnp
from jax.experimental import pallas as pl
from jax.experimental.pallas import tpu as pltpu

EPS = 1e-5  # PyTorch BatchNorm default eps
_PREC = jax.lax.Precision.HIGHEST  # exact f32 matmuls; MXU is ~idle at these sizes


def _fold_groups(v, c):
    """v: (1, W*C) per-(x, c) column sums -> per-channel sums broadcast across the
    W pixel groups, via a log2(W) circular roll-butterfly along lanes (XLU)."""
    wc = v.shape[1]
    k = c
    while k < wc:                       # static Python loop
        v = v + pltpu.roll(v, shift=k, axis=1)
        k *= 2
    return v


def _bn_affine(y, gamma_t, beta_t, cout):
    """Training-mode batch norm of a row-folded (R, W*C) slab.

    One fused stats pass (sum, sum-of-squares -> biased variance), then a single
    mul+add full-slab pass.  gamma_t/beta_t are per-channel params pre-tiled to
    (1, W*C) in the wrapper.
    """
    r, wc = y.shape
    m_tot = r * (wc // cout)                               # = N*H*W positions per channel
    s1 = _fold_groups(jnp.sum(y, axis=0, keepdims=True), cout)
    s2 = _fold_groups(jnp.sum(y * y, axis=0, keepdims=True), cout)
    mean = s1 * (1.0 / m_tot)                              # (1, W*C), tiled per channel
    var = s2 * (1.0 / m_tot) - mean * mean                 # biased var (PyTorch train)
    scale = gamma_t * jax.lax.rsqrt(var + EPS)
    shift = beta_t - mean * scale
    return y * scale + shift


def _conv3x3_rows(src, wband_ref, H):
    """3x3 / padding=1 conv of a row-folded (R, W*Ci) slab -> (R, W*Co).

    One MXU matmul per ky tap against a banded (W*Ci, W*Co) weight (kx taps and
    their x-direction zero padding live inside the band); ky=+/-1 row taps are
    sublane rolls masked at the image top/bottom rows (y-direction zero padding).
    """
    R = src.shape[0]
    rowy = jax.lax.broadcasted_iota(jnp.int32, src.shape, 0) % H
    # dy = 0
    acc = jnp.dot(src, wband_ref[1], preferred_element_type=jnp.float32, precision=_PREC)
    # dy = -1: output row y reads image row y-1 (zero at y == 0)
    up = jnp.where(rowy > 0, pltpu.roll(src, shift=1, axis=0), 0.0)
    acc = acc + jnp.dot(up, wband_ref[0], preferred_element_type=jnp.float32, precision=_PREC)
    # dy = +1: output row y reads image row y+1 (zero at y == H-1)
    dn = jnp.where(rowy < H - 1, pltpu.roll(src, shift=R - 1, axis=0), 0.0)
    acc = acc + jnp.dot(dn, wband_ref[2], preferred_element_type=jnp.float32, precision=_PREC)
    return acc


def resblock_kernel(x_ref, w1b_ref, b1_ref, g1_ref, be1_ref,
                    w2b_ref, b2_ref, g2_ref, be2_ref,
                    wsb_ref, bs_ref, gs_ref, bes_ref,
                    out_ref, *, H, Cout):
    xf = x_ref[...]                                        # (N*H, W*Cin), row-folded

    # ---- conv1 (3x3, pad=1) + bias + bn1 + ReLU ----
    y1 = _conv3x3_rows(xf, w1b_ref, H) + b1_ref[...]
    h1 = jnp.maximum(_bn_affine(y1, g1_ref[...], be1_ref[...], Cout), 0.0)

    # ---- conv2 (3x3, pad=1) + bias + bn2 ----
    # No padded scratch buffer: x-padding is baked into the band, y-padding into
    # the row masks inside _conv3x3_rows.
    y2 = _conv3x3_rows(h1, w2b_ref, H) + b2_ref[...]
    y2 = _bn_affine(y2, g2_ref[...], be2_ref[...], Cout)

    # ---- shortcut: 1x1 conv (block-diagonal weight keeps folded layout) + bn ----
    s = jnp.dot(xf, wsb_ref[...], preferred_element_type=jnp.float32, precision=_PREC)
    s = _bn_affine(s + bs_ref[...], gs_ref[...], bes_ref[...], Cout)

    # ---- residual add + final ReLU; (N*H, W*Cout) store is 128-lane dense ----
    out_ref[...] = jnp.maximum(y2 + s, 0.0).astype(out_ref.dtype)


@jax.jit
def custom_resnet_block(x_nchw, p):
    """x_nchw: (N, Cin, H, W) float32 (PyTorch layout). Returns (N, Cout, H, W)."""
    N, Cin, H, W = x_nchw.shape
    Cout = p["w1"].shape[-1]
    assert W & (W - 1) == 0, "folded BN roll-reduction assumes power-of-two W"

    # NCHW -> NHWC -> row-folded lane-dense (N*H, W*Cin).  No spatial pre-padding.
    xf = jnp.transpose(x_nchw, (0, 2, 3, 1)).reshape(N * H, W * Cin).astype(jnp.float32)

    def band(w_hwio):
        # (3, 3, Ci, Co) HWIO kernel -> (3, W*Ci, W*Co): one banded matrix per ky tap.
        # Band entry [(x+dx)*Ci + ci, x*Co + co] = w[ky, dx+1, ci, co]; out-of-range
        # x+dx simply has no entry, which implements the x-direction zero padding.
        mats = []
        for ky in range(3):
            m = None
            for kx in range(3):
                sel = jnp.eye(W, k=-(kx - 1), dtype=jnp.float32)   # sel[x+dx, x] = 1
                t = jnp.kron(sel, w_hwio[ky, kx].astype(jnp.float32))
                m = t if m is None else m + t
            mats.append(m)
        return jnp.stack(mats)

    def tile_c(v):  # per-channel vector -> (1, W*Cout), tiled across the W pixel groups
        return jnp.tile(v.reshape(1, Cout).astype(jnp.float32), (1, W))

    w1b = band(p["w1"])                                               # (3, W*Cin,  W*Cout)
    w2b = band(p["w2"])                                               # (3, W*Cout, W*Cout)
    wsb = jnp.kron(jnp.eye(W, dtype=jnp.float32), p["ws"].astype(jnp.float32))

    vmem = pl.BlockSpec(memory_space=pltpu.MemorySpace.VMEM)
    kernel = functools.partial(resblock_kernel, H=H, Cout=Cout)
    out_folded = pl.pallas_call(
        kernel,
        out_shape=jax.ShapeDtypeStruct((N * H, W * Cout), jnp.float32),
        in_specs=[vmem] * 13,
        out_specs=vmem,
        compiler_params=pltpu.CompilerParams(vmem_limit_bytes=32 * 1024 * 1024),
    )(xf, w1b, tile_c(p["b1"]), tile_c(p["g1"]), tile_c(p["be1"]),
      w2b, tile_c(p["b2"]), tile_c(p["g2"]), tile_c(p["be2"]),
      wsb, tile_c(p["bs"]), tile_c(p["gs"]), tile_c(p["bes"]))

    # (N*H, W*Cout) -> NHWC -> NCHW
    return jnp.transpose(out_folded.reshape(N, H, W, Cout), (0, 3, 1, 2))


# ----------------------- pure-JAX reference (for verification) -----------------------
def reference(x_nchw, p):
    x = jnp.transpose(x_nchw, (0, 2, 3, 1)).astype(jnp.float32)

    def conv(h, w, b):
        y = jax.lax.conv_general_dilated(
            h, w, window_strides=(1, 1), padding="SAME",
            dimension_numbers=("NHWC", "HWIO", "NHWC"), precision=_PREC)
        return y + b.reshape(1, 1, 1, -1)

    def bn(y, g, be):
        m = jnp.mean(y, axis=(0, 1, 2), keepdims=True)
        v = jnp.mean((y - m) ** 2, axis=(0, 1, 2), keepdims=True)
        return g.reshape(1, 1, 1, -1) * (y - m) / jnp.sqrt(v + EPS) + be.reshape(1, 1, 1, -1)

    h = jnp.maximum(bn(conv(x, p["w1"], p["b1"]), p["g1"], p["be1"]), 0.0)
    h = bn(conv(h, p["w2"], p["b2"]), p["g2"], p["be2"])
    s = bn(conv(x, p["ws"].reshape(1, 1, *p["ws"].shape), p["bs"]), p["gs"], p["bes"])
    out = jnp.maximum(h + s, 0.0)
    return jnp.transpose(out, (0, 3, 1, 2))


if __name__ == "__main__":
    N, Cin, Cout, H, W = 2, 4, 8, 16, 16
    key = jax.random.PRNGKey(0)
    keys = jax.random.split(key, 8)

    def u(k, shape, fan_in):
        bound = 1.0 / (fan_in ** 0.5)   # PyTorch-style kaiming-uniform-ish scale
        return jax.random.uniform(k, shape, jnp.float32, -bound, bound)

    params = dict(
        w1=u(keys[0], (3, 3, Cin, Cout), Cin * 9),   # HWIO
        b1=u(keys[1], (1, Cout), Cin * 9),
        g1=jnp.ones((1, Cout), jnp.float32),
        be1=jnp.zeros((1, Cout), jnp.float32),
        w2=u(keys[2], (3, 3, Cout, Cout), Cout * 9),
        b2=u(keys[3], (1, Cout), Cout * 9),
        g2=jnp.ones((1, Cout), jnp.float32),
        be2=jnp.zeros((1, Cout), jnp.float32),
        ws=u(keys[4], (Cin, Cout), Cin),             # 1x1 shortcut conv as (Cin, Cout)
        bs=u(keys[5], (1, Cout), Cin),
        gs=jnp.ones((1, Cout), jnp.float32),
        bes=jnp.zeros((1, Cout), jnp.float32),
    )

    x = jax.random.normal(keys[6], (N, Cin, H, W), jnp.float32)  # PyTorch NCHW input

    out = jax.block_until_ready(custom_resnet_block(x, params))
    ref = reference(x, params)

    assert out.shape == (N, Cout, H, W), out.shape
    assert jnp.allclose(out, ref, atol=1e-3, rtol=1e-3), float(jnp.max(jnp.abs(out - ref)))
    print("KERNEL_OK")
</pallas_src>

<mosaic_0001>
module attributes {stable_mosaic.version = 11 : i64} {
  func.func @resblock_kernel(%arg0: memref<32x64xf32, #tpu.memory_space<vmem>>, %arg1: memref<3x64x128xf32, #tpu.memory_space<vmem>>, %arg2: memref<1x128xf32, #tpu.memory_space<vmem>>, %arg3: memref<1x128xf32, #tpu.memory_space<vmem>>, %arg4: memref<1x128xf32, #tpu.memory_space<vmem>>, %arg5: memref<3x128x128xf32, #tpu.memory_space<vmem>>, %arg6: memref<1x128xf32, #tpu.memory_space<vmem>>, %arg7: memref<1x128xf32, #tpu.memory_space<vmem>>, %arg8: memref<1x128xf32, #tpu.memory_space<vmem>>, %arg9: memref<64x128xf32, #tpu.memory_space<vmem>>, %arg10: memref<1x128xf32, #tpu.memory_space<vmem>>, %arg11: memref<1x128xf32, #tpu.memory_space<vmem>>, %arg12: memref<1x128xf32, #tpu.memory_space<vmem>>, %arg13: memref<32x128xf32, #tpu.memory_space<vmem>>) attributes {dimension_semantics = [], scalar_prefetch = 0 : i64, scratch_operands = 0 : i64, tpu.core_type = #tpu.core_type<tc>} {
    %c0 = arith.constant 0 : index
    %c0_0 = arith.constant 0 : index
    %0 = vector.load %arg0[%c0, %c0_0] : memref<32x64xf32, #tpu.memory_space<vmem>>, vector<32x64xf32>
    %1 = tpu.iota {dimensions = array<i32: 0>} : vector<32x64xi32>
    %c16_i32 = arith.constant 16 : i32
    %c0_i32 = arith.constant 0 : i32
    %2 = arith.cmpi eq, %c16_i32, %c0_i32 : i32
    %c1_i32 = arith.constant 1 : i32
    %3 = arith.select %2, %c1_i32, %c16_i32 : i32
    %4 = vector.broadcast %3 : i32 to vector<32x64xi32>
    %5 = arith.remsi %1, %4 : vector<32x64xi32>
    %c0_i32_1 = arith.constant 0 : i32
    %6 = vector.broadcast %c0_i32_1 : i32 to vector<32x64xi32>
    %7 = arith.cmpi ne, %5, %6 : vector<32x64xi32>
    %c0_i32_2 = arith.constant 0 : i32
    %8 = vector.broadcast %c0_i32_2 : i32 to vector<32x64xi32>
    %9 = arith.cmpi slt, %5, %8 : vector<32x64xi32>
    %c0_i32_3 = arith.constant 0 : i32
    %10 = arith.cmpi slt, %3, %c0_i32_3 : i32
    %11 = vector.broadcast %10 : i1 to vector<32x64xi1>
    %12 = vector.broadcast %11 : vector<32x64xi1> to vector<32x64xi1>
    %13 = arith.xori %9, %12 : vector<32x64xi1>
    %14 = arith.andi %13, %7 : vector<32x64xi1>
    %15 = vector.broadcast %3 : i32 to vector<32x64xi32>
    %16 = arith.addi %5, %15 : vector<32x64xi32>
    %17 = arith.select %14, %16, %5 : vector<32x64xi1>, vector<32x64xi32>
    %c1 = arith.constant 1 : index
    %c0_4 = arith.constant 0 : index
    %c0_5 = arith.constant 0 : index
    %18 = vector.load %arg1[%c1, %c0_4, %c0_5] : memref<3x64x128xf32, #tpu.memory_space<vmem>>, vector<1x64x128xf32>
    %19 = vector.shape_cast %18 : vector<1x64x128xf32> to vector<64x128xf32>
    %cst = arith.constant dense<0.000000e+00> : vector<32x128xf32>
    %20 = tpu.matmul %0, %19, %cst {dimension_numbers = #tpu.dot_dimension_numbers<[1], [0], [0], [1], [0, 0, 1, 1], [], []>, precision = #tpu.contract_precision<fp32>} : vector<32x64xf32>, vector<64x128xf32>, vector<32x128xf32> -> vector<32x128xf32>
    %c0_i32_6 = arith.constant 0 : i32
    %21 = vector.broadcast %c0_i32_6 : i32 to vector<32x64xi32>
    %22 = arith.cmpi sgt, %17, %21 : vector<32x64xi32>
    %c1_i32_7 = arith.constant 1 : i32
    %23 = tpu.dynamic_rotate %0 by %c1_i32_7 dim 0 : vector<32x64xf32>, i32 -> vector<32x64xf32>
    %cst_8 = arith.constant 0.000000e+00 : f32
    %24 = vector.broadcast %cst_8 : f32 to vector<32x64xf32>
    %25 = arith.select %22, %23, %24 : vector<32x64xi1>, vector<32x64xf32>
    %c0_9 = arith.constant 0 : index
    %c0_10 = arith.constant 0 : index
    %c0_11 = arith.constant 0 : index
    %26 = vector.load %arg1[%c0_9, %c0_10, %c0_11] : memref<3x64x128xf32, #tpu.memory_space<vmem>>, vector<1x64x128xf32>
    %27 = vector.shape_cast %26 : vector<1x64x128xf32> to vector<64x128xf32>
    %cst_12 = arith.constant dense<0.000000e+00> : vector<32x128xf32>
    %28 = tpu.matmul %25, %27, %cst_12 {dimension_numbers = #tpu.dot_dimension_numbers<[1], [0], [0], [1], [0, 0, 1, 1], [], []>, precision = #tpu.contract_precision<fp32>} : vector<32x64xf32>, vector<64x128xf32>, vector<32x128xf32> -> vector<32x128xf32>
    %29 = arith.addf %20, %28 : vector<32x128xf32>
    %c15_i32 = arith.constant 15 : i32
    %30 = vector.broadcast %c15_i32 : i32 to vector<32x64xi32>
    %31 = arith.cmpi slt, %17, %30 : vector<32x64xi32>
    %c31_i32 = arith.constant 31 : i32
    %32 = tpu.dynamic_rotate %0 by %c31_i32 dim 0 : vector<32x64xf32>, i32 -> vector<32x64xf32>
    %cst_13 = arith.constant 0.000000e+00 : f32
    %33 = vector.broadcast %cst_13 : f32 to vector<32x64xf32>
    %34 = arith.select %31, %32, %33 : vector<32x64xi1>, vector<32x64xf32>
    %c2 = arith.constant 2 : index
    %c0_14 = arith.constant 0 : index
    %c0_15 = arith.constant 0 : index
    %35 = vector.load %arg1[%c2, %c0_14, %c0_15] : memref<3x64x128xf32, #tpu.memory_space<vmem>>, vector<1x64x128xf32>
    %36 = vector.shape_cast %35 : vector<1x64x128xf32> to vector<64x128xf32>
    %cst_16 = arith.constant dense<0.000000e+00> : vector<32x128xf32>
    %37 = tpu.matmul %34, %36, %cst_16 {dimension_numbers = #tpu.dot_dimension_numbers<[1], [0], [0], [1], [0, 0, 1, 1], [], []>, precision = #tpu.contract_precision<fp32>} : vector<32x64xf32>, vector<64x128xf32>, vector<32x128xf32> -> vector<32x128xf32>
    %38 = arith.addf %29, %37 : vector<32x128xf32>
    %c0_17 = arith.constant 0 : index
    %c0_18 = arith.constant 0 : index
    %39 = vector.load %arg2[%c0_17, %c0_18] : memref<1x128xf32, #tpu.memory_space<vmem>>, vector<1x128xf32>
    %40 = vector.broadcast %39 : vector<1x128xf32> to vector<32x128xf32>
    %41 = arith.addf %38, %40 : vector<32x128xf32>
    %c0_19 = arith.constant 0 : index
    %c0_20 = arith.constant 0 : index
    %42 = vector.load %arg3[%c0_19, %c0_20] : memref<1x128xf32, #tpu.memory_space<vmem>>, vector<1x128xf32>
    %c0_21 = arith.constant 0 : index
    %c0_22 = arith.constant 0 : index
    %43 = vector.load %arg4[%c0_21, %c0_22] : memref<1x128xf32, #tpu.memory_space<vmem>>, vector<1x128xf32>
    %cst_23 = arith.constant dense<0.000000e+00> : vector<128xf32>
    %44 = vector.multi_reduction <add>, %41, %cst_23 [0] : vector<32x128xf32> to vector<128xf32>
    %45 = vector.shape_cast %44 : vector<128xf32> to vector<1x128xf32>
    %c8_i32 = arith.constant 8 : i32
    %46 = tpu.dynamic_rotate %45 by %c8_i32 dim 1 : vector<1x128xf32>, i32 -> vector<1x128xf32>
    %47 = arith.addf %45, %46 : vector<1x128xf32>
    %c16_i32_24 = arith.constant 16 : i32
    %48 = tpu.dynamic_rotate %47 by %c16_i32_24 dim 1 : vector<1x128xf32>, i32 -> vector<1x128xf32>
    %49 = arith.addf %47, %48 : vector<1x128xf32>
    %c32_i32 = arith.constant 32 : i32
    %50 = tpu.dynamic_rotate %49 by %c32_i32 dim 1 : vector<1x128xf32>, i32 -> vector<1x128xf32>
    %51 = arith.addf %49, %50 : vector<1x128xf32>
    %c64_i32 = arith.constant 64 : i32
    %52 = tpu.dynamic_rotate %51 by %c64_i32 dim 1 : vector<1x128xf32>, i32 -> vector<1x128xf32>
    %53 = arith.addf %51, %52 : vector<1x128xf32>
    %54 = arith.mulf %41, %41 : vector<32x128xf32>
    %cst_25 = arith.constant dense<0.000000e+00> : vector<128xf32>
    %55 = vector.multi_reduction <add>, %54, %cst_25 [0] : vector<32x128xf32> to vector<128xf32>
    %56 = vector.shape_cast %55 : vector<128xf32> to vector<1x128xf32>
    %c8_i32_26 = arith.constant 8 : i32
    %57 = tpu.dynamic_rotate %56 by %c8_i32_26 dim 1 : vector<1x128xf32>, i32 -> vector<1x128xf32>
    %58 = arith.addf %56, %57 : vector<1x128xf32>
    %c16_i32_27 = arith.constant 16 : i32
    %59 = tpu.dynamic_rotate %58 by %c16_i32_27 dim 1 : vector<1x128xf32>, i32 -> vector<1x128xf32>
    %60 = arith.addf %58, %59 : vector<1x128xf32>
    %c32_i32_28 = arith.constant 32 : i32
    %61 = tpu.dynamic_rotate %60 by %c32_i32_28 dim 1 : vector<1x128xf32>, i32 -> vector<1x128xf32>
    %62 = arith.addf %60, %61 : vector<1x128xf32>
    %c64_i32_29 = arith.constant 64 : i32
    %63 = tpu.dynamic_rotate %62 by %c64_i32_29 dim 1 : vector<1x128xf32>, i32 -> vector<1x128xf32>
    %64 = arith.addf %62, %63 : vector<1x128xf32>
    %cst_30 = arith.constant 0.001953125 : f32
    %65 = vector.broadcast %cst_30 : f32 to vector<1x128xf32>
    %66 = arith.mulf %53, %65 : vector<1x128xf32>
    %cst_31 = arith.constant 0.001953125 : f32
    %67 = vector.broadcast %cst_31 : f32 to vector<1x128xf32>
    %68 = arith.mulf %64, %67 : vector<1x128xf32>
    %69 = arith.mulf %66, %66 : vector<1x128xf32>
    %70 = arith.subf %68, %69 : vector<1x128xf32>
    %cst_32 = arith.constant 9.99999974E-6 : f32
    %71 = vector.broadcast %cst_32 : f32 to vector<1x128xf32>
    %72 = arith.addf %70, %71 : vector<1x128xf32>
    %73 = math.rsqrt %72 : vector<1x128xf32>
    %74 = arith.mulf %42, %73 : vector<1x128xf32>
    %75 = arith.mulf %66, %74 : vector<1x128xf32>
    %76 = arith.subf %43, %75 : vector<1x128xf32>
    %77 = vector.broadcast %74 : vector<1x128xf32> to vector<32x128xf32>
    %78 = arith.mulf %41, %77 : vector<32x128xf32>
    %79 = vector.broadcast %76 : vector<1x128xf32> to vector<32x128xf32>
    %80 = arith.addf %78, %79 : vector<32x128xf32>
    %cst_33 = arith.constant 0.000000e+00 : f32
    %81 = vector.broadcast %cst_33 : f32 to vector<32x128xf32>
    %82 = arith.maximumf %80, %81 : vector<32x128xf32>
    %83 = tpu.iota {dimensions = array<i32: 0>} : vector<32x128xi32>
    %c16_i32_34 = arith.constant 16 : i32
    %c0_i32_35 = arith.constant 0 : i32
    %84 = arith.cmpi eq, %c16_i32_34, %c0_i32_35 : i32
    %c1_i32_36 = arith.constant 1 : i32
    %85 = arith.select %84, %c1_i32_36, %c16_i32_34 : i32
    %86 = vector.broadcast %85 : i32 to vector<32x128xi32>
    %87 = arith.remsi %83, %86 : vector<32x128xi32>
    %c0_i32_37 = arith.constant 0 : i32
    %88 = vector.broadcast %c0_i32_37 : i32 to vector<32x128xi32>
    %89 = arith.cmpi ne, %87, %88 : vector<32x128xi32>
    %c0_i32_38 = arith.constant 0 : i32
    %90 = vector.broadcast %c0_i32_38 : i32 to vector<32x128xi32>
    %91 = arith.cmpi slt, %87, %90 : vector<32x128xi32>
    %c0_i32_39 = arith.constant 0 : i32
    %92 = arith.cmpi slt, %85, %c0_i32_39 : i32
    %93 = vector.broadcast %92 : i1 to vector<32x128xi1>
    %94 = vector.broadcast %93 : vector<32x128xi1> to vector<32x128xi1>
    %95 = arith.xori %91, %94 : vector<32x128xi1>
    %96 = arith.andi %95, %89 : vector<32x128xi1>
    %97 = vector.broadcast %85 : i32 to vector<32x128xi32>
    %98 = arith.addi %87, %97 : vector<32x128xi32>
    %99 = arith.select %96, %98, %87 : vector<32x128xi1>, vector<32x128xi32>
    %c1_40 = arith.constant 1 : index
    %c0_41 = arith.constant 0 : index
    %c0_42 = arith.constant 0 : index
    %100 = vector.load %arg5[%c1_40, %c0_41, %c0_42] : memref<3x128x128xf32, #tpu.memory_space<vmem>>, vector<1x128x128xf32>
    %101 = vector.shape_cast %100 : vector<1x128x128xf32> to vector<128x128xf32>
    %cst_43 = arith.constant dense<0.000000e+00> : vector<32x128xf32>
    %102 = tpu.matmul %82, %101, %cst_43 {dimension_numbers = #tpu.dot_dimension_numbers<[1], [0], [0], [1], [0, 0, 1, 1], [], []>, precision = #tpu.contract_precision<fp32>} : vector<32x128xf32>, vector<128x128xf32>, vector<32x128xf32> -> vector<32x128xf32>
    %c0_i32_44 = arith.constant 0 : i32
    %103 = vector.broadcast %c0_i32_44 : i32 to vector<32x128xi32>
    %104 = arith.cmpi sgt, %99, %103 : vector<32x128xi32>
    %c1_i32_45 = arith.constant 1 : i32
    %105 = tpu.dynamic_rotate %82 by %c1_i32_45 dim 0 : vector<32x128xf32>, i32 -> vector<32x128xf32>
    %cst_46 = arith.constant 0.000000e+00 : f32
    %106 = vector.broadcast %cst_46 : f32 to vector<32x128xf32>
    %107 = arith.select %104, %105, %106 : vector<32x128xi1>, vector<32x128xf32>
    %c0_47 = arith.constant 0 : index
    %c0_48 = arith.constant 0 : index
    %c0_49 = arith.constant 0 : index
    %108 = vector.load %arg5[%c0_47, %c0_48, %c0_49] : memref<3x128x128xf32, #tpu.memory_space<vmem>>, vector<1x128x128xf32>
    %109 = vector.shape_cast %108 : vector<1x128x128xf32> to vector<128x128xf32>
    %cst_50 = arith.constant dense<0.000000e+00> : vector<32x128xf32>
    %110 = tpu.matmul %107, %109, %cst_50 {dimension_numbers = #tpu.dot_dimension_numbers<[1], [0], [0], [1], [0, 0, 1, 1], [], []>, precision = #tpu.contract_precision<fp32>} : vector<32x128xf32>, vector<128x128xf32>, vector<32x128xf32> -> vector<32x128xf32>
    %111 = arith.addf %102, %110 : vector<32x128xf32>
    %c15_i32_51 = arith.constant 15 : i32
    %112 = vector.broadcast %c15_i32_51 : i32 to vector<32x128xi32>
    %113 = arith.cmpi slt, %99, %112 : vector<32x128xi32>
    %c31_i32_52 = arith.constant 31 : i32
    %114 = tpu.dynamic_rotate %82 by %c31_i32_52 dim 0 : vector<32x128xf32>, i32 -> vector<32x128xf32>
    %cst_53 = arith.constant 0.000000e+00 : f32
    %115 = vector.broadcast %cst_53 : f32 to vector<32x128xf32>
    %116 = arith.select %113, %114, %115 : vector<32x128xi1>, vector<32x128xf32>
    %c2_54 = arith.constant 2 : index
    %c0_55 = arith.constant 0 : index
    %c0_56 = arith.constant 0 : index
    %117 = vector.load %arg5[%c2_54, %c0_55, %c0_56] : memref<3x128x128xf32, #tpu.memory_space<vmem>>, vector<1x128x128xf32>
    %118 = vector.shape_cast %117 : vector<1x128x128xf32> to vector<128x128xf32>
    %cst_57 = arith.constant dense<0.000000e+00> : vector<32x128xf32>
    %119 = tpu.matmul %116, %118, %cst_57 {dimension_numbers = #tpu.dot_dimension_numbers<[1], [0], [0], [1], [0, 0, 1, 1], [], []>, precision = #tpu.contract_precision<fp32>} : vector<32x128xf32>, vector<128x128xf32>, vector<32x128xf32> -> vector<32x128xf32>
    %120 = arith.addf %111, %119 : vector<32x128xf32>
    %c0_58 = arith.constant 0 : index
    %c0_59 = arith.constant 0 : index
    %121 = vector.load %arg6[%c0_58, %c0_59] : memref<1x128xf32, #tpu.memory_space<vmem>>, vector<1x128xf32>
    %122 = vector.broadcast %121 : vector<1x128xf32> to vector<32x128xf32>
    %123 = arith.addf %120, %122 : vector<32x128xf32>
    %c0_60 = arith.constant 0 : index
    %c0_61 = arith.constant 0 : index
    %124 = vector.load %arg7[%c0_60, %c0_61] : memref<1x128xf32, #tpu.memory_space<vmem>>, vector<1x128xf32>
    %c0_62 = arith.constant 0 : index
    %c0_63 = arith.constant 0 : index
    %125 = vector.load %arg8[%c0_62, %c0_63] : memref<1x128xf32, #tpu.memory_space<vmem>>, vector<1x128xf32>
    %cst_64 = arith.constant dense<0.000000e+00> : vector<128xf32>
    %126 = vector.multi_reduction <add>, %123, %cst_64 [0] : vector<32x128xf32> to vector<128xf32>
    %127 = vector.shape_cast %126 : vector<128xf32> to vector<1x128xf32>
    %c8_i32_65 = arith.constant 8 : i32
    %128 = tpu.dynamic_rotate %127 by %c8_i32_65 dim 1 : vector<1x128xf32>, i32 -> vector<1x128xf32>
    %129 = arith.addf %127, %128 : vector<1x128xf32>
    %c16_i32_66 = arith.constant 16 : i32
    %130 = tpu.dynamic_rotate %129 by %c16_i32_66 dim 1 : vector<1x128xf32>, i32 -> vector<1x128xf32>
    %131 = arith.addf %129, %130 : vector<1x128xf32>
    %c32_i32_67 = arith.constant 32 : i32
    %132 = tpu.dynamic_rotate %131 by %c32_i32_67 dim 1 : vector<1x128xf32>, i32 -> vector<1x128xf32>
    %133 = arith.addf %131, %132 : vector<1x128xf32>
    %c64_i32_68 = arith.constant 64 : i32
    %134 = tpu.dynamic_rotate %133 by %c64_i32_68 dim 1 : vector<1x128xf32>, i32 -> vector<1x128xf32>
    %135 = arith.addf %133, %134 : vector<1x128xf32>
    %136 = arith.mulf %123, %123 : vector<32x128xf32>
    %cst_69 = arith.constant dense<0.000000e+00> : vector<128xf32>
    %137 = vector.multi_reduction <add>, %136, %cst_69 [0] : vector<32x128xf32> to vector<128xf32>
    %138 = vector.shape_cast %137 : vector<128xf32> to vector<1x128xf32>
    %c8_i32_70 = arith.constant 8 : i32
    %139 = tpu.dynamic_rotate %138 by %c8_i32_70 dim 1 : vector<1x128xf32>, i32 -> vector<1x128xf32>
    %140 = arith.addf %138, %139 : vector<1x128xf32>
    %c16_i32_71 = arith.constant 16 : i32
    %141 = tpu.dynamic_rotate %140 by %c16_i32_71 dim 1 : vector<1x128xf32>, i32 -> vector<1x128xf32>
    %142 = arith.addf %140, %141 : vector<1x128xf32>
    %c32_i32_72 = arith.constant 32 : i32
    %143 = tpu.dynamic_rotate %142 by %c32_i32_72 dim 1 : vector<1x128xf32>, i32 -> vector<1x128xf32>
    %144 = arith.addf %142, %143 : vector<1x128xf32>
    %c64_i32_73 = arith.constant 64 : i32
    %145 = tpu.dynamic_rotate %144 by %c64_i32_73 dim 1 : vector<1x128xf32>, i32 -> vector<1x128xf32>
    %146 = arith.addf %144, %145 : vector<1x128xf32>
    %cst_74 = arith.constant 0.001953125 : f32
    %147 = vector.broadcast %cst_74 : f32 to vector<1x128xf32>
    %148 = arith.mulf %135, %147 : vector<1x128xf32>
    %cst_75 = arith.constant 0.001953125 : f32
    %149 = vector.broadcast %cst_75 : f32 to vector<1x128xf32>
    %150 = arith.mulf %146, %149 : vector<1x128xf32>
    %151 = arith.mulf %148, %148 : vector<1x128xf32>
    %152 = arith.subf %150, %151 : vector<1x128xf32>
    %cst_76 = arith.constant 9.99999974E-6 : f32
    %153 = vector.broadcast %cst_76 : f32 to vector<1x128xf32>
    %154 = arith.addf %152, %153 : vector<1x128xf32>
    %155 = math.rsqrt %154 : vector<1x128xf32>
    %156 = arith.mulf %124, %155 : vector<1x128xf32>
    %157 = arith.mulf %148, %156 : vector<1x128xf32>
    %158 = arith.subf %125, %157 : vector<1x128xf32>
    %159 = vector.broadcast %156 : vector<1x128xf32> to vector<32x128xf32>
    %160 = arith.mulf %123, %159 : vector<32x128xf32>
    %161 = vector.broadcast %158 : vector<1x128xf32> to vector<32x128xf32>
    %162 = arith.addf %160, %161 : vector<32x128xf32>
    %c0_77 = arith.constant 0 : index
    %c0_78 = arith.constant 0 : index
    %163 = vector.load %arg9[%c0_77, %c0_78] : memref<64x128xf32, #tpu.memory_space<vmem>>, vector<64x128xf32>
    %cst_79 = arith.constant dense<0.000000e+00> : vector<32x128xf32>
    %164 = tpu.matmul %0, %163, %cst_79 {dimension_numbers = #tpu.dot_dimension_numbers<[1], [0], [0], [1], [0, 0, 1, 1], [], []>, precision = #tpu.contract_precision<fp32>} : vector<32x64xf32>, vector<64x128xf32>, vector<32x128xf32> -> vector<32x128xf32>
    %c0_80 = arith.constant 0 : index
    %c0_81 = arith.constant 0 : index
    %165 = vector.load %arg10[%c0_80, %c0_81] : memref<1x128xf32, #tpu.memory_space<vmem>>, vector<1x128xf32>
    %166 = vector.broadcast %165 : vector<1x128xf32> to vector<32x128xf32>
    %167 = arith.addf %164, %166 : vector<32x128xf32>
    %c0_82 = arith.constant 0 : index
    %c0_83 = arith.constant 0 : index
    %168 = vector.load %arg11[%c0_82, %c0_83] : memref<1x128xf32, #tpu.memory_space<vmem>>, vector<1x128xf32>
    %c0_84 = arith.constant 0 : index
    %c0_85 = arith.constant 0 : index
    %169 = vector.load %arg12[%c0_84, %c0_85] : memref<1x128xf32, #tpu.memory_space<vmem>>, vector<1x128xf32>
    %cst_86 = arith.constant dense<0.000000e+00> : vector<128xf32>
    %170 = vector.multi_reduction <add>, %167, %cst_86 [0] : vector<32x128xf32> to vector<128xf32>
    %171 = vector.shape_cast %170 : vector<128xf32> to vector<1x128xf32>
    %c8_i32_87 = arith.constant 8 : i32
    %172 = tpu.dynamic_rotate %171 by %c8_i32_87 dim 1 : vector<1x128xf32>, i32 -> vector<1x128xf32>
    %173 = arith.addf %171, %172 : vector<1x128xf32>
    %c16_i32_88 = arith.constant 16 : i32
    %174 = tpu.dynamic_rotate %173 by %c16_i32_88 dim 1 : vector<1x128xf32>, i32 -> vector<1x128xf32>
    %175 = arith.addf %173, %174 : vector<1x128xf32>
    %c32_i32_89 = arith.constant 32 : i32
    %176 = tpu.dynamic_rotate %175 by %c32_i32_89 dim 1 : vector<1x128xf32>, i32 -> vector<1x128xf32>
    %177 = arith.addf %175, %176 : vector<1x128xf32>
    %c64_i32_90 = arith.constant 64 : i32
    %178 = tpu.dynamic_rotate %177 by %c64_i32_90 dim 1 : vector<1x128xf32>, i32 -> vector<1x128xf32>
    %179 = arith.addf %177, %178 : vector<1x128xf32>
    %180 = arith.mulf %167, %167 : vector<32x128xf32>
    %cst_91 = arith.constant dense<0.000000e+00> : vector<128xf32>
    %181 = vector.multi_reduction <add>, %180, %cst_91 [0] : vector<32x128xf32> to vector<128xf32>
    %182 = vector.shape_cast %181 : vector<128xf32> to vector<1x128xf32>
    %c8_i32_92 = arith.constant 8 : i32
    %183 = tpu.dynamic_rotate %182 by %c8_i32_92 dim 1 : vector<1x128xf32>, i32 -> vector<1x128xf32>
    %184 = arith.addf %182, %183 : vector<1x128xf32>
    %c16_i32_93 = arith.constant 16 : i32
    %185 = tpu.dynamic_rotate %184 by %c16_i32_93 dim 1 : vector<1x128xf32>, i32 -> vector<1x128xf32>
    %186 = arith.addf %184, %185 : vector<1x128xf32>
    %c32_i32_94 = arith.constant 32 : i32
    %187 = tpu.dynamic_rotate %186 by %c32_i32_94 dim 1 : vector<1x128xf32>, i32 -> vector<1x128xf32>
    %188 = arith.addf %186, %187 : vector<1x128xf32>
    %c64_i32_95 = arith.constant 64 : i32
    %189 = tpu.dynamic_rotate %188 by %c64_i32_95 dim 1 : vector<1x128xf32>, i32 -> vector<1x128xf32>
    %190 = arith.addf %188, %189 : vector<1x128xf32>
    %cst_96 = arith.constant 0.001953125 : f32
    %191 = vector.broadcast %cst_96 : f32 to vector<1x128xf32>
    %192 = arith.mulf %179, %191 : vector<1x128xf32>
    %cst_97 = arith.constant 0.001953125 : f32
    %193 = vector.broadcast %cst_97 : f32 to vector<1x128xf32>
    %194 = arith.mulf %190, %193 : vector<1x128xf32>
    %195 = arith.mulf %192, %192 : vector<1x128xf32>
    %196 = arith.subf %194, %195 : vector<1x128xf32>
    %cst_98 = arith.constant 9.99999974E-6 : f32
    %197 = vector.broadcast %cst_98 : f32 to vector<1x128xf32>
    %198 = arith.addf %196, %197 : vector<1x128xf32>
    %199 = math.rsqrt %198 : vector<1x128xf32>
    %200 = arith.mulf %168, %199 : vector<1x128xf32>
    %201 = arith.mulf %192, %200 : vector<1x128xf32>
    %202 = arith.subf %169, %201 : vector<1x128xf32>
    %203 = vector.broadcast %200 : vector<1x128xf32> to vector<32x128xf32>
    %204 = arith.mulf %167, %203 : vector<32x128xf32>
    %205 = vector.broadcast %202 : vector<1x128xf32> to vector<32x128xf32>
    %206 = arith.addf %204, %205 : vector<32x128xf32>
    %207 = arith.addf %162, %206 : vector<32x128xf32>
    %cst_99 = arith.constant 0.000000e+00 : f32
    %208 = vector.broadcast %cst_99 : f32 to vector<32x128xf32>
    %209 = arith.maximumf %207, %208 : vector<32x128xf32>
    %c0_100 = arith.constant 0 : index
    %c0_101 = arith.constant 0 : index
    %210 = vector.load %arg13[%c0_100, %c0_101] : memref<32x128xf32, #tpu.memory_space<vmem>>, vector<32x128xf32>
    tpu.vector_store %arg13[%c0_100, %c0_101], %209 {strides = array<i32>} : memref<32x128xf32, #tpu.memory_space<vmem>>, vector<32x128xf32>,
    return
  }
}

</mosaic_0001>

<bundles_post_ra>
// kernel: custom_resnet_block.1
= control target key start
LH: loop header
LB: loop body
LE: loop exit
PB: predicated region body
PF: predicated region fallthrough
CT: control target
= control target key end

     0   :  { %v48_v3 = vlaneseq  ;;  %vm135_vm1 = vcmask 523264   ;;  %v5580_v46 = vmov 0  ;;  %v5583_v62 = vmov 0  ;;  %s3268_s29 = smov 16   ;;  %s3269_s30 = smov 32   ;;  %s5520_s1 = inlined_call_operand.vmem [shape: f32[3,64,128], index: 1, kind: input, shape index: {}]   ;;  %s5521_s0 = inlined_call_operand.vmem [shape: f32[32,64], index: 0, kind: input, shape index: {}]   ;;  %s5522_s2 = inlined_call_operand.vmem [shape: f32[1,128], index: 2, kind: input, shape index: {}]   ;;  %s5523_s5 = inlined_call_operand.vmem [shape: f32[3,128,128], index: 5, kind: input, shape index: {}]   ;;  %s5524_s3 = inlined_call_operand.vmem [shape: f32[1,128], index: 3, kind: input, shape index: {}]   ;;  %s5525_s4 = inlined_call_operand.vmem [shape: f32[1,128], index: 4, kind: input, shape index: {}]   ;;  %s5526_s9 = inlined_call_operand.vmem [shape: f32[64,128], index: 9, kind: input, shape index: {}]   ;;  %s5527_s6 = inlined_call_operand.vmem [shape: f32[1,128], index: 6, kind: input, shape index: {}]   ;;  %s5528_s10 = inlined_call_operand.vmem [shape: f32[1,128], index: 10, kind: input, shape index: {}]   ;;  %s5529_s7 = inlined_call_operand.vmem [shape: f32[1,128], index: 7, kind: input, shape index: {}]   ;;  %s5530_s8 = inlined_call_operand.vmem [shape: f32[1,128], index: 8, kind: input, shape index: {}]   ;;  %s5531_s11 = inlined_call_operand.vmem [shape: f32[1,128], index: 11, kind: input, shape index: {}]   ;;  %s5532_s12 = inlined_call_operand.vmem [shape: f32[1,128], index: 12, kind: input, shape index: {}]   ;;  %s5533_s13 = inlined_call_operand.vmem [shape: f32[32,128], index: 13, kind: output, shape index: {}]  }
   0x1   :  { %v134_v0 = vld [vmem:[%s5520_s1 + $0x38] sm:$0xff]  ;;  %v133_v1 = vld [vmem:[%s5520_s1 + $0x30] sm:$0xff]  ;;  %v132_v2 = vld [vmem:[%s5520_s1 + $0x28] sm:$0xff]  ;;  %s3270_s14 = smov 64  }
   0x2   :  { %v3350_v4 = vand.u32 4294901760, %v134_v0  ;;  %v3352_v5 = vand.u32 4294901760, %v133_v1  ;;  %v3354_v6 = vand.u32 4294901760, %v132_v2  ;;  %v131_v7 = vld [vmem:[%s5520_s1 + $0x20] sm:$0xff]  ;;  %v130_v8 = vld [vmem:[%s5520_s1 + $0x18] sm:$0xff]  ;;  %v129_v9 = vld [vmem:[%s5520_s1 + $0x10] sm:$0xff] }
   0x3   :  { %v3365_v10 = vand.u32 4294901760, %v131_v7  ;;  %v3367_v11 = vand.u32 4294901760, %v130_v8  ;;  %v3369_v12 = vand.u32 4294901760, %v129_v9  ;;  %v128_v13 = vld [vmem:[%s5520_s1 + $0x8] sm:$0xff]  ;;  %v127_v14 = vld [vmem:[%s5520_s1] sm:$0xff]  ;;  %v3398_v20 = vld [vmem:[%s5521_s0 + $0x10] sm:$0xff] }
   0x4   :  { %v3380_v15 = vld [vmem:[%s5521_s0 + $0x8] sm:$0xff]  ;;  %3238 = vmatpush.msra.mxu2 %v3350_v4  ;;  %v3384_v16 = vsub.f32 %v134_v0, %v3350_v4  ;;  %v3387_v17 = vsub.f32 %v133_v1, %v3352_v5  ;;  %v3390_v18 = vsub.f32 %v132_v2, %v3354_v6  ;;  %v3392_v19 = vand.u32 4294901760, %v128_v13  ;;  %157 = vmatpush.msra.mxu0 %v3350_v4  ;;  %v3442_v39 = vld [vmem:[%s5521_s0 + $0x18] sm:$0xff]  ;;  %v3452_v43 = vld [vmem:[%s5521_s0] sm:$0xff] }
   0x5   :  { %v3401_v21 = vsub.f32 %v131_v7, %v3365_v10  ;;  %v3403_v22 = vand.u32 4294901760, %v127_v14  ;;  %v3406_v23 = vsub.f32 %v130_v8, %v3367_v11  ;;  %v3408_v24 = vshrl.u32 %v48_v3, 7 }
   0x6   :  { %3239 = vmatpush.msra.mxu2 %v3352_v5  ;;  %v215_v25 = vand.u32 4294901760, %v3384_v16  ;;  %v221_v26 = vand.u32 4294901760, %v3387_v17  ;;  %v227_v27 = vand.u32 4294901760, %v3390_v18  ;;  %v115_v28 = vrot.slane %v3380_v15, 7  ;;  %159 = vmatpush.msra.mxu0 %v3352_v5 }
   0x7   :  { %5579 = vst [vmem:[#allocation2_spill] sm:$0xff] %v3408_v24  ;;  %v233_v29 = vand.u32 4294901760, %v3401_v21  ;;  %v239_v30 = vand.u32 4294901760, %v3406_v23  ;;  %v51_v31 = vadd.s32 16, %v3408_v24  ;;  %v116_v32 = vrot.slane %v3398_v20, 7 }
   0x8   :  { %3240 = vmatpush.msra.mxu2 %v3354_v6  ;;  %v216_v33 = vsub.f32 %v3384_v16, %v215_v25  ;;  %v222_v34 = vsub.f32 %v3387_v17, %v221_v26  ;;  %v228_v35 = vsub.f32 %v3390_v18, %v227_v27  ;;  %vm118_vm0 = vcmp.lt.s32.totalorder %v3408_v24, 1  ;;  %161 = vmatpush.msra.mxu0 %v3354_v6 }
   0x9   :  { %v234_v36 = vsub.f32 %v3401_v21, %v233_v29  ;;  %v71_v37 = vand.u32 15, %v51_v31  ;;  %v120_v38 = vsel %vm118_vm0, %v115_v28, %v116_v32  ;;  %v240_v42 = vsub.f32 %v3406_v23, %v239_v30 }
   0xa   :  { %3241 = vmatpush.msra.mxu2 %v3365_v10  ;;  %v217_v40 = vand.u32 4294901760, %v216_v33  ;;  %v223_v41 = vand.u32 4294901760, %v222_v34  ;;  %163 = vmatpush.msra.mxu0 %v3365_v10  ;;  %v229_v44 = vand.u32 4294901760, %v228_v35  ;;  %v3459_v47 = vsub.f32 %v129_v9, %v3369_v12 }
   0xb   :  { %v235_v45 = vand.u32 4294901760, %v234_v36  ;;  %vm3454_vm2 = vcmp.gt.s32.totalorder %v71_v37, 0  ;;  %v3465_v49 = vsub.f32 %v128_v13, %v3392_v19  ;;  %v3468_v50 = vsub.f32 %v127_v14, %v3403_v22 }
   0xc   :  { %v5581_v46 = vsel %vm3454_vm2, 4294967295, %v5580_v46  ;;  %3246 = vmatpush.msra.mxu3 %v217_v40  ;;  %3242 = vmatpush.msra.mxu2 %v3367_v11  ;;  %v125_v48 = vsel %vm3454_vm2, %v120_v38, 0.0  ;;  %v117_v51 = vrot.slane %v3442_v39, 7  ;;  %v245_v53 = vand.u32 4294901760, %v3459_v47 }
   0xd   :  { %5582 = vst [vmem:[#allocation3_spill] sm:$0xff] %v5581_v46  ;;  %218 = vmatpush.msra.mxu1 %v217_v40  ;;  %v143_v52 = vsel %vm135_vm1, %v125_v48, 0  ;;  %165 = vmatpush.msra.mxu0 %v3367_v11  ;;  %v57_v54 = vand.u32 15, %v3408_v24  ;;  %v114_v55 = vrot.slane %v3452_v43, 7  ;;  %v251_v57 = vand.u32 4294901760, %v3465_v49 }
   0xe   :  { %3247 = vmatpush.msra.mxu3 %v223_v41  ;;  %3243 = vmatpush.msra.mxu2 %v3369_v12  ;;  %v3477_v56 = vand.u32 4294901760, %v143_v52  ;;  %v257_v58 = vand.u32 4294901760, %v3468_v50  ;;  %v119_v59 = vsel %vm118_vm0, %v116_v32, %v117_v51  ;;  %v246_v60 = vsub.f32 %v3459_v47, %v245_v53 }
   0xf   :  { %224 = vmatpush.msra.mxu1 %v223_v41  ;;  %v146_v61 = vsel %vm135_vm1, %v119_v59, 0  ;;  %167 = vmatpush.msra.mxu0 %v3369_v12  ;;  %vm3488_vm3 = vcmp.gt.s32.totalorder %v57_v54, 0  ;;  %v122_v63 = vsel %vm118_vm0, %v117_v51, %v114_v55  ;;  %v241_v0 = vand.u32 4294901760, %v240_v42 }
  0x10   :  { %v5584_v62 = vsel %vm3488_vm3, 4294967295, %v5583_v62  ;;  %3248 = vmatpush.msra.mxu3 %v229_v44  ;;  %3244 = vmatpush.msra.mxu2 %v3392_v19  ;;  %v3496_v1 = vsub.f32 %v143_v52, %v3477_v56  ;;  %v252_v2 = vsub.f32 %v3465_v49, %v251_v57  ;;  %v3501_v3 = vand.u32 4294901760, %v146_v61 }
  0x11   :  { %5585 = vst [vmem:[#allocation4_spill] sm:$0xff] %v5584_v62  ;;  %230 = vmatpush.msra.mxu1 %v229_v44  ;;  %169 = vmatpush.msra.mxu0 %v3392_v19  ;;  %v123_v7 = vsel %vm3488_vm3, %v122_v63, 0.0  ;;  %v247_v9 = vand.u32 4294901760, %v246_v60  ;;  %v258_v13 = vsub.f32 %v3468_v50, %v257_v58  ;;  %v121_v33 = vsel %vm118_vm0, %v114_v55, %v115_v28  ;;  %v3197_v28 = vld [vmem:[%s5520_s1 + $0x78] sm:$0xff]  ;;  %v3195_v55 = vld [vmem:[%s5520_s1 + $0x68] sm:$0xff] }
  0x12   :  { %3249 = vmatpush.msra.mxu3 %v235_v45  ;;  %3245 = vmatpush.msra.mxu2 %v3403_v22  ;;  %v190_v8 = vand.u32 4294901760, %v3496_v1  ;;  %v3512_v14 = vsub.f32 %v146_v61, %v3501_v3  ;;  %v253_v31 = vand.u32 4294901760, %v252_v2  ;;  %v137_v32 = vsel %vm135_vm1, %v123_v7, 0  ;;  %v3194_v61 = vld [vmem:[%s5520_s1 + $0x60] sm:$0xff]  ;;  %v3193_v2 = vld [vmem:[%s5520_s1 + $0x58] sm:$0xff] }
  0x13   :  { %236 = vmatpush.msra.mxu1 %v235_v45  ;;  %171 = vmatpush.msra.mxu0 %v3403_v22  ;;  %v3525_v36 = vand.u32 4294901760, %v137_v32  ;;  %v140_v37 = vsel %vm135_vm1, %v121_v33, 0  ;;  %v259_v41 = vand.u32 4294901760, %v258_v13  ;;  %v3196_v45 = vld [vmem:[%s5520_s1 + $0x70] sm:$0xff]  ;;  %vm828_vm4 = vcmp.lt.s32.totalorder %v3408_v24, 7 }
  0x14   :  { %288 = vmatpush.msrb.mxu2 %v3384_v16  ;;  %3250 = vmatpush.msra.mxu3 %v241_v0  ;;  %v191_v34 = vsub.f32 %v3496_v1, %v190_v8  ;;  %v198_v35 = vand.u32 4294901760, %v3512_v14  ;;  %v3532_v38 = vand.u32 4294901760, %v140_v37  ;;  %v3550_v16 = vand.u32 4294901760, %v3197_v28  ;;  %v3192_v33 = vld [vmem:[%s5520_s1 + $0x50] sm:$0xff] }
  0x15   :  { %242 = vmatpush.msra.mxu1 %v241_v0  ;;  %v3535_v42 = vsub.f32 %v137_v32, %v3525_v36  ;;  %391 = vmatpush.msrb.mxu0 %v215_v25  ;;  %v3559_v54 = vand.u32 4294901760, %v3196_v45  ;;  %v3602_v32 = vand.u32 4294901760, %v3193_v2 }
  0x16   :  { %291 = vmatpush.msrb.mxu2 %v3387_v17  ;;  %v192_v40 = vand.u32 4294901760, %v191_v34  ;;  %3251 = vmatpush.msra.mxu3 %v247_v9  ;;  %v3541_v44 = vsub.f32 %v140_v37, %v3532_v38  ;;  %v199_v48 = vsub.f32 %v3512_v14, %v198_v35  ;;  %v3568_v17 = vsub.f32 %v3197_v28, %v3550_v16 }
  0x17   :  { %248 = vmatpush.msra.mxu1 %v247_v9  ;;  %v174_v51 = vand.u32 4294901760, %v3535_v42  ;;  %395 = vmatpush.msrb.mxu0 %v221_v26  ;;  %v3572_v26 = vand.u32 4294901760, %v3195_v55  ;;  %v3582_v0 = vsub.f32 %v3196_v45, %v3559_v54  ;;  %v3591_v9 = vand.u32 4294901760, %v3194_v61 }
  0x18   :  { %294 = vmatpush.msrb.mxu2 %v3390_v18  ;;  %3252 = vmatpush.msra.mxu3 %v253_v31  ;;  %v182_v52 = vand.u32 4294901760, %v3541_v44  ;;  %v200_v59 = vand.u32 4294901760, %v199_v48  ;;  %v557_v7 = vand.u32 4294901760, %v3568_v17  ;;  %v3621_v34 = vand.u32 4294901760, %v3192_v33 }
  0x19   :  { %193 = vmatmul.f32.vlgmr.msra.gmra.mxu2 %v192_v40  ;;  %254 = vmatpush.msra.mxu1 %v253_v31  ;;  %v175_v25 = vsub.f32 %v3535_v42, %v174_v51  ;;  %v3596_v13 = vsub.f32 %v3195_v55, %v3572_v26  ;;  %v563_v31 = vand.u32 4294901760, %v3582_v0  ;;  %v3616_v18 = vsub.f32 %v3194_v61, %v3591_v9 }
  0x1a   :  { %297 = vmatpush.msrb.mxu2 %v3401_v21  ;;  %3253 = vmatpush.msra.mxu3 %v259_v41  ;;  %v183_v63 = vsub.f32 %v3541_v44, %v182_v52 }
  0x1b   :  { %270 = vmatmul.f32.vlgmr.msra.gmra.mxu3 %v3477_v56  ;;  %260 = vmatpush.msra.mxu1 %v259_v41  ;;  %v176_v60 = vand.u32 4294901760, %v175_v25  ;;  %v564_v21 = vsub.f32 %v3582_v0, %v563_v31  ;;  %v575_v28 = vand.u32 4294901760, %v3616_v18 }
  0x1c   :  { %300 = vmatpush.msrb.mxu2 %v3406_v23  ;;  %340 = vmatpush.msrb.mxu3 %v3350_v4 }
  0x1d   :  { %262 = vmatmul.f32.vlgmr.msra.gmra.mxu1 %v3525_v36  ;;  %177 = vmatmul.f32.vlgmr.msra.gmra.mxu0 %v176_v60  ;;  %v565_v41 = vand.u32 4294901760, %v564_v21  ;;  %v3203_v21 = vld [vmem:[%s5520_s1 + $0xa8] sm:$0xff] }
  0x1e   :  { %303 = vmatpush.msrb.mxu2 %v3459_v47  ;;  %342 = vmatpush.msrb.mxu3 %v3352_v5 }
  0x1f   :  { %446 = vmatpush.msrb.mxu1 %v3350_v4  ;;  %399 = vmatpush.msrb.mxu0 %v227_v27  ;;  %v184_v4 = vand.u32 4294901760, %v183_v63  ;;  %v569_v27 = vand.u32 4294901760, %v3596_v13 }
  0x20   :  { %306 = vmatpush.msrb.mxu2 %v3465_v49  ;;  %344 = vmatpush.msrb.mxu3 %v3354_v6 }
  0x21   :  { %201 = vmatmul.f32.gmra.mxu2 %v200_v59  ;;  %448 = vmatpush.msrb.mxu1 %v3352_v5  ;;  %v558_v5 = vsub.f32 %v3568_v17, %v557_v7  ;;  %v570_v23 = vsub.f32 %v3596_v13, %v569_v27 }
  0x22   :  { %309 = vmatpush.msrb.mxu2 %v3468_v50  ;;  %346 = vmatpush.msrb.mxu3 %v3365_v10 }
  0x23   :  { %274 = vmatmul.f32.gmra.mxu3 %v3501_v3  ;;  %450 = vmatpush.msrb.mxu1 %v3354_v6  ;;  %v3191_v6 = vld [vmem:[%s5520_s1 + $0x48] sm:$0xff]  ;;  %v559_v37 = vand.u32 4294901760, %v558_v5 }
  0x24   :  { %348 = vmatpush.msrb.mxu3 %v3367_v11  ;;  %403 = vmatpush.msrb.mxu0 %v233_v29  ;;  %v3631_v29 = vsub.f32 %v3193_v2, %v3602_v32  ;;  %v3642_v40 = vand.u32 4294901760, %v3191_v6  ;;  %v3204_v2 = vld [vmem:[%s5520_s1 + $0xb0] sm:$0xff] }
  0x25   :  { %499 = vmatpush.msra.mxu2 %v3550_v16  ;;  %452 = vmatpush.msrb.mxu1 %v3365_v10  ;;  %v3190_v10 = vld [vmem:[%s5520_s1 + $0x40] sm:$0xff] }
  0x26   :  { %350 = vmatpush.msrb.mxu3 %v3369_v12  ;;  %185 = vmatmul.f32.gmra.mxu0 %v184_v4  ;;  %v581_v45 = vand.u32 4294901760, %v3631_v29  ;;  %v3656_v48 = vand.u32 4294901760, %v3190_v10  ;;  %v3667_v47 = vsub.f32 %v3191_v6, %v3642_v40  ;;  %v482_v4 = vsel %vm135_vm1, %v3380_v15, 0 }
  0x27   :  { %266 = vmatmul.f32.gmra.mxu1 %v3532_v38  ;;  %407 = vmatpush.msrb.mxu0 %v239_v30  ;;  %v3651_v30 = vsub.f32 %v3192_v33, %v3621_v34  ;;  %v3730_v33 = vand.u32 4294901760, %v3204_v2 }
  0x28   :  { %352 = vmatpush.msrb.mxu3 %v3392_v19  ;;  %454 = vmatpush.msrb.mxu1 %v3367_v11  ;;  %v576_v11 = vsub.f32 %v3616_v18, %v575_v28  ;;  %v3678_v49 = vsub.f32 %v3190_v10, %v3656_v48 }
  0x29   :  { %312 = vmatmul.f32.vlgmr.msrb.gmra.mxu2 %v3535_v42  ;;  %411 = vmatpush.msrb.mxu0 %v245_v53  ;;  %v571_v53 = vand.u32 4294901760, %v570_v23  ;;  %v587_v42 = vand.u32 4294901760, %v3651_v30  ;;  %v3739_v6 = vsub.f32 %v3204_v2, %v3730_v33  ;;  %v3750_v23 = vand.u32 4294901760, %v3203_v21  ;;  %v3199_v2 = vld [vmem:[%s5520_s1 + $0x88] sm:$0xff] }
  0x2a   :  { %354 = vmatpush.msrb.mxu3 %v3403_v22  ;;  %501 = vmatpush.msra.mxu2 %v3559_v54 }
  0x2b   :  { %358 = vmatmul.f32.vlgmr.msrb.gmra.mxu3 %v174_v51  ;;  %456 = vmatpush.msrb.mxu1 %v3369_v12  ;;  %v582_v12 = vsub.f32 %v3631_v29, %v581_v45  ;;  %v588_v50 = vsub.f32 %v3651_v30, %v587_v42  ;;  %v3205_v51 = vld [vmem:[%s5520_s1 + $0xb8] sm:$0xff] }
  0x2c   :  { %560 = vmatpush.msra.mxu3 %v559_v37  ;;  %415 = vmatpush.msrb.mxu0 %v251_v57  ;;  %v593_v57 = vand.u32 4294901760, %v3667_v47  ;;  %v3706_v59 = vand.u32 4294901760, %v3205_v51  ;;  %v3748_v37 = vand.u32 4294901760, %v482_v4 }
  0x2d   :  { %458 = vmatpush.msrb.mxu1 %v3392_v19  ;;  %503 = vmatpush.msra.mxu2 %v3572_v26  ;;  %v577_v19 = vand.u32 4294901760, %v576_v11  ;;  %v3202_v11 = vld [vmem:[%s5520_s1 + $0xa0] sm:$0xff] }
  0x2e   :  { %566 = vmatpush.msra.mxu3 %v565_v41  ;;  %419 = vmatpush.msrb.mxu0 %v257_v58  ;;  %v479_v58 = vsel %vm135_vm1, %v3452_v43, 0  ;;  %v594_v25 = vsub.f32 %v3667_v47, %v593_v57  ;;  %v3715_v60 = vsub.f32 %v3205_v51, %v3706_v59  ;;  %5589 = vst [vmem:[#allocation8_spill] sm:$0xff] %v3748_v37 }
  0x2f   :  { %460 = vmatpush.msrb.mxu1 %v3403_v22  ;;  %421 = vmatmul.f32.vlgmr.msrb.gmra.mxu0 %v3525_v36  ;;  %v583_v22 = vand.u32 4294901760, %v582_v12  ;;  %v3704_v55 = vand.u32 4294901760, %v479_v58 }
  0x30   :  { %462 = vmatmul.f32.vlgmr.msrb.gmra.mxu1 %v3525_v36  ;;  %572 = vmatpush.msra.mxu3 %v571_v53  ;;  %v599_v36 = vand.u32 4294901760, %v3678_v49  ;;  %v595_v61 = vand.u32 4294901760, %v594_v25  ;;  %v925_v5 = vand.u32 4294901760, %v3715_v60  ;;  %v3779_v53 = vand.u32 4294901760, %v3202_v11  ;;  %v3200_v25 = vld [vmem:[%s5520_s1 + $0x90] sm:$0xff] }
  0x31   :  { %317 = vmatmul.f32.gmra.mxu2 %v3541_v44  ;;  %630 = vmatpush.msra.mxu0 %v3568_v17  ;;  %5586 = vst [vmem:[#allocation5_spill] sm:$0xff] %v3704_v55  ;;  %v589_v44 = vand.u32 4294901760, %v588_v50  ;;  %v3722_v63 = vsub.f32 %v479_v58, %v3704_v55  ;;  %v3767_v17 = vsub.f32 %v482_v4, %v3748_v37 }
  0x32   :  { %505 = vmatpush.msra.mxu2 %v3591_v9  ;;  %682 = vmatpush.msra.mxu1 %v3550_v16 }
  0x33   :  { %364 = vmatmul.f32.gmra.mxu3 %v182_v52  ;;  %633 = vmatpush.msra.mxu0 %v3582_v0  ;;  %v600_v52 = vsub.f32 %v3678_v49, %v599_v36  ;;  %5587 = vst [vmem:[#allocation6_spill] sm:$0xff] %v3722_v63  ;;  %v3746_v10 = vand.u32 4294901760, %v3722_v63  ;;  %v3201_v0 = vld [vmem:[%s5520_s1 + $0x98] sm:$0xff]  ;;  %v3800_v58 = vand.u32 4294901760, %v3767_v17 }
  0x34   :  { %578 = vmatpush.msra.mxu3 %v577_v19  ;;  %507 = vmatpush.msra.mxu2 %v3602_v32  ;;  %5590 = vst [vmem:[#allocation9_spill] sm:$0xff] %v3767_v17 }
  0x35   :  { %684 = vmatpush.msra.mxu1 %v3559_v54  ;;  %636 = vmatpush.msra.mxu0 %v3596_v13  ;;  %5588 = vst [vmem:[#allocation7_spill] sm:$0xff] %v3746_v10  ;;  %v517_v41 = vsub.f32 %v3722_v63, %v3746_v10 }
  0x36   :  { %584 = vmatpush.msra.mxu3 %v583_v22  ;;  %509 = vmatpush.msra.mxu2 %v3621_v34  ;;  %5592 = vst [vmem:[#allocation11_spill] sm:$0xff] %v3800_v58 }
  0x37   :  { %425 = vmatmul.f32.gmra.mxu0 %v3532_v38  ;;  %686 = vmatpush.msra.mxu1 %v3572_v26 }
  0x38   :  { %466 = vmatmul.f32.gmra.mxu1 %v3532_v38  ;;  %590 = vmatpush.msra.mxu3 %v589_v44  ;;  %v601_v38 = vand.u32 4294901760, %v600_v52  ;;  %v825_v44 = vrot.slane %v3380_v15, 1  ;;  %v824_v52 = vrot.slane %v3452_v43, 1 }
  0x39   :  { %322 = vmatmul.f32.gmra.mxu2 %v3496_v1  ;;  %639 = vmatpush.msra.mxu0 %v3616_v18  ;;  %v926_v1 = vsub.f32 %v3715_v60, %v925_v5 }
  0x3a   :  { %511 = vmatpush.msra.mxu2 %v3642_v40  ;;  %688 = vmatpush.msra.mxu1 %v3591_v9 }
  0x3b   :  { %370 = vmatmul.f32.gmra.mxu3 %v190_v8  ;;  %642 = vmatpush.msra.mxu0 %v3631_v29  ;;  %v931_v8 = vand.u32 4294901760, %v3739_v6  ;;  %v927_v12 = vand.u32 4294901760, %v926_v1 }
  0x3c   :  { %596 = vmatpush.msra.mxu3 %v595_v61  ;;  %513 = vmatpush.msra.mxu2 %v3656_v48  ;;  %v525_v61 = vsub.f32 %v3767_v17, %v3800_v58 }
  0x3d   :  { %690 = vmatpush.msra.mxu1 %v3602_v32  ;;  %645 = vmatpush.msra.mxu0 %v3651_v30  ;;  %v932_v19 = vsub.f32 %v3739_v6, %v931_v8 }
  0x3e   :  { %602 = vmatpush.msra.mxu3 %v601_v38  ;;  %733 = vmatpush.msrb.mxu2 %v557_v7  ;;  %v3770_v7 = vsub.f32 %v3203_v21, %v3750_v23  ;;  %v3850_v21 = vand.u32 4294901760, %v3199_v2 }
  0x3f   :  { %429 = vmatmul.f32.gmra.mxu0 %v3477_v56  ;;  %692 = vmatpush.msra.mxu1 %v3621_v34 }
  0x40   :  { %470 = vmatmul.f32.gmra.mxu1 %v3477_v56  ;;  %648 = vmatpush.msra.mxu0 %v3667_v47  ;;  %v485_v56 = vsel %vm135_vm1, %v3398_v20, 0  ;;  %v937_v50 = vand.u32 4294901760, %v3770_v7  ;;  %v3865_v29 = vsub.f32 %v3199_v2, %v3850_v21  ;;  %v50_v2 = vadd.s32 8, %v3408_v24 }
  0x41   :  { %327 = vmatmul.f32.gmra.mxu2 %v3512_v14  ;;  %788 = vmatpush.msrb.mxu3 %v3550_v16  ;;  %v3792_v16 = vsub.f32 %v3202_v11, %v3779_v53  ;;  %v3804_v14 = vand.u32 4294901760, %v485_v56 }
  0x42   :  { %694 = vmatpush.msra.mxu1 %v3642_v40  ;;  %737 = vmatpush.msrb.mxu2 %v563_v31  ;;  %v3797_v31 = vand.u32 4294901760, %v517_v41  ;;  %v938_v22 = vsub.f32 %v3770_v7, %v937_v50  ;;  %v3198_v41 = vld [vmem:[%s5520_s1 + $0x80] sm:$0xff] }
  0x43   :  { %376 = vmatmul.f32.gmra.mxu3 %v198_v35  ;;  %651 = vmatpush.msra.mxu0 %v3678_v49  ;;  %5593 = vst [vmem:[#allocation12_spill] sm:$0xff] %v3804_v14  ;;  %v3806_v35 = vand.u32 4294901760, %v3201_v0  ;;  %v943_v51 = vand.u32 4294901760, %v3792_v16  ;;  %v3837_v18 = vsub.f32 %v485_v56, %v3804_v14  ;;  %v3869_v56 = vand.u32 4294901760, %v525_v61 }
  0x44   :  { %5591 = vst [vmem:[#allocation10_spill] sm:$0xff] %v3797_v31  ;;  %790 = vmatpush.msrb.mxu3 %v3559_v54  ;;  %696 = vmatpush.msra.mxu1 %v3656_v48  ;;  %v933_v54 = vand.u32 4294901760, %v932_v19  ;;  %v939_v4 = vand.u32 4294901760, %v938_v22 }
  0x45   :  { %741 = vmatpush.msrb.mxu2 %v569_v27  ;;  %867 = vmatpush.msrb.mxu0 %v3706_v59  ;;  %v944_v13 = vsub.f32 %v3792_v16, %v943_v51  ;;  %v3827_v27 = vsub.f32 %v3201_v0, %v3806_v35  ;;  %5594 = vst [vmem:[#allocation13_spill] sm:$0xff] %v3837_v18 }
  0x46   :  { %792 = vmatpush.msrb.mxu3 %v3572_v26  ;;  %928 = vmatpush.msrb.mxu1 %v927_v12  ;;  %v3829_v26 = vand.u32 4294901760, %v3200_v25  ;;  %5595 = vst [vmem:[#allocation14_spill] sm:$0xff] %v3869_v56  ;;  %v3872_v12 = vand.u32 4294901760, %v3837_v18  ;;  %v831_v0 = vsel %vm828_vm4, %v824_v52, %v825_v44 }
  0x47   :  { %433 = vmatmul.f32.gmra.mxu0 %v3501_v3  ;;  %745 = vmatpush.msrb.mxu2 %v575_v28  ;;  %v488_v28 = vsel %vm135_vm1, %v3442_v39, 0  ;;  %v945_v1 = vand.u32 4294901760, %v944_v13 }
  0x48   :  { %474 = vmatmul.f32.gmra.mxu1 %v3501_v3  ;;  %794 = vmatpush.msrb.mxu3 %v3591_v9  ;;  %v949_v3 = vand.u32 4294901760, %v3827_v27  ;;  %v3848_v38 = vsub.f32 %v3200_v25, %v3829_v26  ;;  %5596 = vst [vmem:[#allocation15_spill] sm:$0xff] %v3872_v12  ;;  %v3875_v19 = vand.u32 4294901760, %v488_v28 }
  0x49   :  { %519 = vmatmul.f32.vlgmr.msra.gmra.mxu2 %v3797_v31  ;;  %869 = vmatpush.msrb.mxu0 %v3730_v33 }
  0x4a   :  { %749 = vmatpush.msrb.mxu2 %v581_v45  ;;  %934 = vmatpush.msrb.mxu1 %v933_v54  ;;  %v950_v9 = vsub.f32 %v3827_v27, %v949_v3  ;;  %v955_v11 = vand.u32 4294901760, %v3848_v38  ;;  %v3867_v45 = vand.u32 4294901760, %v3198_v41  ;;  %5597 = vst [vmem:[#allocation16_spill] sm:$0xff] %v3875_v19  ;;  %v3906_v47 = vsub.f32 %v488_v28, %v3875_v19 }
  0x4b   :  { %604 = vmatmul.f32.vlgmr.msra.gmra.mxu3 %v3704_v55  ;;  %871 = vmatpush.msrb.mxu0 %v3750_v23 }
  0x4c   :  { %796 = vmatpush.msrb.mxu3 %v3602_v32  ;;  %753 = vmatpush.msrb.mxu2 %v587_v42  ;;  %v956_v22 = vsub.f32 %v3848_v38, %v955_v11  ;;  %v961_v32 = vand.u32 4294901760, %v3865_v29  ;;  %v3891_v54 = vsub.f32 %v3198_v41, %v3867_v45  ;;  %v951_v30 = vand.u32 4294901760, %v950_v9  ;;  %5598 = vst [vmem:[#allocation17_spill] sm:$0xff] %v3906_v47 }
  0x4d   :  { %940 = vmatpush.msrb.mxu1 %v939_v4  ;;  %873 = vmatpush.msrb.mxu0 %v3779_v53  ;;  %v826_v4 = vrot.slane %v3398_v20, 1  ;;  %v5601_v20 = vmov 0 }
  0x4e   :  { %798 = vmatpush.msrb.mxu3 %v3621_v34  ;;  %757 = vmatpush.msrb.mxu2 %v593_v57  ;;  %v962_v42 = vsub.f32 %v3865_v29, %v961_v32  ;;  %v967_v25 = vand.u32 4294901760, %v3891_v54  ;;  %v533_v34 = vsub.f32 %v3837_v18, %v3872_v12  ;;  %v957_v57 = vand.u32 4294901760, %v956_v22 }
  0x4f   :  { %654 = vmatmul.f32.vlgmr.msra.gmra.mxu0 %v3722_v63  ;;  %946 = vmatpush.msrb.mxu1 %v945_v1  ;;  %v847_v1 = vsel %vm135_vm1, %v831_v0, 0  ;;  %v830_v41 = vsel %vm828_vm4, %v825_v44, %v826_v4 }
  0x50   :  { %700 = vmatmul.f32.vlgmr.msra.gmra.mxu1 %v3746_v10  ;;  %800 = vmatpush.msrb.mxu3 %v3642_v40  ;;  %v963_v13 = vand.u32 4294901760, %v962_v42  ;;  %v968_v61 = vsub.f32 %v3891_v54, %v967_v25  ;;  %v3918_v28 = vand.u32 4294901760, %v533_v34  ;;  %v3921_v40 = vand.u32 4294901760, %v3906_v47 }
  0x51   :  { %527 = vmatmul.f32.gmra.mxu2 %v3869_v56  ;;  %875 = vmatpush.msrb.mxu0 %v3806_v35  ;;  %v3947_v9 = vand.u32 4294901760, %v847_v1 }
  0x52   :  { %761 = vmatpush.msrb.mxu2 %v599_v36  ;;  %952 = vmatpush.msrb.mxu1 %v951_v30  ;;  %5599 = vst [vmem:[#allocation18_spill] sm:$0xff] %v3918_v28  ;;  %v969_v49 = vand.u32 4294901760, %v968_v61  ;;  %v64_v36 = vand.u32 15, %v50_v2 }
  0x53   :  { %608 = vmatmul.f32.gmra.mxu3 %v3748_v37  ;;  %877 = vmatpush.msrb.mxu0 %v3829_v26  ;;  %5600 = vst [vmem:[#allocation19_spill] sm:$0xff] %v3921_v40 }
  0x54   :  { %802 = vmatpush.msrb.mxu3 %v3656_v48  ;;  %958 = vmatpush.msrb.mxu1 %v957_v57  ;;  %v541_v48 = vsub.f32 %v3906_v47, %v3921_v40  ;;  %vm3938_vm5 = vcmp.lt.s32.totalorder %v64_v36, 15 }
  0x55   :  { %998 = vmatpush.msra.mxu2 %v3715_v60  ;;  %879 = vmatpush.msrb.mxu0 %v3850_v21  ;;  %v5602_v20 = vsel %vm3938_vm5, 4294967295, %v5601_v20  ;;  %v834_v15 = vsel %vm3938_vm5, %v830_v41, 0.0  ;;  %v3964_v60 = vsub.f32 %v847_v1, %v3947_v9 }
  0x56   :  { %1050 = vmatpush.msra.mxu3 %v3706_v59  ;;  %964 = vmatpush.msrb.mxu1 %v963_v13  ;;  %5603 = vst [vmem:[#allocation20_spill] sm:$0xff] %v5602_v20  ;;  %v3951_v0 = vand.u32 4294901760, %v541_v48 }
  0x57   :  { %659 = vmatmul.f32.gmra.mxu0 %v3767_v17  ;;  %1001 = vmatpush.msra.mxu2 %v3739_v6  ;;  %v52_v6 = vadd.s32 24, %v3408_v24 }
  0x58   :  { %706 = vmatmul.f32.gmra.mxu1 %v3800_v58  ;;  %881 = vmatpush.msrb.mxu0 %v3867_v45  ;;  %5604 = vst [vmem:[#allocation21_spill] sm:$0xff] %v3951_v0 }
  0x59   :  { %535 = vmatmul.f32.gmra.mxu2 %v3918_v28  ;;  %1052 = vmatpush.msra.mxu3 %v3730_v33 }
  0x5a   :  { %970 = vmatpush.msrb.mxu1 %v969_v49  ;;  %1004 = vmatpush.msra.mxu2 %v3770_v7 }
  0x5b   :  { %612 = vmatmul.f32.gmra.mxu3 %v3804_v14  ;;  %1101 = vmatpush.msra.mxu0 %v925_v5  ;;  %v827_v5 = vrot.slane %v3442_v39, 1 }
  0x5c   :  { %1054 = vmatpush.msra.mxu3 %v3750_v23  ;;  %1007 = vmatpush.msra.mxu2 %v3792_v16  ;;  %v5605_v16 = vmov 0 }
  0x5d   :  { %1156 = vmatpush.msra.mxu1 %v3706_v59  ;;  %1105 = vmatpush.msra.mxu0 %v931_v8  ;;  %v850_v59 = vsel %vm135_vm1, %v834_v15, 0  ;;  %v829_v39 = vsel %vm828_vm4, %v826_v4, %v827_v5 }
  0x5e   :  { %1056 = vmatpush.msra.mxu3 %v3779_v53  ;;  %1010 = vmatpush.msra.mxu2 %v3827_v27  ;;  %v3979_v8 = vand.u32 4294901760, %v850_v59 }
  0x5f   :  { %664 = vmatmul.f32.gmra.mxu0 %v3837_v18  ;;  %1158 = vmatpush.msra.mxu1 %v3730_v33  ;;  %v884_v33 = vand.u32 4294901760, %v3964_v60 }
  0x60   :  { %712 = vmatmul.f32.gmra.mxu1 %v3872_v12  ;;  %1058 = vmatpush.msra.mxu3 %v3806_v35 }
  0x61   :  { %543 = vmatmul.f32.gmra.mxu2 %v3951_v0  ;;  %1109 = vmatpush.msra.mxu0 %v937_v50  ;;  %v885_v7 = vsub.f32 %v3964_v60, %v884_v33  ;;  %v891_v50 = vsub.f32 %v850_v59, %v3979_v8 }
  0x62   :  { %1013 = vmatpush.msra.mxu2 %v3848_v38  ;;  %1160 = vmatpush.msra.mxu1 %v3750_v23  ;;  %v78_v23 = vand.u32 15, %v52_v6 }
  0x63   :  { %616 = vmatmul.f32.gmra.mxu3 %v3875_v19  ;;  %1113 = vmatpush.msra.mxu0 %v943_v51  ;;  %v886_v51 = vand.u32 4294901760, %v885_v7  ;;  %v892_v44 = vand.u32 4294901760, %v891_v50 }
  0x64   :  { %1060 = vmatpush.msra.mxu3 %v3829_v26  ;;  %1016 = vmatpush.msra.mxu2 %v3865_v29  ;;  %vm4003_vm6 = vcmp.lt.s32.totalorder %v78_v23, 15 }
  0x65   :  { %1162 = vmatpush.msra.mxu1 %v3779_v53  ;;  %1117 = vmatpush.msra.mxu0 %v949_v3  ;;  %v853_v53 = vsel %vm135_vm1, %v829_v39, 0  ;;  %v5606_v16 = vsel %vm4003_vm6, 4294967295, %v5605_v16  ;;  %v893_v43 = vsub.f32 %v891_v50, %v892_v44 }
  0x66   :  { %1062 = vmatpush.msra.mxu3 %v3850_v21  ;;  %1019 = vmatpush.msra.mxu2 %v3891_v54  ;;  %5607 = vst [vmem:[#allocation22_spill] sm:$0xff] %v5606_v16  ;;  %v898_v27 = vand.u32 4294901760, %v853_v53 }
  0x67   :  { %669 = vmatmul.f32.gmra.mxu0 %v3906_v47  ;;  %1164 = vmatpush.msra.mxu1 %v3806_v35  ;;  %v832_v35 = vsel %vm828_vm4, %v827_v5, %v824_v52  ;;  %v894_v38 = vand.u32 4294901760, %v893_v43 }
  0x68   :  { %718 = vmatmul.f32.gmra.mxu1 %v3921_v40  ;;  %1064 = vmatpush.msra.mxu3 %v3867_v45  ;;  %v899_v52 = vsub.f32 %v853_v53, %v898_v27 }
  0x69   :  { %763 = vmatmul.f32.vlgmr.msrb.gmra.mxu2 %v3704_v55  ;;  %1121 = vmatpush.msra.mxu0 %v955_v11 }
  0x6a   :  { %1166 = vmatpush.msra.mxu1 %v3829_v26  ;;  %v836_v26 = vsel %vm4003_vm6, %v832_v35, 0.0 }
  0x6b   :  { %804 = vmatmul.f32.vlgmr.msrb.gmra.mxu3 %v3704_v55  ;;  %1125 = vmatpush.msra.mxu0 %v961_v32  ;;  %v856_v3 = vsel %vm135_vm1, %v836_v26, 0 }
  0x6c   :  { %1168 = vmatpush.msra.mxu1 %v3850_v21  ;;  %v900_v21 = vand.u32 4294901760, %v899_v52  ;;  %v906_v11 = vand.u32 4294901760, %v856_v3 }
  0x6d   :  { %1129 = vmatpush.msra.mxu0 %v967_v25 }
  0x6e   :  { %1170 = vmatpush.msra.mxu1 %v3867_v45  ;;  %v901_v29 = vsub.f32 %v899_v52, %v900_v21  ;;  %v907_v22 = vsub.f32 %v856_v3, %v906_v11 }
  0x6f   :  { %887 = vmatmul.f32.vlgmr.msrb.gmra.mxu0 %v886_v51 }
  0x70   :  { %972 = vmatmul.f32.vlgmr.msrb.gmra.mxu1 %v3947_v9  ;;  %v902_v45 = vand.u32 4294901760, %v901_v29  ;;  %v908_v32 = vand.u32 4294901760, %v907_v22 }
  0x71   :  { %767 = vmatmul.f32.gmra.mxu2 %v3748_v37 }
  0x72   :  { %v909_v54 = vsub.f32 %v907_v22, %v908_v32 }
  0x73   :  { %808 = vmatmul.f32.gmra.mxu3 %v3748_v37 }
  0x74   :  { %v910_v30 = vand.u32 4294901760, %v909_v54 }
  0x77   :  { %895 = vmatmul.f32.gmra.mxu0 %v894_v38 }
  0x78   :  { %976 = vmatmul.f32.gmra.mxu1 %v3979_v8 }
  0x79   :  { %771 = vmatmul.f32.gmra.mxu2 %v3804_v14 }
  0x7b   :  { %812 = vmatmul.f32.gmra.mxu3 %v3804_v14 }
  0x7f   :  { %903 = vmatmul.f32.gmra.mxu0 %v902_v45 }
  0x80   :  { %980 = vmatmul.f32.gmra.mxu1 %v898_v27 }
  0x81   :  { %775 = vmatmul.f32.gmra.mxu2 %v3875_v19 }
  0x83   :  { %816 = vmatmul.f32.gmra.mxu3 %v3875_v19 }
  0x87   :  { %911 = vmatmul.f32.gmra.mxu0 %v910_v30 }
  0x88   :  { %984 = vmatmul.f32.gmra.mxu1 %v906_v11 }
  0x89   :  { %1022 = vmatmul.f32.vlgmr.msra.gmra.mxu2 %v3964_v60 }
  0x8b   :  { %1068 = vmatmul.f32.vlgmr.msra.gmra.mxu3 %v884_v33 }
  0x8f   :  { %1131 = vmatmul.f32.vlgmr.msra.gmra.mxu0 %v3947_v9 }
  0x90   :  { %1172 = vmatmul.f32.vlgmr.msra.gmra.mxu1 %v3947_v9 }
  0x91   :  { %1027 = vmatmul.f32.gmra.mxu2 %v891_v50 }
  0x93   :  { %1074 = vmatmul.f32.gmra.mxu3 %v892_v44 }
  0x97   :  { %1135 = vmatmul.f32.gmra.mxu0 %v3979_v8 }
  0x98   :  { %1176 = vmatmul.f32.gmra.mxu1 %v3979_v8 }
  0x99   :  { %1032 = vmatmul.f32.gmra.mxu2 %v899_v52 }
  0x9a   :  { %v4034_v42 = vpop.f32.mrf.mxu1  ;;  %v178_v34 = vpop.f32.mrf.mxu0 }
  0x9b   :  { %1080 = vmatmul.f32.gmra.mxu3 %v900_v21  ;;  %v264_v56 = vadd.f32 %v4034_v42, %v178_v34 }
  0x9c   :  { %v4036_v25 = vpop.f32.mrf.mxu2 }
  0x9e   :  { %v271_v57 = vpop.f32.mrf.mxu3 }
  0x9f   :  { %1139 = vmatmul.f32.gmra.mxu0 %v898_v27  ;;  %v272_v31 = vadd.f32 %v271_v57, %v4036_v25 }
  0xa0   :  { %1180 = vmatmul.f32.gmra.mxu1 %v898_v27 }
  0xa1   :  { %1037 = vmatmul.f32.gmra.mxu2 %v907_v22 }
  0xa3   :  { %1086 = vmatmul.f32.gmra.mxu3 %v908_v32  ;;  %v186_v61 = vpop.f32.mrf.mxu0 }
  0xa4   :  { %v4038_v13 = vpop.f32.mrf.mxu2  ;;  %v267_v2 = vpop.f32.mrf.mxu1 }
  0xa5   :  { %v268_v28 = vadd.f32 %v267_v2, %v186_v61 }
  0xa6   :  { %v4040_v49 = vpop.f32.mrf.mxu3 }
  0xa7   :  { %1143 = vmatmul.f32.gmra.mxu0 %v906_v11  ;;  %v276_v61 = vadd.f32 %v4040_v49, %v4038_v13 }
  0xa8   :  { %1184 = vmatmul.f32.gmra.mxu1 %v906_v11 }
  0xac   :  { %v313_v36 = vpop.f32.mrf.mxu2  ;;  %v422_v4 = vpop.f32.mrf.mxu0 }
  0xad   :  { %v4042_v48 = vpop.f32.mrf.mxu1  ;;  %v314_v20 = vadd.f32 %v313_v36, %v264_v56 }
  0xae   :  { %v359_v1 = vpop.f32.mrf.mxu3 }
  0xaf   :  { %v360_v24 = vadd.f32 %v359_v1, %v314_v20 }
  0xb1   :  { %v423_v2 = vadd.f32 %v422_v4, %v360_v24 }
  0xb3   :  { %v464_v25 = vadd.f32 %v4042_v48, %v423_v2 }
  0xb4   :  { %v318_v41 = vpop.f32.mrf.mxu2  ;;  %v426_v9 = vpop.f32.mrf.mxu0 }
  0xb5   :  { %v467_v15 = vpop.f32.mrf.mxu1  ;;  %v319_v16 = vadd.f32 %v318_v41, %v268_v28 }
  0xb6   :  { %v365_v60 = vpop.f32.mrf.mxu3 }
  0xb7   :  { %v366_v46 = vadd.f32 %v365_v60, %v319_v16 }
  0xbc   :  { %v323_v59 = vpop.f32.mrf.mxu2  ;;  %v430_v5 = vpop.f32.mrf.mxu0 }
  0xbd   :  { %v471_v6 = vpop.f32.mrf.mxu1  ;;  %v324_v62 = vadd.f32 %v323_v59, %v272_v31 }
  0xbe   :  { %v371_v33 = vpop.f32.mrf.mxu3 }
  0xc4   :  { %v328_v8 = vpop.f32.mrf.mxu2  ;;  %v4044_v39 = vpop.f32.mrf.mxu0 }
  0xc5   :  { %v4046_v23 = vpop.f32.mrf.mxu1  ;;  %v329_v34 = vadd.f32 %v328_v8, %v276_v61 }
  0xc6   :  { %v377_v7 = vpop.f32.mrf.mxu3 }
  0xc7   :  { %v378_v28 = vadd.f32 %v377_v7, %v329_v34 }
  0xc9   :  { %v435_v24 = vadd.f32 %v4044_v39, %v378_v28 }
  0xcc   :  { %v520_v50 = vpop.f32.mrf.mxu2  ;;  %v4048_v53 = vpop.f32.mrf.mxu0 }
  0xcd   :  { %v4050_v35 = vpop.f32.mrf.mxu1 }
  0xce   :  { %v605_v51 = vpop.f32.mrf.mxu3 }
  0xd4   :  { %v528_v44 = vpop.f32.mrf.mxu2  ;;  %v4052_v27 = vpop.f32.mrf.mxu0 }
  0xd5   :  { %v4054_v26 = vpop.f32.mrf.mxu1 }
  0xd6   :  { %v609_v43 = vpop.f32.mrf.mxu3 }
  0xdc   :  { %v536_v52 = vpop.f32.mrf.mxu2  ;;  %v4056_v3 = vpop.f32.mrf.mxu0 }
  0xdd   :  { %v4058_v38 = vpop.f32.mrf.mxu1 }
  0xde   :  { %v613_v21 = vpop.f32.mrf.mxu3 }
  0xe4   :  { %v4060_v11 = vpop.f32.mrf.mxu2  ;;  %v4062_v29 = vpop.f32.mrf.mxu0 }
  0xe5   :  { %5608 = vst [vmem:[#allocation23_spill] sm:$0xff] %v4062_v29  ;;  %v4064_v22 = vpop.f32.mrf.mxu1 }
  0xe6   :  { %5609 = vst [vmem:[#allocation24_spill] sm:$0xff] %v4064_v22  ;;  %v4066_v45 = vpop.f32.mrf.mxu3  ;;  %v372_v22 = vadd.f32 %v371_v33, %v324_v62  ;;  %v521_v62 = vadd.f32 %v520_v50, %v464_v25 }
  0xe8   :  { %v431_v42 = vadd.f32 %v430_v5, %v372_v22  ;;  %v606_v13 = vadd.f32 %v605_v51, %v521_v62 }
  0xea   :  { %v472_v56 = vadd.f32 %v471_v6, %v431_v42 }
  0xec   :  { %v4068_v32 = vpop.f32.mrf.mxu2  ;;  %v888_v54 = vpop.f32.mrf.mxu0 }
  0xed   :  { %v973_v30 = vpop.f32.mrf.mxu1  ;;  %v5619_v34 = vld [vmem:[#allocation24_spill] sm:$0xff] }
  0xee   :  { %v4070_v47 = vpop.f32.mrf.mxu3  ;;  %v974_v1 = vadd.f32 %v973_v30, %v888_v54 }
  0xef   :  { %5610 = vst [vmem:[#allocation25_spill] sm:$0xff] %v4070_v47 }
  0xf4   :  { %v4072_v40 = vpop.f32.mrf.mxu2  ;;  %v896_v18 = vpop.f32.mrf.mxu0 }
  0xf5   :  { %v977_v12 = vpop.f32.mrf.mxu1 }
  0xf6   :  { %v4074_v17 = vpop.f32.mrf.mxu3  ;;  %v978_v31 = vadd.f32 %v977_v12, %v896_v18  ;;  %v656_v18 = vadd.f32 %v4048_v53, %v606_v13 }
  0xf8   :  { %v702_v50 = vadd.f32 %v4050_v35, %v656_v18 }
  0xfc   :  { %v4076_v58 = vpop.f32.mrf.mxu2  ;;  %v904_v63 = vpop.f32.mrf.mxu0 }
  0xfd   :  { %v981_v10 = vpop.f32.mrf.mxu1 }
  0xfe   :  { %v4078_v19 = vpop.f32.mrf.mxu3  ;;  %v982_v59 = vadd.f32 %v981_v10, %v904_v63 }
  0xff   :  { %5611 = vst [vmem:[#allocation26_spill] sm:$0xff] %v4078_v19 }
 0x104   :  { %v4080_v0 = vpop.f32.mrf.mxu2  ;;  %v4082_v14 = vpop.f32.mrf.mxu0 }
 0x105   :  { %5612 = vst [vmem:[#allocation27_spill] sm:$0xff] %v4080_v0  ;;  %v4084_v37 = vpop.f32.mrf.mxu1  ;;  %v427_v0 = vadd.f32 %v426_v9, %v366_v46  ;;  %v537_v46 = vadd.f32 %v536_v52, %v472_v56 }
 0x106   :  { %5613 = vst [vmem:[#allocation28_spill] sm:$0xff] %v4084_v37  ;;  %v4087_v55 = vpop.f32.mrf.mxu3  ;;  %v5617_v22 = vld [vmem:[#allocation26_spill] sm:$0xff] }
 0x107   :  { %5614 = vst [vmem:[#allocation29_spill] sm:$0xff] %v4087_v55  ;;  %v468_v55 = vadd.f32 %v467_v15, %v427_v0  ;;  %v614_v4 = vadd.f32 %v613_v21, %v537_v46  ;;  %v5616_v21 = vld [vmem:[#allocation25_spill] sm:$0xff] }
 0x109   :  { %v529_v16 = vadd.f32 %v528_v44, %v468_v55  ;;  %v476_v55 = vadd.f32 %v4046_v23, %v435_v24  ;;  %v666_v12 = vadd.f32 %v4056_v3, %v614_v4  ;;  %v5615_v3 = vld [vmem:[#allocation23_spill] sm:$0xff] }
 0x10b   :  { %v610_v36 = vadd.f32 %v609_v43, %v529_v16  ;;  %v545_v33 = vadd.f32 %v4060_v11, %v476_v55  ;;  %v714_v53 = vadd.f32 %v4058_v38, %v666_v12 }
 0x10c   :  { %v1023_v19 = vpop.f32.mrf.mxu2  ;;  %v1132_v47 = vpop.f32.mrf.mxu0 }
 0x10d   :  { %v1173_v29 = vpop.f32.mrf.mxu1  ;;  %v1024_v0 = vadd.f32 %v1023_v19, %v974_v1  ;;  %v661_v48 = vadd.f32 %v4052_v27, %v610_v36  ;;  %v765_v27 = vadd.f32 %v4068_v32, %v702_v50  ;;  %v5618_v38 = vld [vmem:[#allocation28_spill] sm:$0xff] }
 0x10e   :  { %v1069_v37 = vpop.f32.mrf.mxu3  ;;  %v986_v54 = vadd.f32 %v5618_v38, %v4082_v14  ;;  %v5621_v36 = vld [vmem:[#allocation29_spill] sm:$0xff] }
 0x10f   :  { %v1070_v60 = vadd.f32 %v1069_v37, %v1024_v0  ;;  %v708_v39 = vadd.f32 %v4054_v26, %v661_v48  ;;  %v618_v37 = vadd.f32 %v4066_v45, %v545_v33  ;;  %v773_v26 = vadd.f32 %v4076_v58, %v714_v53 }
 0x110   :  { %v806_v11 = vadd.f32 %v5616_v21, %v765_v27  ;;  %v1328_v21 = vld [vmem:[%s5523_s5 + $0x78] sm:$0xff] }
 0x111   :  { %v1133_v7 = vadd.f32 %v1132_v47, %v1070_v60  ;;  %v769_v44 = vadd.f32 %v4072_v40, %v708_v39  ;;  %v671_v35 = vadd.f32 %v5615_v3, %v618_v37  ;;  %v814_v45 = vadd.f32 %v5617_v22, %v773_v26  ;;  %v1327_v22 = vld [vmem:[%s5523_s5 + $0x70] sm:$0xff] }
 0x112   :  { %v4163_v38 = vand.u32 4294901760, %v1327_v22 }
 0x113   :  { %v810_v43 = vadd.f32 %v4074_v17, %v769_v44  ;;  %v1174_v47 = vadd.f32 %v1173_v29, %v1133_v7  ;;  %v3258_v17 = vld [vmem:[%s5522_s2] ss:$0 sm:$0xff]  ;;  %v720_v25 = vadd.f32 %v5619_v34, %v671_v35  ;;  %s3267_s2 = smov 8  }
 0x114   :  { %v1028_v20 = vpop.f32.mrf.mxu2  ;;  %v1136_v57 = vpop.f32.mrf.mxu0 }
 0x115   :  { %v1029_v41 = vadd.f32 %v1028_v20, %v978_v31  ;;  %v1177_v9 = vpop.f32.mrf.mxu1  ;;  %v1188_v2 = vadd.f32 %v1174_v47, %v806_v11  ;;  %v5620_v31 = vld [vmem:[#allocation27_spill] sm:$0xff]  ;;  %v4155_v11 = vand.u32 4294901760, %v1328_v21 }
 0x116   :  { %v1075_v49 = vpop.f32.mrf.mxu3  ;;  %v777_v14 = vadd.f32 %v5620_v31, %v720_v25 }
 0x117   :  { %v1076_v15 = vadd.f32 %v1075_v49, %v1029_v41  ;;  %v4119_v20 = vadd.f32 %v3258_v17, %v1188_v2  ;;  %1577 = vmatpush.msrb.mxu1 %v4155_v11  ;;  %1330 = vmatpush.msrb.mxu2 %v4155_v11  ;;  %v1325_v2 = vld [vmem:[%s5523_s5 + $0x60] sm:$0xff] }
 0x118   :  { %v818_v46 = vadd.f32 %v5621_v36, %v777_v14  ;;  %v1323_v14 = vld [vmem:[%s5523_s5 + $0x50] sm:$0xff] }
 0x119   :  { %v1137_v6 = vadd.f32 %v1136_v57, %v1076_v15  ;;  %1579 = vmatpush.msrb.mxu1 %v4163_v38  ;;  %1332 = vmatpush.msrb.mxu2 %v4163_v38 }
 0x11b   :  { %v1178_v63 = vadd.f32 %v1177_v9, %v1137_v6  ;;  %v1223_v9 = vmul.f32 %v4119_v20, %v4119_v20 }
 0x11c   :  { %v1033_v5 = vpop.f32.mrf.mxu2  ;;  %v1140_v8 = vpop.f32.mrf.mxu0 }
 0x11d   :  { %v1034_v19 = vadd.f32 %v1033_v5, %v982_v59  ;;  %v1181_v23 = vpop.f32.mrf.mxu1  ;;  %v1189_v40 = vadd.f32 %v1178_v63, %v810_v43 }
 0x11e   :  { %v1081_v51 = vpop.f32.mrf.mxu3 }
 0x11f   :  { %v1082_v10 = vadd.f32 %v1081_v51, %v1034_v19  ;;  %v4116_v28 = vadd.f32 %v3258_v17, %v1189_v40 }
 0x121   :  { %v1141_v52 = vadd.f32 %v1140_v8, %v1082_v10  ;;  %v1224_v1 = vmul.f32 %v4116_v28, %v4116_v28  ;;  %v1202_v24 = vadd.f32 %v4116_v28, %v4119_v20 }
 0x123   :  { %v1182_v61 = vadd.f32 %v1181_v23, %v1141_v52  ;;  %v1227_v4 = vadd.f32 %v1224_v1, %v1223_v9  ;;  %v4217_v1 = vand.u32 4294901760, %v1323_v14  ;;  %v1322_v9 = vld [vmem:[%s5523_s5 + $0x48] sm:$0xff] }
 0x124   :  { %v1038_v30 = vpop.f32.mrf.mxu2  ;;  %v1144_v42 = vpop.f32.mrf.mxu0 }
 0x125   :  { %v1039_v58 = vadd.f32 %v1038_v30, %v986_v54  ;;  %v1190_v29 = vadd.f32 %v1182_v61, %v814_v45  ;;  %v1185_v16 = vpop.f32.mrf.mxu1  ;;  %v4161_v45 = vsub.f32 %v1328_v21, %v4155_v11  ;;  %v1326_v54 = vld [vmem:[%s5523_s5 + $0x68] sm:$0xff]  ;;  %v4172_v30 = vsub.f32 %v1327_v22, %v4163_v38  ;;  %v1317_v21 = vld [vmem:[%s5523_s5 + $0x20] sm:$0xff] }
 0x126   :  { %v1087_v32 = vpop.f32.mrf.mxu3  ;;  %v4175_v61 = vand.u32 4294901760, %v1326_v54 }
 0x127   :  { %v1088_v56 = vadd.f32 %v1087_v32, %v1039_v58  ;;  %v4121_v62 = vadd.f32 %v3258_v17, %v1190_v29  ;;  %v1396_v40 = vand.u32 4294901760, %v4161_v45  ;;  %1509 = vmatpush.msrb.mxu0 %v4161_v45  ;;  %v1402_v58 = vand.u32 4294901760, %v4172_v30 }
 0x128   :  { %v4187_v29 = vsub.f32 %v1326_v54, %v4175_v61  ;;  %v4190_v32 = vand.u32 4294901760, %v1325_v2  ;;  %1581 = vmatpush.msrb.mxu1 %v4175_v61  ;;  %1334 = vmatpush.msrb.mxu2 %v4175_v61 }
 0x129   :  { %v1145_v57 = vadd.f32 %v1144_v42, %v1088_v56  ;;  %v1225_v13 = vmul.f32 %v4121_v62, %v4121_v62  ;;  %v1203_v15 = vadd.f32 %v1202_v24, %v4121_v62  ;;  %1512 = vmatpush.msrb.mxu0 %v4172_v30  ;;  %v1324_v42 = vld [vmem:[%s5523_s5 + $0x58] sm:$0xff]  ;;  %v1403_v25 = vsub.f32 %v4172_v30, %v1402_v58 }
 0x12a   :  { %v1408_v56 = vand.u32 4294901760, %v4187_v29  ;;  %1583 = vmatpush.msrb.mxu1 %v4190_v32  ;;  %v4206_v31 = vand.u32 4294901760, %v1324_v42  ;;  %1336 = vmatpush.msrb.mxu2 %v4190_v32 }
 0x12b   :  { %v1186_v41 = vadd.f32 %v1185_v16, %v1145_v57  ;;  %v1228_v55 = vadd.f32 %v1227_v4, %v1225_v13  ;;  %v4202_v16 = vsub.f32 %v1325_v2, %v4190_v32  ;;  %1515 = vmatpush.msrb.mxu0 %v4187_v29  ;;  %v1404_v57 = vand.u32 4294901760, %v1403_v25 }
 0x12c   :  { %v1409_v36 = vsub.f32 %v4187_v29, %v1408_v56  ;;  %1585 = vmatpush.msrb.mxu1 %v4206_v31  ;;  %1338 = vmatpush.msrb.mxu2 %v4206_v31  ;;  %v4233_v4 = vand.u32 4294901760, %v1322_v9  ;;  %v4306_v2 = vand.u32 4294901760, %v1317_v21 }
 0x12d   :  { %v1191_v49 = vadd.f32 %v1186_v41, %v818_v46  ;;  %v1414_v46 = vand.u32 4294901760, %v4202_v16  ;;  %1518 = vmatpush.msrb.mxu0 %v4202_v16  ;;  %v4220_v41 = vsub.f32 %v1324_v42, %v4206_v31 }
 0x12e   :  { %v1410_v24 = vand.u32 4294901760, %v1409_v36  ;;  %1587 = vmatpush.msrb.mxu1 %v4217_v1  ;;  %1340 = vmatpush.msrb.mxu2 %v4217_v1 }
 0x12f   :  { %v4132_v0 = vadd.f32 %v3258_v17, %v1191_v49  ;;  %v1397_v17 = vsub.f32 %v4161_v45, %v1396_v40  ;;  %v1415_v13 = vsub.f32 %v4202_v16, %v1414_v46  ;;  %v4231_v49 = vsub.f32 %v1323_v14, %v4217_v1  ;;  %1521 = vmatpush.msrb.mxu0 %v4220_v41  ;;  %v3219_v45 = vld [vmem:[%s5523_s5 + $0xe8] sm:$0xff]  ;;  %v3216_v16 = vld [vmem:[%s5523_s5 + $0xd0] sm:$0xff] }
 0x130   :  { %1589 = vmatpush.msrb.mxu1 %v4233_v4  ;;  %1342 = vmatpush.msrb.mxu2 %v4233_v4  ;;  %v4320_v14 = vsub.f32 %v1317_v21, %v4306_v2 }
 0x131   :  { %v1226_v48 = vmul.f32 %v4132_v0, %v4132_v0  ;;  %v1204_v60 = vadd.f32 %v1203_v15, %v4132_v0  ;;  %v1398_v34 = vand.u32 4294901760, %v1397_v17  ;;  %v1420_v15 = vand.u32 4294901760, %v4220_v41  ;;  %1524 = vmatpush.msrb.mxu0 %v4231_v49 }
 0x133   :  { %v1205_v18 = vrot.slane %v1204_v60, 4  ;;  %v1229_v12 = vadd.f32 %v1228_v55, %v1226_v48  ;;  %1399 = vmatpush.msrb.mxu3 %v1398_v34  ;;  %v1321_v48 = vld [vmem:[%s5523_s5 + $0x40] sm:$0xff]  ;;  %v1426_v55 = vand.u32 4294901760, %v4231_v49  ;;  %v1316_v34 = vld [vmem:[%s5523_s5 + $0x18] sm:$0xff] }
 0x135   :  { %v1206_v59 = vadd.f32 %v1205_v18, %v1204_v60  ;;  %v1230_v5 = vrot.slane %v1229_v12, 4  ;;  %1405 = vmatpush.msrb.mxu3 %v1404_v57  ;;  %v1416_v60 = vand.u32 4294901760, %v1415_v13  ;;  %v4243_v18 = vsub.f32 %v1322_v9, %v4233_v4 }
 0x136   :  { %v4322_v57 = vand.u32 4294901760, %v1316_v34 }
 0x137   :  { %v1207_v6 = vrot.slane %v1206_v59, 2  ;;  %v1231_v33 = vadd.f32 %v1230_v5, %v1229_v12  ;;  %1411 = vmatpush.msrb.mxu3 %v1410_v24  ;;  %v4245_v12 = vand.u32 4294901760, %v1321_v48  ;;  %v1320_v5 = vld [vmem:[%s5523_s5 + $0x38] sm:$0xff]  ;;  %1527 = vmatpush.msrb.mxu0 %v4243_v18 }
 0x139   :  { %v1208_v8 = vadd.f32 %v1207_v6, %v1206_v59  ;;  %v1232_v39 = vrot.slane %v1231_v33, 2  ;;  %v1421_v59 = vsub.f32 %v4220_v41, %v1420_v15  ;;  %1417 = vmatpush.msrb.mxu3 %v1416_v60  ;;  %v1427_v6 = vsub.f32 %v4231_v49, %v1426_v55  ;;  %1591 = vmatpush.msrb.mxu1 %v4245_v12  ;;  %v3214_v49 = vld [vmem:[%s5523_s5 + $0xc0] sm:$0xff] }
 0x13a   :  { %1344 = vmatpush.msrb.mxu2 %v4245_v12 }
 0x13b   :  { %v1209_v7 = vrot.slane %v1208_v8, 1  ;;  %v1233_v50 = vadd.f32 %v1232_v39, %v1231_v33  ;;  %v1432_v33 = vand.u32 4294901760, %v4243_v18  ;;  %v4263_v39 = vand.u32 4294901760, %v1320_v5 }
 0x13d   :  { %v1210_v19 = vadd.f32 %v1209_v7, %v1208_v8  ;;  %v1234_v37 = vrot.slane %v1233_v50, 1  ;;  %v4261_v8 = vsub.f32 %v1321_v48, %v4245_v12  ;;  %1593 = vmatpush.msrb.mxu1 %v4263_v39  ;;  %1346 = vmatpush.msrb.mxu2 %v4263_v39  ;;  %v1315_v48 = vld [vmem:[%s5523_s5 + $0x10] sm:$0xff] }
 0x13f   :  { %1211 = vrot.lane.b32.xlu0 %v1210_v19, %s3267_s2  ;;  %v1235_v51 = vadd.f32 %v1234_v37, %v1233_v50  ;;  %v1319_v50 = vld [vmem:[%s5523_s5 + $0x30] sm:$0xff]  ;;  %1530 = vmatpush.msrb.mxu0 %v4261_v8 }
 0x147   :  { %1236 = vrot.lane.b32.xlu0 %v1235_v51, %s3267_s2 }
 0x1b1   :  { %v1212_v23 = vpop.permute.xlu0 %1211 }
 0x1b2   :  { %v1213_v53 = vadd.f32 %v1212_v23, %v1210_v19  ;;  %v1422_v19 = vand.u32 4294901760, %v1421_v59  ;;  %v1433_v23 = vsub.f32 %v4243_v18, %v1432_v33 }
 0x1b4   :  { %1214 = vrot.lane.b32.xlu1 %v1213_v53, %s3268_s29  ;;  %1423 = vmatpush.msrb.mxu3 %v1422_v19 }
 0x1b9   :  { %v1237_v44 = vpop.permute.xlu0 %1236 }
 0x1ba   :  { %v1238_v63 = vadd.f32 %v1237_v44, %v1235_v51  ;;  %v1428_v51 = vand.u32 4294901760, %v1427_v6  ;;  %v4278_v44 = vsub.f32 %v1320_v5, %v4263_v39  ;;  %v1462_v5 = vand.u32 4294901760, %v4320_v14 }
 0x1bb   :  { %v4341_v6 = vsub.f32 %v1316_v34, %v4322_v57 }
 0x1bc   :  { %1239 = vrot.lane.b32.xlu1 %v1238_v63, %s3268_s29  ;;  %1429 = vmatpush.msrb.mxu3 %v1428_v51 }
 0x1bd   :  { %1533 = vmatpush.msrb.mxu0 %v4278_v44 }
 0x226   :  { %v1215_v10 = vpop.permute.xlu1 %1214 }
 0x227   :  { %v1216_v27 = vadd.f32 %v1215_v10, %v1213_v53  ;;  %v1438_v53 = vand.u32 4294901760, %v4261_v8  ;;  %v1318_v10 = vld [vmem:[%s5523_s5 + $0x28] sm:$0xff] }
 0x229   :  { %1217 = vrot.lane.b32.xlu2 %v1216_v27, %s3269_s30 }
 0x22e   :  { %v1240_v43 = vpop.permute.xlu1 %1239 }
 0x22f   :  { %v1241_v26 = vadd.f32 %v1240_v43, %v1238_v63  ;;  %v4281_v63 = vand.u32 4294901760, %v1319_v50  ;;  %v1439_v43 = vsub.f32 %v4261_v8, %v1438_v53 }
 0x231   :  { %1242 = vrot.lane.b32.xlu2 %v1241_v26, %s3269_s30  ;;  %v1440_v22 = vand.u32 4294901760, %v1439_v43  ;;  %1595 = vmatpush.msrb.mxu1 %v4281_v63  ;;  %v1468_v43 = vand.u32 4294901760, %v4341_v6 }
 0x232   :  { %1348 = vmatpush.msrb.mxu2 %v4281_v63 }
 0x283   :  { %v1218_v47 = vpop.permute.xlu2 %1217 }
 0x284   :  { %v4144_v52 = vadd.f32 %v1218_v47, %v1216_v27  ;;  %v1434_v27 = vand.u32 4294901760, %v1433_v23 }
 0x286   :  { %1220 = vrot.lane.b32.xlu0 %v4144_v52, %s3270_s14  ;;  %1435 = vmatpush.msrb.mxu3 %v1434_v27  ;;  %v1463_v27 = vsub.f32 %v4320_v14, %v1462_v5 }
 0x288   :  { %1441 = vmatpush.msrb.mxu3 %v1440_v22 }
 0x28b   :  { %v1243_v3 = vpop.permute.xlu2 %1242 }
 0x28c   :  { %v4148_v35 = vadd.f32 %v1243_v3, %v1241_v26  ;;  %v4289_v26 = vand.u32 4294901760, %v1318_v10  ;;  %v4297_v3 = vsub.f32 %v1319_v50, %v4281_v63  ;;  %v4352_v50 = vand.u32 4294901760, %v1315_v48 }
 0x28e   :  { %1245 = vrot.lane.b32.xlu1 %v4148_v35, %s3270_s14  ;;  %v4304_v54 = vsub.f32 %v1318_v10, %v4289_v26  ;;  %v1450_v42 = vand.u32 4294901760, %v4297_v3  ;;  %1536 = vmatpush.msrb.mxu0 %v4297_v3  ;;  %v4365_v21 = vsub.f32 %v1315_v48, %v4352_v50 }
 0x28f   :  { %1597 = vmatpush.msrb.mxu1 %v4289_v26  ;;  %1350 = vmatpush.msrb.mxu2 %v4289_v26 }
 0x290   :  { %v1456_v25 = vand.u32 4294901760, %v4304_v54  ;;  %v1451_v13 = vsub.f32 %v4297_v3, %v1450_v42  ;;  %1539 = vmatpush.msrb.mxu0 %v4304_v54 }
 0x291   :  { %1599 = vmatpush.msrb.mxu1 %v4306_v2  ;;  %1352 = vmatpush.msrb.mxu2 %v4306_v2 }
 0x292   :  { %v1457_v59 = vsub.f32 %v4304_v54, %v1456_v25  ;;  %v1452_v19 = vand.u32 4294901760, %v1451_v13  ;;  %1542 = vmatpush.msrb.mxu0 %v4320_v14  ;;  %v1474_v13 = vand.u32 4294901760, %v4365_v21 }
 0x293   :  { %1601 = vmatpush.msrb.mxu1 %v4322_v57  ;;  %1354 = vmatpush.msrb.mxu2 %v4322_v57 }
 0x294   :  { %v1458_v10 = vand.u32 4294901760, %v1457_v59  ;;  %1545 = vmatpush.msrb.mxu0 %v4341_v6 }
 0x295   :  { %1603 = vmatpush.msrb.mxu1 %v4352_v50  ;;  %1356 = vmatpush.msrb.mxu2 %v4352_v50 }
 0x296   :  { %1548 = vmatpush.msrb.mxu0 %v4365_v21 }
 0x2f8   :  { %v1221_v7 = vpop.permute.xlu0 %1220 }
 0x2f9   :  { %v1222_v37 = vadd.f32 %v1221_v7, %v4144_v52  ;;  %v1444_v52 = vand.u32 4294901760, %v4278_v44  ;;  %v1314_v7 = vld [vmem:[%s5523_s5 + $0x8] sm:$0xff] }
 0x2fb   :  { %v4293_v47 = vmul.f32 0.001953125, %v1222_v37  ;;  %v1445_v17 = vsub.f32 %v4278_v44, %v1444_v52  ;;  %v4354_v37 = vand.u32 4294901760, %v1314_v7 }
 0x2fd   :  { %v1250_v36 = vmul.f32 %v4293_v47, %v4293_v47  ;;  %v1446_v24 = vand.u32 4294901760, %v1445_v17  ;;  %v4369_v22 = vsub.f32 %v1314_v7, %v4354_v37  ;;  %1605 = vmatpush.msrb.mxu1 %v4354_v37  ;;  %1358 = vmatpush.msrb.mxu2 %v4354_v37  ;;  %v1475_v7 = vsub.f32 %v4365_v21, %v1474_v13 }
 0x2ff   :  { %1447 = vmatpush.msrb.mxu3 %v1446_v24  ;;  %v1469_v24 = vsub.f32 %v4341_v6, %v1468_v43  ;;  %v5561_v48 = vand.u32 4294901760, %v4369_v22  ;;  %1551 = vmatpush.msrb.mxu0 %v4369_v22  ;;  %v5626_v21 = vand.u32 4294901760, %v4369_v22 }
 0x300   :  { %v1246_v9 = vpop.permute.xlu1 %1245 }
 0x301   :  { %v1247_v60 = vadd.f32 %v1246_v9, %v4148_v35  ;;  %v1313_v35 = vld [vmem:[%s5523_s5] sm:$0xff]  ;;  %1453 = vmatpush.msrb.mxu3 %v1452_v19  ;;  %v1464_v9 = vand.u32 4294901760, %v1463_v27  ;;  %v3221_v27 = vld [vmem:[%s5523_s5 + $0xf8] sm:$0xff] }
 0x302   :  { %v4356_v51 = vand.u32 4294901760, %v1313_v35 }
 0x303   :  { %v1249_v23 = vmul.f32 0.001953125, %v1247_v60  ;;  %1459 = vmatpush.msrb.mxu3 %v1458_v10 }
 0x304   :  { %v4372_v17 = vsub.f32 %v1313_v35, %v4356_v51  ;;  %v1481_v35 = vsub.f32 %v4369_v22, %v5561_v48  ;;  %1607 = vmatpush.msrb.mxu1 %v4356_v51  ;;  %1360 = vmatpush.msrb.mxu2 %v4356_v51 }
 0x305   :  { %v1251_v34 = vsub.f32 %v1249_v23, %v1250_v36  ;;  %v1470_v36 = vand.u32 4294901760, %v1469_v24  ;;  %1465 = vmatpush.msrb.mxu3 %v1464_v9  ;;  %v1476_v23 = vand.u32 4294901760, %v1475_v7  ;;  %v3220_v24 = vld [vmem:[%s5523_s5 + $0xf0] sm:$0xff] }
 0x306   :  { %v5560_v60 = vand.u32 4294901760, %v4372_v17  ;;  %v1482_v10 = vand.u32 4294901760, %v1481_v35  ;;  %1554 = vmatpush.msrb.mxu0 %v4372_v17  ;;  %1636 = vmatpush.msra.mxu2 %v1396_v40  ;;  %v4415_v7 = vand.u32 4294901760, %v3220_v24 }
 0x307   :  { %v4383_v59 = vadd.f32 1e-05, %v1251_v34  ;;  %1471 = vmatpush.msrb.mxu3 %v1470_v36  ;;  %v4404_v34 = vand.u32 4294901760, %v3221_v27 }
 0x308   :  { %v1487_v19 = vsub.f32 %v4372_v17, %v5560_v60  ;;  %1640 = vmatpush.msra.mxu2 %v1402_v58  ;;  %v3218_v58 = vld [vmem:[%s5523_s5 + $0xe0] sm:$0xff] }
 0x309   :  { %3261 = vrsqrt.f32 %v4383_v59  ;;  %1477 = vmatpush.msrb.mxu3 %v1476_v23  ;;  %1764 = vmatpush.msra.mxu0 %v4404_v34  ;;  %v4413_v36 = vsub.f32 %v3221_v27, %v4404_v34  ;;  %v4429_v23 = vsub.f32 %v3220_v24, %v4415_v7  ;;  %v4444_v29 = vand.u32 4294901760, %v3218_v58  ;;  %v3217_v24 = vld [vmem:[%s5523_s5 + $0xd8] sm:$0xff] }
 0x30a   :  { %v1488_v9 = vand.u32 4294901760, %v1487_v19  ;;  %v4426_v19 = vand.u32 4294901760, %v3219_v45  ;;  %1644 = vmatpush.msra.mxu2 %v1408_v56  ;;  %v4461_v48 = vand.u32 4294901760, %v3217_v24  ;;  %vm1259_vm8 = vweird.f32 %v4383_v59 }
 0x30b   :  { %1483 = vmatpush.msrb.mxu3 %v1482_v10  ;;  %1766 = vmatpush.msra.mxu0 %v4415_v7  ;;  %v5562_v35 = vand.u32 4294901760, %v4413_v36  ;;  %v1836_v27 = vand.u32 4294901760, %v4429_v23 }
 0x30c   :  { %v4447_v56 = vsub.f32 %v3219_v45, %v4426_v19  ;;  %1648 = vmatpush.msra.mxu2 %v1414_v46 }
 0x30d   :  { %1489 = vmatpush.msrb.mxu3 %v1488_v9  ;;  %v1831_v10 = vsub.f32 %v4413_v36, %v5562_v35  ;;  %1768 = vmatpush.msra.mxu0 %v4426_v19  ;;  %v1837_v60 = vsub.f32 %v4429_v23, %v1836_v27  ;;  %v4464_v35 = vsub.f32 %v3218_v58, %v4444_v29 }
 0x30e   :  { %v5563_v45 = vand.u32 4294901760, %v4447_v56  ;;  %1652 = vmatpush.msra.mxu2 %v1420_v15  ;;  %v4478_v58 = vsub.f32 %v3217_v24, %v4461_v48 }
 0x30f   :  { %v4422_v40 = vpop.eup %3261  ;;  %1715 = vmatpush.msra.mxu3 %v4155_v11  ;;  %v1832_v11 = vand.u32 4294901760, %v1831_v10  ;;  %1770 = vmatpush.msra.mxu0 %v4444_v29  ;;  %v4475_v10 = vand.u32 4294901760, %v3216_v16  ;;  %v1848_v41 = vand.u32 4294901760, %v4464_v35 }
 0x310   :  { %v1254_v30 = vmul.f32 %v4422_v40, %v4383_v59  ;;  %v1843_v46 = vsub.f32 %v4447_v56, %v5563_v45  ;;  %vm1260_vm7 = vweird.f32 %v4422_v40  ;;  %1656 = vmatpush.msra.mxu2 %v1426_v55 }
 0x311   :  { %1717 = vmatpush.msra.mxu3 %v4163_v38  ;;  %1833 = vmatpush.msra.mxu1 %v1832_v11  ;;  %v1838_v38 = vand.u32 4294901760, %v1837_v60  ;;  %v1854_v60 = vand.u32 4294901760, %v4478_v58  ;;  %v4493_v11 = vsub.f32 %v3216_v16, %v4475_v10  ;;  %vm1261_vm9 = vmor %vm1259_vm8, %vm1260_vm7  ;;  %v4516_v16 = vand.u32 4294901760, %v3214_v49 }
 0x312   :  { %v1255_v9 = vmul.f32 %v4422_v40, %v1254_v30  ;;  %1772 = vmatpush.msra.mxu0 %v4461_v48  ;;  %v1844_v15 = vand.u32 4294901760, %v1843_v46  ;;  %1660 = vmatpush.msra.mxu2 %v1432_v33 }
 0x313   :  { %1719 = vmatpush.msra.mxu3 %v4175_v61  ;;  %v3215_v61 = vld [vmem:[%s5523_s5 + $0xc8] sm:$0xff]  ;;  %1839 = vmatpush.msra.mxu1 %v1838_v38  ;;  %v1855_v55 = vsub.f32 %v4478_v58, %v1854_v60  ;;  %v1860_v59 = vand.u32 4294901760, %v4493_v11  ;;  %v4540_v8 = vsub.f32 %v3214_v49, %v4516_v16 }
 0x314   :  { %v1256_v30 = vmul.f32 0.5, %v1255_v9  ;;  %v4490_v24 = vand.u32 4294901760, %v3215_v61  ;;  %1774 = vmatpush.msra.mxu0 %v4475_v10  ;;  %1664 = vmatpush.msra.mxu2 %v1438_v53 }
 0x315   :  { %1721 = vmatpush.msra.mxu3 %v4190_v32  ;;  %v1849_v32 = vsub.f32 %v4464_v35, %v1848_v41  ;;  %1845 = vmatpush.msra.mxu1 %v1844_v15  ;;  %v5568_v49 = vand.u32 4294901760, %v4540_v8 }
 0x316   :  { %v1257_v9 = vsub.f32 1.5, %v1256_v30  ;;  %v1200_v30 = vld [vmem:[%s5524_s3] sm:$0x1]  ;;  %v4519_v38 = vsub.f32 %v3215_v61, %v4490_v24  ;;  %1776 = vmatpush.msra.mxu0 %v4490_v24  ;;  %v1861_v61 = vsub.f32 %v4493_v11, %v1860_v59  ;;  %1668 = vmatpush.msra.mxu2 %v1444_v52 }
 0x317   :  { %1723 = vmatpush.msra.mxu3 %v4206_v31  ;;  %v1850_v33 = vand.u32 4294901760, %v1849_v32  ;;  %v3213_v31 = vld [vmem:[%s5523_s5 + $0xb8] sm:$0xff] }
 0x318   :  { %v1258_v45 = vmul.f32 %v4422_v40, %v1257_v9  ;;  %v1856_v9 = vand.u32 4294901760, %v1855_v55  ;;  %1778 = vmatpush.msra.mxu0 %v4516_v16  ;;  %v4537_v15 = vand.u32 4294901760, %v3213_v31  ;;  %v1862_v32 = vand.u32 4294901760, %v1861_v61  ;;  %1672 = vmatpush.msra.mxu2 %v1450_v42 }
 0x319   :  { %1725 = vmatpush.msra.mxu3 %v4217_v1  ;;  %1851 = vmatpush.msra.mxu1 %v1850_v33  ;;  %v3212_v1 = vld [vmem:[%s5523_s5 + $0xb0] sm:$0xff] }
 0x31a   :  { %v1262_v18 = vsel %vm1261_vm9, %v4422_v40, %v1258_v45  ;;  %v1866_v40 = vand.u32 4294901760, %v4519_v38  ;;  %v1201_v45 = vld [vmem:[%s5525_s4] sm:$0x1]  ;;  %1780 = vmatpush.msra.mxu0 %v4537_v15  ;;  %1676 = vmatpush.msra.mxu2 %v1456_v25 }
 0x31b   :  { %v1263_v46 = vmul.f32 %v1262_v18, %v1200_v30  ;;  %1727 = vmatpush.msra.mxu3 %v4233_v4  ;;  %1857 = vmatpush.msra.mxu1 %v1856_v9  ;;  %v4554_v18 = vand.u32 4294901760, %v3212_v1  ;;  %v3211_v4 = vld [vmem:[%s5523_s5 + $0xa8] sm:$0xff] }
 0x31c   :  { %v1867_v55 = vsub.f32 %v4519_v38, %v1866_v40  ;;  %1680 = vmatpush.msra.mxu2 %v1462_v5  ;;  %v3207_v5 = vld [vmem:[%s5523_s5 + $0x88] sm:$0xff] }
 0x31d   :  { %v1264_v53 = vmul.f32 %v1263_v46, %v4293_v47  ;;  %v1267_v30 = vperm.slane %v1263_v46, 0  ;;  %v4557_v47 = vsub.f32 %v3213_v31, %v4537_v15  ;;  %1729 = vmatpush.msra.mxu3 %v4245_v12  ;;  %1863 = vmatpush.msra.mxu1 %v1862_v32  ;;  %v1873_v31 = vsub.f32 %v4540_v8, %v5568_v49 }
 0x31e   :  { %v1868_v9 = vand.u32 4294901760, %v1867_v55  ;;  %1782 = vmatpush.msra.mxu0 %v4554_v18  ;;  %v4579_v12 = vsub.f32 %v3212_v1, %v4554_v18  ;;  %1684 = vmatpush.msra.mxu2 %v1468_v43 }
 0x31f   :  { %v1265_v33 = vsub.f32 %v1201_v45, %v1264_v53  ;;  %v1269_v46 = vmul.f32 %v1267_v30, %v4119_v20  ;;  %v1270_v44 = vmul.f32 %v1267_v30, %v4116_v28  ;;  %v1271_v52 = vmul.f32 %v1267_v30, %v4121_v62  ;;  %v3210_v20 = vld [vmem:[%s5523_s5 + $0xa0] sm:$0xff]  ;;  %1731 = vmatpush.msra.mxu3 %v4263_v39 }
 0x320   :  { %v5566_v61 = vand.u32 4294901760, %v4557_v47  ;;  %v1272_v28 = vmul.f32 %v1267_v30, %v4132_v0  ;;  %v4576_v62 = vand.u32 4294901760, %v3211_v4  ;;  %1869 = vmatpush.msra.mxu1 %v1868_v9  ;;  %v1874_v53 = vand.u32 4294901760, %v1873_v31  ;;  %v3209_v0 = vld [vmem:[%s5523_s5 + $0x98] sm:$0xff]  ;;  %1688 = vmatpush.msra.mxu2 %v1474_v13 }
 0x321   :  { %v1274_v45 = vperm.slane %v1265_v33, 0  ;;  %v4586_v55 = vand.u32 4294901760, %v3210_v20  ;;  %1733 = vmatpush.msra.mxu3 %v4281_v63  ;;  %v5565_v42 = vand.u32 4294901760, %v4579_v12  ;;  %v4597_v31 = vand.u32 4294901760, %v3209_v0 }
 0x322   :  { %v1879_v32 = vsub.f32 %v4557_v47, %v5566_v61  ;;  %1875 = vmatpush.msra.mxu1 %v1874_v53  ;;  %1784 = vmatpush.msra.mxu0 %v4576_v62  ;;  %v4595_v9 = vsub.f32 %v3211_v4, %v4576_v62 }
 0x323   :  { %v1276_v39 = vadd.f32 %v1274_v45, %v1269_v46  ;;  %v1279_v30 = vadd.f32 %v1274_v45, %v1272_v28  ;;  %v1277_v33 = vadd.f32 %v1274_v45, %v1270_v44  ;;  %v1278_v1 = vadd.f32 %v1274_v45, %v1271_v52  ;;  %v3208_v46 = vld [vmem:[%s5523_s5 + $0x90] sm:$0xff]  ;;  %1735 = vmatpush.msra.mxu3 %v4289_v26 }
 0x324   :  { %v1880_v3 = vand.u32 4294901760, %v1879_v32  ;;  %v1885_v4 = vsub.f32 %v4579_v12, %v5565_v42  ;;  %1786 = vmatpush.msra.mxu0 %v4586_v55  ;;  %v5564_v45 = vand.u32 4294901760, %v4595_v9  ;;  %v4619_v53 = vsub.f32 %v3210_v20, %v4586_v55  ;;  %1692 = vmatpush.msra.mxu2 %v5626_v21 }
 0x325   :  { %v4602_v28 = vmax.f32 %v1276_v39, 0.0  ;;  %v4604_v44 = vmax.f32 %v1279_v30, 0.0  ;;  %v4606_v63 = vmax.f32 %v1277_v33, 0.0  ;;  %v4608_v52 = vmax.f32 %v1278_v1, 0.0  ;;  %1737 = vmatpush.msra.mxu3 %v4306_v2 }
 0x326   :  { %1881 = vmatpush.msra.mxu1 %v1880_v3  ;;  %v4621_v32 = vand.u32 4294901760, %v3208_v46  ;;  %v1886_v30 = vand.u32 4294901760, %v1885_v4  ;;  %v1891_v20 = vsub.f32 %v4595_v9, %v5564_v45  ;;  %1788 = vmatpush.msra.mxu0 %v4597_v31  ;;  %v5567_v33 = vand.u32 4294901760, %v4619_v53 }
 0x327   :  { %v1301_v39 = vrot.slane %v4602_v28, 7  ;;  %v1304_v26 = vrot.slane %v4604_v44, 7  ;;  %v1302_v54 = vrot.slane %v4606_v63, 7  ;;  %v1303_v25 = vrot.slane %v4608_v52, 7  ;;  %1739 = vmatpush.msra.mxu3 %v4322_v57 }
 0x328   :  { %v4636_v1 = vsub.f32 %v3209_v0, %v4597_v31  ;;  %1887 = vmatpush.msra.mxu1 %v1886_v30  ;;  %1790 = vmatpush.msra.mxu0 %v4621_v32  ;;  %v1892_v57 = vand.u32 4294901760, %v1891_v20  ;;  %v1897_v4 = vsub.f32 %v4619_v53, %v5567_v33  ;;  %v4674_v61 = vsub.f32 %v3208_v46, %v4621_v32 }
 0x329   :  { %v1308_v2 = vsel %vm118_vm0, %v1304_v26, %v1301_v39  ;;  %v1307_v14 = vsel %vm118_vm0, %v1301_v39, %v1302_v54  ;;  %v1306_v0 = vsel %vm118_vm0, %v1302_v54, %v1303_v25  ;;  %1741 = vmatpush.msra.mxu3 %v4352_v50  ;;  %v3206_v54 = vld [vmem:[%s5523_s5 + $0x80] sm:$0xff]  ;;  %v5627_v21 = vand.u32 4294901760, %v4372_v17 }
 0x32a   :  { %v1309_v45 = vsel %vm3488_vm3, %v1308_v2, 0.0  ;;  %v4657_v39 = vand.u32 4294901760, %v1307_v14  ;;  %v5569_v30 = vand.u32 4294901760, %v4636_v1  ;;  %v4669_v2 = vand.u32 4294901760, %v3207_v5  ;;  %1893 = vmatpush.msra.mxu1 %v1892_v57 }
 0x32b   :  { %v4655_v42 = vand.u32 4294901760, %v1309_v45  ;;  %v1898_v50 = vand.u32 4294901760, %v1897_v4  ;;  %v1311_v6 = vsel %vm3454_vm2, %v1306_v0, 0.0  ;;  %1743 = vmatpush.msra.mxu3 %v4354_v37  ;;  %v4683_v49 = vand.u32 4294901760, %v3206_v54  ;;  %1696 = vmatpush.msra.mxu2 %v5627_v21 }
 0x32c   :  { %v1903_v43 = vsub.f32 %v4636_v1, %v5569_v30  ;;  %1792 = vmatpush.msra.mxu0 %v4669_v2  ;;  %v1370_v57 = vsub.f32 %v1307_v14, %v4657_v39  ;;  %v1908_v46 = vand.u32 4294901760, %v4674_v61  ;;  %v4688_v33 = vsub.f32 %v3207_v5, %v4669_v2 }
 0x32d   :  { %1491 = vmatmul.f32.vlgmr.msrb.gmra.mxu3 %v4655_v42  ;;  %v1362_v20 = vsub.f32 %v1309_v45, %v4655_v42  ;;  %1899 = vmatpush.msra.mxu1 %v1898_v50  ;;  %v4697_v14 = vand.u32 4294901760, %v1311_v6  ;;  %v5628_v21 = vand.u32 4294901760, %v4447_v56 }
 0x32e   :  { %v1904_v0 = vand.u32 4294901760, %v1903_v43  ;;  %1745 = vmatpush.msra.mxu3 %v4356_v51  ;;  %1794 = vmatpush.msra.mxu0 %v4683_v49  ;;  %v1909_v4 = vsub.f32 %v4674_v61, %v1908_v46  ;;  %v1914_v30 = vand.u32 4294901760, %v4688_v33  ;;  %v4702_v51 = vsub.f32 %v3206_v54, %v4683_v49 }
 0x32f   :  { %1557 = vmatmul.f32.vlgmr.msrb.gmra.mxu0 %v1362_v20  ;;  %v1363_v45 = vand.u32 4294901760, %v1362_v20  ;;  %v1371_v50 = vand.u32 4294901760, %v1370_v57  ;;  %v2197_v54 = vrot.slane %v4602_v28, 1 }
 0x330   :  { %2011 = vmatpush.msrb.mxu3 %v4404_v34  ;;  %1905 = vmatpush.msra.mxu1 %v1904_v0  ;;  %v1915_v43 = vsub.f32 %v4688_v33, %v1914_v30  ;;  %v5570_v0 = vand.u32 4294901760, %v4702_v51 }
 0x331   :  { %1611 = vmatmul.f32.vlgmr.msrb.gmra.mxu1 %v1363_v45  ;;  %v1364_v37 = vsub.f32 %v1362_v20, %v1363_v45  ;;  %v1910_v20 = vand.u32 4294901760, %v1909_v4  ;;  %v5625_v45 = vand.u32 4294901760, %v4413_v36  ;;  %v1372_v22 = vsub.f32 %v1370_v57, %v1371_v50 }
 0x332   :  { %2013 = vmatpush.msrb.mxu3 %v4415_v7  ;;  %v1916_v13 = vand.u32 4294901760, %v1915_v43  ;;  %v1921_v4 = vsub.f32 %v4702_v51, %v5570_v0  ;;  %v1305_v0 = vsel %vm118_vm0, %v1303_v25, %v1304_v26 }
 0x333   :  { %v1365_v5 = vand.u32 4294901760, %v1364_v37  ;;  %2070 = vmatpush.msrb.mxu0 %v5625_v45  ;;  %v2198_v37 = vrot.slane %v4606_v63, 1  ;;  %1911 = vmatpush.msra.mxu1 %v1910_v20  ;;  %v2199_v45 = vrot.slane %v4608_v52, 1  ;;  %v2200_v20 = vrot.slane %v4604_v44, 1 }
 0x334   :  { %2015 = vmatpush.msrb.mxu3 %v4426_v19  ;;  %v1373_v26 = vand.u32 4294901760, %v1372_v22  ;;  %v5633_v22 = vand.u32 4294901760, %v4619_v53 }
 0x335   :  { %1366 = vmatmul.f32.vlgmr.msrb.gmra.mxu2 %v1365_v5  ;;  %1495 = vmatmul.f32.gmra.mxu3 %v4657_v39  ;;  %v1378_v5 = vsub.f32 %v1311_v6, %v4697_v14  ;;  %v4726_v43 = vsel %vm828_vm4, %v2197_v54, %v2198_v37  ;;  %v4740_v17 = vsel %vm828_vm4, %v2198_v37, %v2199_v45  ;;  %v3234_v37 = vld [vmem:[%s5523_s5 + $0x160] sm:$0xff] }
 0x336   :  { %1917 = vmatpush.msra.mxu1 %v1916_v13  ;;  %2074 = vmatpush.msrb.mxu0 %v1836_v27  ;;  %v4744_v6 = vsel %vm828_vm4, %v2199_v45, %v2200_v20  ;;  %v4748_v13 = vand.u32 4294901760, %v1305_v0  ;;  %v4754_v27 = vsel %vm828_vm4, %v2200_v20, %v2197_v54  ;;  %v3235_v54 = vld [vmem:[%s5523_s5 + $0x168] sm:$0xff] }
 0x337   :  { %1562 = vmatmul.f32.gmra.mxu0 %v1370_v57  ;;  %v1922_v57 = vand.u32 4294901760, %v1921_v4  ;;  %2017 = vmatpush.msrb.mxu3 %v4444_v29  ;;  %v1379_v25 = vand.u32 4294901760, %v1378_v5 }
 0x338   :  { %2078 = vmatpush.msrb.mxu0 %v5628_v21  ;;  %1943 = vmatpush.msrb.mxu2 %v4413_v36  ;;  %v1386_v36 = vsub.f32 %v1305_v0, %v4748_v13  ;;  %v4878_v21 = vand.u32 4294901760, %v4604_v44 }
 0x339   :  { %1617 = vmatmul.f32.gmra.mxu1 %v1371_v50  ;;  %2019 = vmatpush.msrb.mxu3 %v4461_v48  ;;  %v4761_v50 = vand.u32 4294901760, %v4602_v28 }
 0x33a   :  { %1923 = vmatpush.msra.mxu1 %v1922_v57  ;;  %2082 = vmatpush.msrb.mxu0 %v1848_v41 }
 0x33b   :  { %1946 = vmatpush.msrb.mxu2 %v4429_v23  ;;  %2021 = vmatpush.msrb.mxu3 %v4475_v10  ;;  %v4772_v41 = vsub.f32 %v4602_v28, %v4761_v50  ;;  %v1387_v23 = vand.u32 4294901760, %v1386_v36  ;;  %v5631_v28 = vand.u32 4294901760, %v4579_v12 }
 0x33c   :  { %2149 = vmatpush.msrb.mxu1 %v4404_v34  ;;  %v1380_v34 = vsub.f32 %v1378_v5, %v1379_v25  ;;  %2086 = vmatpush.msrb.mxu0 %v1854_v60 }
 0x33d   :  { %1374 = vmatmul.f32.gmra.mxu2 %v1373_v26  ;;  %1499 = vmatmul.f32.gmra.mxu3 %v4697_v14  ;;  %v3233_v26 = vld [vmem:[%s5523_s5 + $0x158] sm:$0xff] }
 0x33e   :  { %2151 = vmatpush.msrb.mxu1 %v4415_v7  ;;  %1949 = vmatpush.msrb.mxu2 %v4447_v56  ;;  %v1381_v7 = vand.u32 4294901760, %v1380_v34  ;;  %v1388_v56 = vsub.f32 %v1386_v36, %v1387_v23 }
 0x33f   :  { %1567 = vmatmul.f32.gmra.mxu0 %v1378_v5  ;;  %2023 = vmatpush.msrb.mxu3 %v4490_v24 }
 0x340   :  { %2153 = vmatpush.msrb.mxu1 %v4426_v19  ;;  %2090 = vmatpush.msrb.mxu0 %v1860_v59  ;;  %v1797_v19 = vand.u32 4294901760, %v4772_v41 }
 0x341   :  { %1623 = vmatmul.f32.gmra.mxu1 %v1379_v25  ;;  %1952 = vmatpush.msrb.mxu2 %v4464_v35  ;;  %v5634_v25 = vand.u32 4294901760, %v4636_v1 }
 0x342   :  { %2155 = vmatpush.msrb.mxu1 %v4444_v29  ;;  %2025 = vmatpush.msrb.mxu3 %v4516_v16  ;;  %v4785_v29 = vand.u32 4294901760, %v4606_v63  ;;  %v1798_v35 = vsub.f32 %v4772_v41, %v1797_v19 }
 0x343   :  { %2094 = vmatpush.msrb.mxu0 %v1866_v40  ;;  %1955 = vmatpush.msrb.mxu2 %v4478_v58  ;;  %v5630_v58 = vand.u32 4294901760, %v4557_v47  ;;  %v3237_v40 = vld [vmem:[%s5523_s5 + $0x178] sm:$0xff] }
 0x344   :  { %2157 = vmatpush.msrb.mxu1 %v4461_v48  ;;  %2027 = vmatpush.msrb.mxu3 %v4537_v15  ;;  %v5629_v48 = vand.u32 4294901760, %v4540_v8  ;;  %v4799_v60 = vsub.f32 %v4606_v63, %v4785_v29  ;;  %v1799_v59 = vand.u32 4294901760, %v1798_v35  ;;  %v5632_v63 = vand.u32 4294901760, %v4595_v9  ;;  %v3231_v35 = vld [vmem:[%s5523_s5 + $0x148] sm:$0xff] }
 0x345   :  { %1382 = vmatmul.f32.gmra.mxu2 %v1381_v7  ;;  %1503 = vmatmul.f32.gmra.mxu3 %v4748_v13  ;;  %v3232_v7 = vld [vmem:[%s5523_s5 + $0x150] sm:$0xff] }
 0x346   :  { %2159 = vmatpush.msrb.mxu1 %v4475_v10  ;;  %2098 = vmatpush.msrb.mxu0 %v5629_v48  ;;  %v1389_v10 = vand.u32 4294901760, %v1388_v56  ;;  %v4900_v56 = vand.u32 4294901760, %v3232_v7  ;;  %v4908_v48 = vsub.f32 %v4604_v44, %v4878_v21 }
 0x347   :  { %1572 = vmatmul.f32.gmra.mxu0 %v1386_v36  ;;  %1958 = vmatpush.msrb.mxu2 %v4493_v11  ;;  %v1805_v11 = vand.u32 4294901760, %v4799_v60  ;;  %v4889_v36 = vand.u32 4294901760, %v3233_v26 }
 0x348   :  { %2161 = vmatpush.msrb.mxu1 %v4490_v24  ;;  %2029 = vmatpush.msrb.mxu3 %v4554_v18  ;;  %v4812_v24 = vand.u32 4294901760, %v4608_v52 }
 0x349   :  { %1629 = vmatmul.f32.gmra.mxu1 %v1387_v23  ;;  %2102 = vmatpush.msrb.mxu0 %v5630_v58  ;;  %v4928_v58 = vand.u32 4294901760, %v3231_v35 }
 0x34a   :  { %1961 = vmatpush.msrb.mxu2 %v4519_v38  ;;  %2163 = vmatpush.msrb.mxu1 %v4516_v16  ;;  %v4820_v16 = vand.u32 4294901760, %v3237_v40  ;;  %v3236_v38 = vld [vmem:[%s5523_s5 + $0x170] sm:$0xff] }
 0x34b   :  { %2031 = vmatpush.msrb.mxu3 %v4576_v62  ;;  %2106 = vmatpush.msrb.mxu0 %v5631_v28  ;;  %v4832_v0 = vand.u32 4294901760, %v3236_v38  ;;  %v4939_v28 = vsub.f32 %v3231_v35, %v4928_v58 }
 0x34c   :  { %2165 = vmatpush.msrb.mxu1 %v4537_v15  ;;  %1964 = vmatpush.msrb.mxu2 %v4540_v8  ;;  %v4830_v3 = vsub.f32 %v3237_v40, %v4820_v16  ;;  %v1806_v15 = vsub.f32 %v4799_v60, %v1805_v11  ;;  %v4840_v8 = vsub.f32 %v4608_v52, %v4812_v24  ;;  %v4855_v52 = vand.u32 4294901760, %v3235_v54 }
 0x34d   :  { %1390 = vmatmul.f32.gmra.mxu2 %v1389_v10  ;;  %1747 = vmatmul.f32.vlgmr.msra.gmra.mxu3 %v4655_v42  ;;  %v4853_v45 = vsub.f32 %v3236_v38, %v4832_v0  ;;  %v3230_v10 = vld [vmem:[%s5523_s5 + $0x140] sm:$0xff] }
 0x34e   :  { %2033 = vmatpush.msrb.mxu3 %v4586_v55  ;;  %2110 = vmatpush.msrb.mxu0 %v5632_v63  ;;  %v2293_v4 = vand.u32 4294901760, %v4830_v3  ;;  %v4869_v20 = vsub.f32 %v3235_v54, %v4855_v52  ;;  %v4941_v38 = vand.u32 4294901760, %v3230_v10  ;;  %v5635_v63 = vand.u32 4294901760, %v4702_v51 }
 0x34f   :  { %1800 = vmatmul.f32.vlgmr.msra.gmra.mxu0 %v1799_v59  ;;  %1967 = vmatpush.msrb.mxu2 %v4557_v47  ;;  %v4857_v47 = vand.u32 4294901760, %v3234_v37  ;;  %v2299_v5 = vand.u32 4294901760, %v4853_v45 }
 0x350   :  { %2167 = vmatpush.msrb.mxu1 %v4554_v18  ;;  %2035 = vmatpush.msrb.mxu3 %v4597_v31  ;;  %v2294_v18 = vsub.f32 %v4830_v3, %v2293_v4  ;;  %v2305_v34 = vand.u32 4294901760, %v4869_v20 }
 0x351   :  { %1925 = vmatmul.f32.vlgmr.msra.gmra.mxu1 %v4761_v50  ;;  %2114 = vmatpush.msrb.mxu0 %v5633_v22  ;;  %v4872_v57 = vsub.f32 %v3234_v37, %v4857_v47  ;;  %v3228_v22 = vld [vmem:[%s5523_s5 + $0x130] sm:$0xff] }
 0x352   :  { %1970 = vmatpush.msrb.mxu2 %v4579_v12  ;;  %2169 = vmatpush.msrb.mxu1 %v4576_v62  ;;  %v1807_v12 = vand.u32 4294901760, %v1806_v15  ;;  %v1813_v62 = vand.u32 4294901760, %v4840_v8  ;;  %v2295_v23 = vand.u32 4294901760, %v2294_v18  ;;  %v2306_v44 = vsub.f32 %v4869_v20, %v2305_v34 }
 0x353   :  { %2037 = vmatpush.msrb.mxu3 %v4621_v32  ;;  %2118 = vmatpush.msrb.mxu0 %v5634_v25  ;;  %v2329_v18 = vand.u32 4294901760, %v4939_v28 }
 0x354   :  { %2171 = vmatpush.msrb.mxu1 %v4586_v55  ;;  %1973 = vmatpush.msrb.mxu2 %v4595_v9  ;;  %v2300_v55 = vsub.f32 %v4853_v45, %v2299_v5  ;;  %v1814_v9 = vsub.f32 %v4840_v8, %v1813_v62  ;;  %v2307_v15 = vand.u32 4294901760, %v2306_v44 }
 0x355   :  { %1698 = vmatmul.f32.vlgmr.msra.gmra.mxu2 %v4655_v42  ;;  %1751 = vmatmul.f32.gmra.mxu3 %v4657_v39  ;;  %v2311_v42 = vand.u32 4294901760, %v4872_v57 }
 0x356   :  { %2039 = vmatpush.msrb.mxu3 %v4669_v2  ;;  %2122 = vmatpush.msrb.mxu0 %v1908_v46  ;;  %v4912_v46 = vsub.f32 %v3233_v26, %v4889_v36  ;;  %v2301_v59 = vand.u32 4294901760, %v2300_v55  ;;  %v4967_v26 = vand.u32 4294901760, %v3228_v22  ;;  %v3226_v55 = vld [vmem:[%s5523_s5 + $0x120] sm:$0xff] }
 0x357   :  { %1808 = vmatmul.f32.gmra.mxu0 %v1807_v12  ;;  %1976 = vmatpush.msrb.mxu2 %v4619_v53  ;;  %v4926_v53 = vsub.f32 %v3232_v7, %v4900_v56  ;;  %v4965_v12 = vsub.f32 %v3230_v10, %v4941_v38 }
 0x358   :  { %2173 = vmatpush.msrb.mxu1 %v4597_v31  ;;  %2041 = vmatpush.msrb.mxu3 %v4683_v49  ;;  %v2312_v31 = vsub.f32 %v4872_v57, %v2311_v42  ;;  %v2317_v40 = vand.u32 4294901760, %v4912_v46 }
 0x359   :  { %1929 = vmatmul.f32.gmra.mxu1 %v4785_v29  ;;  %2126 = vmatpush.msrb.mxu0 %v1914_v30  ;;  %v1821_v30 = vand.u32 4294901760, %v4908_v48  ;;  %v2323_v54 = vand.u32 4294901760, %v4926_v53  ;;  %v2335_v35 = vand.u32 4294901760, %v4965_v12 }
 0x35a   :  { %1979 = vmatpush.msrb.mxu2 %v4636_v1  ;;  %2175 = vmatpush.msrb.mxu1 %v4621_v32  ;;  %v1815_v1 = vand.u32 4294901760, %v1814_v9  ;;  %v3229_v32 = vld [vmem:[%s5523_s5 + $0x138] sm:$0xff]  ;;  %v2330_v9 = vsub.f32 %v4939_v28, %v2329_v18 }
 0x35b   :  { %2296 = vmatpush.msra.mxu3 %v2295_v23  ;;  %2130 = vmatpush.msrb.mxu0 %v5635_v63  ;;  %v4953_v37 = vand.u32 4294901760, %v3229_v32  ;;  %v2324_v25 = vsub.f32 %v4926_v53, %v2323_v54  ;;  %v4987_v23 = vsub.f32 %v3228_v22, %v4967_v26  ;;  %v2336_v63 = vsub.f32 %v4965_v12, %v2335_v35  ;;  %v3224_v22 = vld [vmem:[%s5523_s5 + $0x110] sm:$0xff] }
 0x35c   :  { %2177 = vmatpush.msrb.mxu1 %v4669_v2  ;;  %1982 = vmatpush.msrb.mxu2 %v4674_v61  ;;  %v2318_v2 = vsub.f32 %v4912_v46, %v2317_v40  ;;  %v1822_v61 = vsub.f32 %v4908_v48, %v1821_v30 }
 0x35d   :  { %1702 = vmatmul.f32.gmra.mxu2 %v4657_v39  ;;  %1755 = vmatmul.f32.gmra.mxu3 %v4697_v14  ;;  %v2313_v39 = vand.u32 4294901760, %v2312_v31  ;;  %v4982_v7 = vsub.f32 %v3229_v32, %v4953_v37  ;;  %v3225_v31 = vld [vmem:[%s5523_s5 + $0x118] sm:$0xff]  ;;  %v2331_v32 = vand.u32 4294901760, %v2330_v9 }
 0x35e   :  { %2179 = vmatpush.msrb.mxu1 %v4683_v49  ;;  %2302 = vmatpush.msra.mxu3 %v2301_v59  ;;  %v3227_v49 = vld [vmem:[%s5523_s5 + $0x128] sm:$0xff]  ;;  %v1823_v44 = vand.u32 4294901760, %v1822_v61 }
 0x35f   :  { %1816 = vmatmul.f32.gmra.mxu0 %v1815_v1  ;;  %1985 = vmatpush.msrb.mxu2 %v4688_v33  ;;  %v2319_v33 = vand.u32 4294901760, %v2318_v2  ;;  %v4997_v10 = vand.u32 4294901760, %v3227_v49  ;;  %v5572_v59 = vand.u32 4294901760, %v4982_v7  ;;  %v5007_v1 = vand.u32 4294901760, %v3226_v55 }
 0x360   :  { %2406 = vmatpush.msra.mxu0 %v4830_v3  ;;  %2308 = vmatpush.msra.mxu3 %v2307_v15 }
 0x361   :  { %1933 = vmatmul.f32.gmra.mxu1 %v4812_v24  ;;  %1988 = vmatpush.msrb.mxu2 %v4702_v51  ;;  %v2325_v51 = vand.u32 4294901760, %v2324_v25  ;;  %v5016_v15 = vsub.f32 %v3227_v49, %v4997_v10  ;;  %v2342_v2 = vsub.f32 %v4982_v7, %v5572_v59  ;;  %v5030_v61 = vsub.f32 %v3226_v55, %v5007_v1  ;;  %v3223_v25 = vld [vmem:[%s5523_s5 + $0x108] sm:$0xff] }
 0x362   :  { %2409 = vmatpush.msra.mxu0 %v4853_v45  ;;  %2474 = vmatpush.msra.mxu1 %v4820_v16 }
 0x363   :  { %2314 = vmatpush.msra.mxu3 %v2313_v39  ;;  %2227 = vmatpush.msra.mxu2 %v4820_v16  ;;  %v5018_v39 = vand.u32 4294901760, %v3225_v31  ;;  %v5573_v9 = vand.u32 4294901760, %v5016_v15 }
 0x364   :  { %2412 = vmatpush.msra.mxu0 %v4869_v20  ;;  %2476 = vmatpush.msra.mxu1 %v4832_v0 }
 0x365   :  { %1706 = vmatmul.f32.gmra.mxu2 %v4697_v14  ;;  %1759 = vmatmul.f32.gmra.mxu3 %v4748_v13  ;;  %v5571_v14 = vand.u32 4294901760, %v4987_v23  ;;  %v5043_v55 = vsub.f32 %v3225_v31, %v5018_v39  ;;  %v5056_v31 = vand.u32 4294901760, %v3223_v25 }
 0x366   :  { %2320 = vmatpush.msra.mxu3 %v2319_v33  ;;  %2415 = vmatpush.msra.mxu0 %v4872_v57  ;;  %v2337_v33 = vand.u32 4294901760, %v2336_v63  ;;  %v2359_v63 = vand.u32 4294901760, %v5030_v61 }
 0x367   :  { %1824 = vmatmul.f32.gmra.mxu0 %v1823_v44  ;;  %2229 = vmatpush.msra.mxu2 %v4832_v0  ;;  %v2348_v49 = vsub.f32 %v4987_v23, %v5571_v14  ;;  %v5045_v44 = vand.u32 4294901760, %v3224_v22  ;;  %v2365_v14 = vand.u32 4294901760, %v5043_v55 }
 0x368   :  { %2478 = vmatpush.msra.mxu1 %v4855_v52  ;;  %2326 = vmatpush.msra.mxu3 %v2325_v51  ;;  %v3222_v51 = vld [vmem:[%s5523_s5 + $0x100] sm:$0xff] }
 0x369   :  { %1937 = vmatmul.f32.gmra.mxu1 %v4878_v21  ;;  %2418 = vmatpush.msra.mxu0 %v4912_v46  ;;  %v5068_v59 = vand.u32 4294901760, %v3222_v51 }
 0x36a   :  { %2231 = vmatpush.msra.mxu2 %v4855_v52  ;;  %2480 = vmatpush.msra.mxu1 %v4857_v47 }
 0x36b   :  { %2332 = vmatpush.msra.mxu3 %v2331_v32  ;;  %2421 = vmatpush.msra.mxu0 %v4926_v53  ;;  %v2343_v32 = vand.u32 4294901760, %v2342_v2  ;;  %v5066_v2 = vsub.f32 %v3224_v22, %v5045_v44  ;;  %v2366_v22 = vsub.f32 %v5043_v55, %v2365_v14 }
 0x36c   :  { %2482 = vmatpush.msra.mxu1 %v4889_v36  ;;  %2233 = vmatpush.msra.mxu2 %v4857_v47 }
 0x36d   :  { %1710 = vmatmul.f32.gmra.mxu2 %v4748_v13  ;;  %2045 = vmatmul.f32.vlgmr.msrb.gmra.mxu3 %v1797_v19  ;;  %v2349_v13 = vand.u32 4294901760, %v2348_v49  ;;  %v2354_v19 = vsub.f32 %v5016_v15, %v5573_v9  ;;  %v2360_v49 = vsub.f32 %v5030_v61, %v2359_v63  ;;  %v5087_v9 = vsub.f32 %v3222_v51, %v5068_v59 }
 0x36e   :  { %2338 = vmatpush.msra.mxu3 %v2337_v33  ;;  %2424 = vmatpush.msra.mxu0 %v4939_v28  ;;  %v5077_v33 = vsub.f32 %v3223_v25, %v5056_v31  ;;  %v2367_v51 = vand.u32 4294901760, %v2366_v22  ;;  %v2759_v22 = vld [vmem:[%s5526_s9 + $0x38] sm:$0xff] }
 0x36f   :  { %2132 = vmatmul.f32.vlgmr.msrb.gmra.mxu0 %v4761_v50  ;;  %2235 = vmatpush.msra.mxu2 %v4889_v36  ;;  %v2361_v25 = vand.u32 4294901760, %v2360_v49 }
 0x370   :  { %2484 = vmatpush.msra.mxu1 %v4900_v56  ;;  %2344 = vmatpush.msra.mxu3 %v2343_v32  ;;  %v2371_v32 = vand.u32 4294901760, %v5066_v2 }
 0x371   :  { %2181 = vmatmul.f32.vlgmr.msrb.gmra.mxu1 %v4761_v50  ;;  %2427 = vmatpush.msra.mxu0 %v4965_v12  ;;  %v2355_v50 = vand.u32 4294901760, %v2354_v19 }
 0x372   :  { %2237 = vmatpush.msra.mxu2 %v4900_v56  ;;  %2486 = vmatpush.msra.mxu1 %v4928_v58 }
 0x373   :  { %2350 = vmatpush.msra.mxu3 %v2349_v13  ;;  %2430 = vmatpush.msra.mxu0 %v4982_v7  ;;  %v5575_v13 = vand.u32 4294901760, %v5077_v33 }
 0x374   :  { %2488 = vmatpush.msra.mxu1 %v4941_v38  ;;  %2239 = vmatpush.msra.mxu2 %v4928_v58 }
 0x375   :  { %1991 = vmatmul.f32.vlgmr.msrb.gmra.mxu2 %v4772_v41  ;;  %2051 = vmatmul.f32.gmra.mxu3 %v1805_v11  ;;  %v2372_v41 = vsub.f32 %v5066_v2, %v2371_v32  ;;  %v5574_v11 = vand.u32 4294901760, %v5087_v9  ;;  %v2378_v19 = vsub.f32 %v5077_v33, %v5575_v13 }
 0x376   :  { %2356 = vmatpush.msra.mxu3 %v2355_v50  ;;  %2433 = vmatpush.msra.mxu0 %v4987_v23 }
 0x377   :  { %2136 = vmatmul.f32.gmra.mxu0 %v4785_v29  ;;  %2241 = vmatpush.msra.mxu2 %v4941_v38  ;;  %v2373_v49 = vand.u32 4294901760, %v2372_v41  ;;  %v2379_v50 = vand.u32 4294901760, %v2378_v19 }
 0x378   :  { %2490 = vmatpush.msra.mxu1 %v4953_v37  ;;  %2362 = vmatpush.msra.mxu3 %v2361_v25  ;;  %v5125_v25 = vand.u32 4294901760, %v2759_v22 }
 0x379   :  { %2185 = vmatmul.f32.gmra.mxu1 %v4785_v29  ;;  %2436 = vmatpush.msra.mxu0 %v5016_v15  ;;  %v2384_v29 = vsub.f32 %v5087_v9, %v5574_v11 }
 0x37a   :  { %2243 = vmatpush.msra.mxu2 %v4953_v37  ;;  %2492 = vmatpush.msra.mxu1 %v4967_v26 }
 0x37b   :  { %2368 = vmatpush.msra.mxu3 %v2367_v51  ;;  %2439 = vmatpush.msra.mxu0 %v5030_v61  ;;  %v5134_v51 = vsub.f32 %v2759_v22, %v5125_v25 }
 0x37c   :  { %2494 = vmatpush.msra.mxu1 %v4997_v10  ;;  %2245 = vmatpush.msra.mxu2 %v4967_v26 }
 0x37d   :  { %1996 = vmatmul.f32.gmra.mxu2 %v4799_v60  ;;  %2057 = vmatmul.f32.gmra.mxu3 %v1813_v62  ;;  %v2385_v60 = vand.u32 4294901760, %v2384_v29  ;;  %v2758_v62 = vld [vmem:[%s5526_s9 + $0x30] sm:$0xff]  ;;  %v5577_v19 = vand.u32 4294901760, %v5134_v51 }
 0x37e   :  { %2374 = vmatpush.msra.mxu3 %v2373_v49  ;;  %2442 = vmatpush.msra.mxu0 %v5043_v55  ;;  %v5136_v41 = vand.u32 4294901760, %v2758_v62  ;;  %v5643_v55 = vand.u32 4294901760, %v5087_v9 }
 0x37f   :  { %2140 = vmatmul.f32.gmra.mxu0 %v4812_v24  ;;  %2247 = vmatpush.msra.mxu2 %v4997_v10  ;;  %v2832_v29 = vsub.f32 %v5134_v51, %v5577_v19 }
 0x380   :  { %2496 = vmatpush.msra.mxu1 %v5007_v1  ;;  %2380 = vmatpush.msra.mxu3 %v2379_v50  ;;  %v5149_v49 = vsub.f32 %v2758_v62, %v5136_v41  ;;  %v2757_v50 = vld [vmem:[%s5526_s9 + $0x28] sm:$0xff] }
 0x381   :  { %2189 = vmatmul.f32.gmra.mxu1 %v4812_v24  ;;  %2445 = vmatpush.msra.mxu0 %v5066_v2  ;;  %v5141_v24 = vand.u32 4294901760, %v4726_v43  ;;  %v2833_v62 = vand.u32 4294901760, %v2832_v29  ;;  %v5169_v11 = vand.u32 4294901760, %v2757_v50  ;;  %v5646_v2 = vld [vmem:[#allocation5_spill] sm:$0xff] }
 0x382   :  { %2249 = vmatpush.msra.mxu2 %v5007_v1  ;;  %2498 = vmatpush.msra.mxu1 %v5018_v39 }
 0x383   :  { %2386 = vmatpush.msra.mxu3 %v2385_v60  ;;  %2448 = vmatpush.msra.mxu0 %v5077_v33  ;;  %v2206_v60 = vsel %vm3938_vm5, %v4740_v17, 0.0  ;;  %v5182_v17 = vsub.f32 %v2757_v50, %v5169_v11 }
 0x384   :  { %2500 = vmatpush.msra.mxu1 %v5045_v44  ;;  %2251 = vmatpush.msra.mxu2 %v5018_v39 }
 0x385   :  { %2001 = vmatmul.f32.gmra.mxu2 %v4840_v8  ;;  %2063 = vmatmul.f32.gmra.mxu3 %v1821_v30  ;;  %v2259_v8 = vsub.f32 %v4726_v43, %v5141_v24  ;;  %v5576_v30 = vand.u32 4294901760, %v5149_v49  ;;  %v2756_v43 = vld [vmem:[%s5526_s9 + $0x20] sm:$0xff]  ;;  %v5578_v13 = vand.u32 4294901760, %v5182_v17 }
 0x386   :  { %2451 = vmatpush.msra.mxu0 %v5087_v9  ;;  %2502 = vmatpush.msra.mxu1 %v5056_v31  ;;  %v5184_v29 = vand.u32 4294901760, %v2756_v43  ;;  %v5647_v9 = vand.u32 4294901760, %v5182_v17 }
 0x387   :  { %2144 = vmatmul.f32.gmra.mxu0 %v4878_v21  ;;  %2612 = vmatpush.msrb.mxu3 %v4820_v16  ;;  %v2838_v22 = vsub.f32 %v5149_v49, %v5576_v30  ;;  %v2260_v16 = vand.u32 4294901760, %v2259_v8  ;;  %v2844_v30 = vsub.f32 %v5182_v17, %v5578_v13  ;;  %v2754_v13 = vld [vmem:[%s5526_s9 + $0x10] sm:$0xff] }
 0x388   :  { %2253 = vmatpush.msra.mxu2 %v5045_v44  ;;  %2504 = vmatpush.msra.mxu1 %v5068_v59  ;;  %v5195_v50 = vsub.f32 %v2756_v43, %v5184_v29 }
 0x389   :  { %2193 = vmatmul.f32.gmra.mxu1 %v4878_v21  ;;  %2614 = vmatpush.msrb.mxu3 %v4832_v0  ;;  %v5187_v21 = vand.u32 4294901760, %v2206_v60  ;;  %v2839_v0 = vand.u32 4294901760, %v2838_v22  ;;  %v2845_v22 = vand.u32 4294901760, %v2844_v30 }
 0x38a   :  { %2773 = vmatpush.msrb.mxu0 %v5125_v25  ;;  %2255 = vmatpush.msra.mxu2 %v5056_v31 }
 0x38b   :  { %2834 = vmatpush.msrb.mxu1 %v2833_v62  ;;  %2616 = vmatpush.msrb.mxu3 %v4855_v52  ;;  %v2755_v62 = vld [vmem:[%s5526_s9 + $0x18] sm:$0xff]  ;;  %v2267_v43 = vsub.f32 %v2206_v60, %v5187_v21  ;;  %v2849_v52 = vand.u32 4294901760, %v5195_v50 }
 0x38c   :  { %2257 = vmatpush.msra.mxu2 %v5068_v59  ;;  %v5209_v19 = vand.u32 4294901760, %v2755_v62  ;;  %2775 = vmatpush.msrb.mxu0 %v5136_v41 }
 0x38d   :  { %2006 = vmatmul.f32.gmra.mxu2 %v4908_v48  ;;  %2388 = vmatmul.f32.vlgmr.msra.gmra.mxu3 %v5141_v24  ;;  %v2261_v48 = vsub.f32 %v2259_v8, %v2260_v16  ;;  %v2850_v3 = vsub.f32 %v5195_v50, %v2849_v52  ;;  %v2268_v60 = vand.u32 4294901760, %v2267_v43 }
 0x38e   :  { %2533 = vmatpush.msrb.mxu2 %v2293_v4  ;;  %2618 = vmatpush.msrb.mxu3 %v4857_v47  ;;  %v5222_v4 = vsub.f32 %v2755_v62, %v5209_v19  ;;  %v5228_v47 = vand.u32 4294901760, %v4744_v6 }
 0x38f   :  { %2454 = vmatmul.f32.vlgmr.msra.gmra.mxu0 %v2259_v8  ;;  %v5224_v8 = vand.u32 4294901760, %v2754_v13  ;;  %2840 = vmatpush.msrb.mxu1 %v2839_v0  ;;  %v2262_v30 = vand.u32 4294901760, %v2261_v48  ;;  %v2851_v45 = vand.u32 4294901760, %v2850_v3  ;;  %v2753_v0 = vld [vmem:[%s5526_s9 + $0x8] sm:$0xff]  ;;  %v2269_v62 = vsub.f32 %v2267_v43, %v2268_v60 }
 0x390   :  { %2537 = vmatpush.msrb.mxu2 %v2299_v5  ;;  %2620 = vmatpush.msrb.mxu3 %v4889_v36  ;;  %v2855_v5 = vand.u32 4294901760, %v5222_v4  ;;  %v2275_v20 = vsub.f32 %v4744_v6, %v5228_v47  ;;  %v5254_v48 = vand.u32 4294901760, %v2753_v0 }
 0x391   :  { %2508 = vmatmul.f32.vlgmr.msra.gmra.mxu1 %v2260_v16  ;;  %2777 = vmatpush.msrb.mxu0 %v5169_v11  ;;  %v5240_v16 = vsub.f32 %v2754_v13, %v5224_v8  ;;  %v2270_v57 = vand.u32 4294901760, %v2269_v62 }
 0x392   :  { %2541 = vmatpush.msrb.mxu2 %v2305_v34  ;;  %2622 = vmatpush.msrb.mxu3 %v4900_v56  ;;  %v2856_v36 = vsub.f32 %v5222_v4, %v2855_v5  ;;  %v2208_v56 = vsel %vm4003_vm6, %v4754_v27, 0.0 }
 0x393   :  { %2846 = vmatpush.msrb.mxu1 %v2845_v22  ;;  %2779 = vmatpush.msrb.mxu0 %v5184_v29  ;;  %v5266_v27 = vand.u32 4294901760, %v2208_v56 }
 0x394   :  { %2624 = vmatpush.msrb.mxu3 %v4928_v58  ;;  %2545 = vmatpush.msrb.mxu2 %v2311_v42  ;;  %v2857_v13 = vand.u32 4294901760, %v2856_v36  ;;  %v2861_v58 = vand.u32 4294901760, %v5240_v16  ;;  %v2276_v42 = vand.u32 4294901760, %v2275_v20 }
 0x395   :  { %2263 = vmatmul.f32.vlgmr.msra.gmra.mxu2 %v2262_v30  ;;  %2392 = vmatmul.f32.gmra.mxu3 %v5187_v21  ;;  %v2283_v28 = vsub.f32 %v2208_v56, %v5266_v27 }
 0x396   :  { %2852 = vmatpush.msrb.mxu1 %v2851_v45  ;;  %2626 = vmatpush.msrb.mxu3 %v4941_v38  ;;  %v2862_v6 = vsub.f32 %v5240_v16, %v2861_v58  ;;  %v2752_v38 = vld [vmem:[%s5526_s9] sm:$0xff] }
 0x397   :  { %2459 = vmatmul.f32.gmra.mxu0 %v2267_v43  ;;  %2549 = vmatpush.msrb.mxu2 %v2317_v40  ;;  %v5270_v40 = vsub.f32 %v2753_v0, %v5254_v48  ;;  %v5278_v53 = vand.u32 4294901760, %v2752_v38  ;;  %v5638_v43 = vand.u32 4294901760, %v4982_v7  ;;  %v5640_v7 = vand.u32 4294901760, %v5016_v15  ;;  %v5653_v0 = vld [vmem:[#allocation16_spill] sm:$0xff] }
 0x398   :  { %2628 = vmatpush.msrb.mxu3 %v4953_v37  ;;  %2781 = vmatpush.msrb.mxu0 %v5209_v19  ;;  %v2863_v46 = vand.u32 4294901760, %v2862_v6 }
 0x399   :  { %2514 = vmatmul.f32.gmra.mxu1 %v2268_v60  ;;  %2553 = vmatpush.msrb.mxu2 %v2323_v54  ;;  %v2867_v54 = vand.u32 4294901760, %v5270_v40  ;;  %v5286_v37 = vsub.f32 %v2752_v38, %v5278_v53  ;;  %v5655_v38 = vld [vmem:[#allocation6_spill] sm:$0xff] }
 0x39a   :  { %2858 = vmatpush.msrb.mxu1 %v2857_v13  ;;  %2630 = vmatpush.msrb.mxu3 %v4967_v26  ;;  %v2277_v26 = vsub.f32 %v2275_v20, %v2276_v42 }
 0x39b   :  { %2557 = vmatpush.msrb.mxu2 %v2329_v18  ;;  %v2868_v18 = vsub.f32 %v5270_v40, %v2867_v54  ;;  %v2873_v12 = vand.u32 4294901760, %v5286_v37  ;;  %2783 = vmatpush.msrb.mxu0 %v5224_v8 }
 0x39c   :  { %2632 = vmatpush.msrb.mxu3 %v4997_v10  ;;  %2864 = vmatpush.msrb.mxu1 %v2863_v46  ;;  %v5639_v10 = vand.u32 4294901760, %v4987_v23  ;;  %v2278_v3 = vand.u32 4294901760, %v2277_v26 }
 0x39d   :  { %2271 = vmatmul.f32.gmra.mxu2 %v2270_v57  ;;  %2396 = vmatmul.f32.gmra.mxu3 %v5228_v47  ;;  %v2874_v22 = vsub.f32 %v5286_v37, %v2873_v12 }
 0x39e   :  { %2561 = vmatpush.msrb.mxu2 %v2335_v35  ;;  %2634 = vmatpush.msrb.mxu3 %v5007_v1  ;;  %v2869_v35 = vand.u32 4294901760, %v2868_v18  ;;  %v2284_v1 = vand.u32 4294901760, %v2283_v28 }
 0x39f   :  { %2464 = vmatmul.f32.gmra.mxu0 %v2275_v20  ;;  %v2875_v30 = vand.u32 4294901760, %v2874_v22 }
 0x3a0   :  { %2565 = vmatpush.msrb.mxu2 %v5638_v43  ;;  %2636 = vmatpush.msrb.mxu3 %v5018_v39  ;;  %v2285_v23 = vsub.f32 %v2283_v28, %v2284_v1  ;;  %v5641_v39 = vand.u32 4294901760, %v5134_v51 }
 0x3a1   :  { %2520 = vmatmul.f32.gmra.mxu1 %v2276_v42  ;;  %2785 = vmatpush.msrb.mxu0 %v5254_v48 }
 0x3a2   :  { %2569 = vmatpush.msrb.mxu2 %v5639_v10  ;;  %2870 = vmatpush.msrb.mxu1 %v2869_v35  ;;  %v2286_v15 = vand.u32 4294901760, %v2285_v23  ;;  %v5658_v35 = vld [vmem:[#allocation15_spill] sm:$0xff] }
 0x3a3   :  { %2638 = vmatpush.msrb.mxu3 %v5045_v44  ;;  %2787 = vmatpush.msrb.mxu0 %v5278_v53  ;;  %v5644_v44 = vld [vmem:[#allocation10_spill] sm:$0xff] }
 0x3a4   :  { %2573 = vmatpush.msrb.mxu2 %v5640_v7  ;;  %2876 = vmatpush.msrb.mxu1 %v2875_v30 }
 0x3a5   :  { %2279 = vmatmul.f32.gmra.mxu2 %v2278_v3  ;;  %2400 = vmatmul.f32.gmra.mxu3 %v5266_v27 }
 0x3a6   :  { %2640 = vmatpush.msrb.mxu3 %v5056_v31  ;;  %2577 = vmatpush.msrb.mxu2 %v2359_v63  ;;  %v5645_v31 = vand.u32 4294901760, %v5149_v49 }
 0x3a7   :  { %2469 = vmatmul.f32.gmra.mxu0 %v2283_v28  ;;  %3062 = vmatpush.msra.mxu1 %v5125_v25 }
 0x3a8   :  { %2642 = vmatpush.msrb.mxu3 %v5068_v59  ;;  %2581 = vmatpush.msrb.mxu2 %v2365_v14  ;;  %v5642_v59 = vand.u32 4294901760, %v5077_v33 }
 0x3a9   :  { %2526 = vmatmul.f32.gmra.mxu1 %v2284_v1  ;;  %3007 = vmatpush.msra.mxu0 %v5641_v39  ;;  %v5659_v39 = vld [vmem:[#allocation13_spill] sm:$0xff] }
 0x3aa   :  { %2956 = vmatpush.msra.mxu3 %v5125_v25  ;;  %2585 = vmatpush.msrb.mxu2 %v2371_v32  ;;  %v5648_v25 = vld [vmem:[#allocation14_spill] sm:$0xff] }
 0x3ab   :  { %3011 = vmatpush.msra.mxu0 %v5645_v31  ;;  %3064 = vmatpush.msra.mxu1 %v5136_v41 }
 0x3ac   :  { %2958 = vmatpush.msra.mxu3 %v5136_v41  ;;  %v1558_v61 = vpop.f32.mrf.mxu0  ;;  %2589 = vmatpush.msrb.mxu2 %v5642_v59 }
 0x3ad   :  { %2287 = vmatmul.f32.gmra.mxu2 %v2286_v15  ;;  %2644 = vmatmul.f32.vlgmr.msrb.gmra.mxu3 %v5141_v24 }
 0x3ae   :  { %v1612_v14 = vpop.f32.mrf.mxu1  ;;  %2593 = vmatpush.msrb.mxu2 %v5643_v55  ;;  %2960 = vmatpush.msra.mxu3 %v5169_v11 }
 0x3af   :  { %2793 = vmatmul.f32.vlgmr.msrb.gmra.mxu0 %v5644_v44  ;;  %3066 = vmatpush.msra.mxu1 %v5169_v11 }
 0x3b0   :  { %2904 = vmatpush.msra.mxu2 %v5134_v51  ;;  %v1492_v63 = vpop.f32.mrf.mxu3  ;;  %2962 = vmatpush.msra.mxu3 %v5184_v29 }
 0x3b1   :  { %2878 = vmatmul.f32.vlgmr.msrb.gmra.mxu1 %v5646_v2  ;;  %3015 = vmatpush.msra.mxu0 %v5647_v9 }
 0x3b2   :  { %2907 = vmatpush.msra.mxu2 %v5149_v49  ;;  %2964 = vmatpush.msra.mxu3 %v5209_v19 }
 0x3b3   :  { %3019 = vmatpush.msra.mxu0 %v2849_v52  ;;  %3068 = vmatpush.msra.mxu1 %v5184_v29 }
 0x3b4   :  { %2910 = vmatpush.msra.mxu2 %v5182_v17  ;;  %v1563_v33 = vpop.f32.mrf.mxu0  ;;  %2966 = vmatpush.msra.mxu3 %v5224_v8 }
 0x3b5   :  { %2595 = vmatmul.f32.vlgmr.msrb.gmra.mxu2 %v5141_v24  ;;  %2648 = vmatmul.f32.gmra.mxu3 %v5187_v21  ;;  %v5649_v24 = vld [vmem:[#allocation8_spill] sm:$0xff] }
 0x3b6   :  { %v1618_v32 = vpop.f32.mrf.mxu1  ;;  %2913 = vmatpush.msra.mxu2 %v5195_v50  ;;  %2968 = vmatpush.msra.mxu3 %v5254_v48 }
 0x3b7   :  { %2801 = vmatmul.f32.gmra.mxu0 %v5648_v25  ;;  %3070 = vmatpush.msra.mxu1 %v5209_v19  ;;  %v5650_v19 = vld [vmem:[#allocation18_spill] sm:$0xff] }
 0x3b8   :  { %v1367_v51 = vpop.f32.mrf.mxu2  ;;  %v1496_v41 = vpop.f32.mrf.mxu3  ;;  %2916 = vmatpush.msra.mxu2 %v5222_v4  ;;  %3023 = vmatpush.msra.mxu0 %v2855_v5 }
 0x3b9   :  { %v1493_v11 = vadd.f32 %v1492_v63, %v1367_v51  ;;  %2882 = vmatmul.f32.gmra.mxu1 %v5649_v24  ;;  %2970 = vmatpush.msra.mxu3 %v5278_v53 }
 0x3ba   :  { %2919 = vmatpush.msra.mxu2 %v5240_v16  ;;  %3027 = vmatpush.msra.mxu0 %v2861_v58  ;;  %v5652_v16 = vld [vmem:[#allocation21_spill] sm:$0xff]  ;;  %v5654_v58 = vld [vmem:[#allocation7_spill] sm:$0xff] }
 0x3bb   :  { %v1559_v49 = vadd.f32 %v1558_v61, %v1493_v11  ;;  %3072 = vmatpush.msra.mxu1 %v5224_v8  ;;  %v5660_v61 = vld [vmem:[#allocation19_spill] sm:$0xff] }
 0x3bc   :  { %v1568_v17 = vpop.f32.mrf.mxu0  ;;  %2922 = vmatpush.msra.mxu2 %v5270_v40  ;;  %3031 = vmatpush.msra.mxu0 %v2867_v54 }
 0x3bd   :  { %2599 = vmatmul.f32.gmra.mxu2 %v5187_v21  ;;  %2652 = vmatmul.f32.gmra.mxu3 %v5228_v47  ;;  %v1613_v29 = vadd.f32 %v1612_v14, %v1559_v49  ;;  %v5651_v21 = vld [vmem:[#allocation12_spill] sm:$0xff] }
 0x3be   :  { %v1624_v50 = vpop.f32.mrf.mxu1  ;;  %2925 = vmatpush.msra.mxu2 %v5286_v37  ;;  %3074 = vmatpush.msra.mxu1 %v5254_v48 }
 0x3bf   :  { %2809 = vmatmul.f32.gmra.mxu0 %v5650_v19 }
 0x3c0   :  { %v1375_v52 = vpop.f32.mrf.mxu2  ;;  %v1500_v4 = vpop.f32.mrf.mxu3  ;;  %3035 = vmatpush.msra.mxu0 %v2873_v12  ;;  %3076 = vmatpush.msra.mxu1 %v5278_v53  ;;  %v5656_v53 = vld [vmem:[#allocation11_spill] sm:$0xff]  ;;  %v5657_v12 = vld [vmem:[#allocation9_spill] sm:$0xff] }
 0x3c1   :  { %v1497_v8 = vadd.f32 %v1496_v41, %v1375_v52  ;;  %2886 = vmatmul.f32.gmra.mxu1 %v5651_v21 }
 0x3c3   :  { %v1564_v60 = vadd.f32 %v1563_v33, %v1497_v8  ;;  %v5661_v33 = vld [vmem:[#allocation17_spill] sm:$0xff] }
 0x3c4   :  { %v1573_v45 = vpop.f32.mrf.mxu0 }
 0x3c5   :  { %2603 = vmatmul.f32.gmra.mxu2 %v5228_v47  ;;  %2656 = vmatmul.f32.gmra.mxu3 %v5266_v27  ;;  %v1619_v5 = vadd.f32 %v1618_v32, %v1564_v60 }
 0x3c6   :  { %v1630_v36 = vpop.f32.mrf.mxu1 }
 0x3c7   :  { %2817 = vmatmul.f32.gmra.mxu0 %v5652_v16 }
 0x3c8   :  { %v1383_v20 = vpop.f32.mrf.mxu2  ;;  %v1504_v34 = vpop.f32.mrf.mxu3 }
 0x3c9   :  { %v1501_v56 = vadd.f32 %v1500_v4, %v1383_v20  ;;  %2890 = vmatmul.f32.gmra.mxu1 %v5653_v0 }
 0x3cb   :  { %v1569_v62 = vadd.f32 %v1568_v17, %v1501_v56 }
 0x3cc   :  { %v1801_v13 = vpop.f32.mrf.mxu0 }
 0x3cd   :  { %2607 = vmatmul.f32.gmra.mxu2 %v5266_v27  ;;  %2974 = vmatmul.f32.vlgmr.msra.gmra.mxu3 %v5654_v58  ;;  %v1625_v48 = vadd.f32 %v1624_v50, %v1569_v62 }
 0x3ce   :  { %v1926_v6 = vpop.f32.mrf.mxu1 }
 0x3cf   :  { %3037 = vmatmul.f32.vlgmr.msra.gmra.mxu0 %v5646_v2 }
 0x3d0   :  { %v1391_v47 = vpop.f32.mrf.mxu2  ;;  %v1748_v57 = vpop.f32.mrf.mxu3 }
 0x3d1   :  { %v1505_v42 = vadd.f32 %v1504_v34, %v1391_v47  ;;  %3078 = vmatmul.f32.vlgmr.msra.gmra.mxu1 %v5646_v2 }
 0x3d3   :  { %v1574_v46 = vadd.f32 %v1573_v45, %v1505_v42 }
 0x3d4   :  { %v1809_v40 = vpop.f32.mrf.mxu0 }
 0x3d5   :  { %2928 = vmatmul.f32.vlgmr.msra.gmra.mxu2 %v5655_v38  ;;  %2980 = vmatmul.f32.gmra.mxu3 %v5656_v53  ;;  %v1631_v54 = vadd.f32 %v1630_v36, %v1574_v46 }
 0x3d6   :  { %v1930_v37 = vpop.f32.mrf.mxu1 }
 0x3d7   :  { %3041 = vmatmul.f32.gmra.mxu0 %v5649_v24 }
 0x3d8   :  { %v1699_v27 = vpop.f32.mrf.mxu2  ;;  %v1752_v26 = vpop.f32.mrf.mxu3 }
 0x3d9   :  { %v1700_v28 = vadd.f32 %v1699_v27, %v1613_v29  ;;  %3082 = vmatmul.f32.gmra.mxu1 %v5649_v24 }
 0x3db   :  { %v1749_v18 = vadd.f32 %v1748_v57, %v1700_v28 }
 0x3dc   :  { %v1817_v43 = vpop.f32.mrf.mxu0 }
 0x3dd   :  { %2933 = vmatmul.f32.gmra.mxu2 %v5657_v12  ;;  %2986 = vmatmul.f32.gmra.mxu3 %v5658_v35  ;;  %v1802_v10 = vadd.f32 %v1801_v13, %v1749_v18 }
 0x3de   :  { %v1934_v22 = vpop.f32.mrf.mxu1 }
 0x3df   :  { %3045 = vmatmul.f32.gmra.mxu0 %v5651_v21  ;;  %v1927_v3 = vadd.f32 %v1926_v6, %v1802_v10 }
 0x3e0   :  { %v1703_v1 = vpop.f32.mrf.mxu2  ;;  %v1756_v7 = vpop.f32.mrf.mxu3 }
 0x3e1   :  { %v1704_v30 = vadd.f32 %v1703_v1, %v1619_v5  ;;  %3086 = vmatmul.f32.gmra.mxu1 %v5651_v21 }
 0x3e3   :  { %v1753_v23 = vadd.f32 %v1752_v26, %v1704_v30 }
 0x3e4   :  { %v1825_v15 = vpop.f32.mrf.mxu0 }
 0x3e5   :  { %2938 = vmatmul.f32.gmra.mxu2 %v5659_v39  ;;  %2992 = vmatmul.f32.gmra.mxu3 %v5660_v61  ;;  %v1810_v59 = vadd.f32 %v1809_v40, %v1753_v23 }
 0x3e6   :  { %v1938_v14 = vpop.f32.mrf.mxu1 }
 0x3e7   :  { %3049 = vmatmul.f32.gmra.mxu0 %v5653_v0  ;;  %v1931_v55 = vadd.f32 %v1930_v37, %v1810_v59 }
 0x3e8   :  { %v1707_v44 = vpop.f32.mrf.mxu2  ;;  %v1760_v63 = vpop.f32.mrf.mxu3 }
 0x3e9   :  { %v1708_v31 = vadd.f32 %v1707_v44, %v1625_v48  ;;  %3090 = vmatmul.f32.gmra.mxu1 %v5653_v0 }
 0x3eb   :  { %v1757_v2 = vadd.f32 %v1756_v7, %v1708_v31 }
 0x3ec   :  { %v2133_v9 = vpop.f32.mrf.mxu0 }
 0x3ed   :  { %2943 = vmatmul.f32.gmra.mxu2 %v5661_v33  ;;  %v1818_v32 = vadd.f32 %v1817_v43, %v1757_v2 }
 0x3ee   :  { %v2182_v25 = vpop.f32.mrf.mxu1 }
 0x3ef   :  { %v1935_v51 = vadd.f32 %v1934_v22, %v1818_v32 }
 0x3f0   :  { %v1711_v41 = vpop.f32.mrf.mxu2  ;;  %v2046_v11 = vpop.f32.mrf.mxu3 }
 0x3f1   :  { %v1712_v24 = vadd.f32 %v1711_v41, %v1631_v54 }
 0x3f3   :  { %v1761_v49 = vadd.f32 %v1760_v63, %v1712_v24 }
 0x3f4   :  { %v2137_v17 = vpop.f32.mrf.mxu0 }
 0x3f5   :  { %v1826_v29 = vadd.f32 %v1825_v15, %v1761_v49 }
 0x3f6   :  { %v2186_v50 = vpop.f32.mrf.mxu1 }
 0x3f7   :  { %v1939_v19 = vadd.f32 %v1938_v14, %v1826_v29 }
 0x3f8   :  { %v1992_v52 = vpop.f32.mrf.mxu2  ;;  %v2052_v4 = vpop.f32.mrf.mxu3 }
 0x3f9   :  { %v1993_v8 = vadd.f32 %v1992_v52, %v1927_v3 }
 0x3fb   :  { %v2047_v21 = vadd.f32 %v2046_v11, %v1993_v8 }
 0x3fc   :  { %v2141_v60 = vpop.f32.mrf.mxu0 }
 0x3fd   :  { %v2134_v45 = vadd.f32 %v2133_v9, %v2047_v21 }
 0x3fe   :  { %v2190_v5 = vpop.f32.mrf.mxu1 }
 0x3ff   :  { %v5393_v36 = vadd.f32 %v2182_v25, %v2134_v45 }
 0x400   :  { %v1997_v16 = vpop.f32.mrf.mxu2  ;;  %v2058_v20 = vpop.f32.mrf.mxu3 }
 0x401   :  { %v1998_v34 = vadd.f32 %v1997_v16, %v1931_v55 }
 0x403   :  { %v2053_v56 = vadd.f32 %v2052_v4, %v1998_v34 }
 0x404   :  { %v5395_v0 = vpop.f32.mrf.mxu0 }
 0x405   :  { %v2138_v62 = vadd.f32 %v2137_v17, %v2053_v56 }
 0x406   :  { %v5397_v13 = vpop.f32.mrf.mxu1 }
 0x407   :  { %v2187_v58 = vadd.f32 %v2186_v50, %v2138_v62 }
 0x408   :  { %v2002_v48 = vpop.f32.mrf.mxu2  ;;  %v2064_v6 = vpop.f32.mrf.mxu3 }
 0x409   :  { %v2003_v47 = vadd.f32 %v2002_v48, %v1935_v51 }
 0x40b   :  { %v2059_v57 = vadd.f32 %v2058_v20, %v2003_v47 }
 0x40c   :  { %v2455_v42 = vpop.f32.mrf.mxu0 }
 0x40d   :  { %v2142_v46 = vadd.f32 %v2141_v60, %v2059_v57 }
 0x40e   :  { %v2509_v40 = vpop.f32.mrf.mxu1 }
 0x40f   :  { %v2191_v38 = vadd.f32 %v2190_v5, %v2142_v46 }
 0x410   :  { %v2007_v53 = vpop.f32.mrf.mxu2  ;;  %v2389_v54 = vpop.f32.mrf.mxu3 }
 0x411   :  { %v2008_v17 = vadd.f32 %v2007_v53, %v1939_v19  ;;  %v3259_v19 = vld [vmem:[%s5527_s6] ss:$0 sm:$0xff] }
 0x413   :  { %v2065_v5 = vadd.f32 %v2064_v6, %v2008_v17 }
 0x414   :  { %v2460_v37 = vpop.f32.mrf.mxu0 }
 0x415   :  { %v2146_v47 = vadd.f32 %v5395_v0, %v2065_v5 }
 0x416   :  { %v2515_v27 = vpop.f32.mrf.mxu1 }
 0x418   :  { %v2264_v26 = vpop.f32.mrf.mxu2  ;;  %v2393_v28 = vpop.f32.mrf.mxu3 }
 0x419   :  { %v2390_v44 = vadd.f32 %v2389_v54, %v2264_v26  ;;  %v2195_v54 = vadd.f32 %v5397_v13, %v2146_v47 }
 0x41b   :  { %v2456_v31 = vadd.f32 %v2455_v42, %v2390_v44 }
 0x41c   :  { %v2465_v18 = vpop.f32.mrf.mxu0 }
 0x41d   :  { %v2510_v11 = vadd.f32 %v2509_v40, %v2456_v31 }
 0x41e   :  { %v2521_v43 = vpop.f32.mrf.mxu1 }
 0x420   :  { %v2272_v12 = vpop.f32.mrf.mxu2  ;;  %v2397_v35 = vpop.f32.mrf.mxu3 }
 0x421   :  { %v2394_v55 = vadd.f32 %v2393_v28, %v2272_v12 }
 0x423   :  { %v2461_v63 = vadd.f32 %v2460_v37, %v2394_v55 }
 0x424   :  { %v2470_v10 = vpop.f32.mrf.mxu0 }
 0x425   :  { %v2516_v25 = vadd.f32 %v2515_v27, %v2461_v63 }
 0x426   :  { %v2527_v22 = vpop.f32.mrf.mxu1 }
 0x428   :  { %v2280_v3 = vpop.f32.mrf.mxu2  ;;  %v2401_v1 = vpop.f32.mrf.mxu3 }
 0x429   :  { %v2398_v2 = vadd.f32 %v2397_v35, %v2280_v3 }
 0x42b   :  { %v2466_v41 = vadd.f32 %v2465_v18, %v2398_v2 }
 0x42c   :  { %v5399_v7 = vpop.f32.mrf.mxu0 }
 0x42d   :  { %v2522_v52 = vadd.f32 %v2521_v43, %v2466_v41 }
 0x42e   :  { %v5401_v30 = vpop.f32.mrf.mxu1 }
 0x430   :  { %v2288_v23 = vpop.f32.mrf.mxu2  ;;  %v2645_v15 = vpop.f32.mrf.mxu3 }
 0x431   :  { %v2402_v29 = vadd.f32 %v2401_v1, %v2288_v23  ;;  %v3260_v1 = vld [vmem:[%s5528_s10] ss:$0 sm:$0xff] }
 0x432   :  { %v2795_v63 = vadd.f32 %v3260_v1, %v5399_v7 }
 0x433   :  { %v2471_v16 = vadd.f32 %v2470_v10, %v2402_v29 }
 0x434   :  { %v5403_v39 = vpop.f32.mrf.mxu0 }
 0x435   :  { %v2528_v42 = vadd.f32 %v2527_v22, %v2471_v16 }
 0x436   :  { %v5405_v61 = vpop.f32.mrf.mxu1 }
 0x438   :  { %v2596_v59 = vpop.f32.mrf.mxu2  ;;  %v2649_v14 = vpop.f32.mrf.mxu3 }
 0x439   :  { %v2597_v49 = vadd.f32 %v2596_v59, %v2510_v11 }
 0x43b   :  { %v2646_v8 = vadd.f32 %v2645_v15, %v2597_v49  ;;  %v2880_v49 = vadd.f32 %v5401_v30, %v2795_v63 }
 0x43c   :  { %v5407_v9 = vpop.f32.mrf.mxu0 }
 0x43d   :  { %v2660_v62 = vadd.f32 %v2646_v8, %v5393_v36  ;;  %v2811_v17 = vadd.f32 %v3260_v1, %v5407_v9 }
 0x43e   :  { %v5409_v51 = vpop.f32.mrf.mxu1 }
 0x43f   :  { %v5422_v40 = vadd.f32 %v3259_v19, %v2660_v62 }
 0x440   :  { %v2600_v33 = vpop.f32.mrf.mxu2  ;;  %v2653_v32 = vpop.f32.mrf.mxu3 }
 0x441   :  { %v2601_v24 = vadd.f32 %v2600_v33, %v2516_v25  ;;  %v2695_v0 = vmul.f32 %v5422_v40, %v5422_v40 }
 0x443   :  { %v2650_v50 = vadd.f32 %v2649_v14, %v2601_v24  ;;  %v2803_v14 = vadd.f32 %v3260_v1, %v5403_v39 }
 0x444   :  { %v5411_v45 = vpop.f32.mrf.mxu0 }
 0x445   :  { %v2661_v20 = vadd.f32 %v2650_v50, %v2187_v58  ;;  %v2884_v41 = vadd.f32 %v5405_v61, %v2803_v14  ;;  %v2819_v9 = vadd.f32 %v3260_v1, %v5411_v45 }
 0x446   :  { %v5413_v56 = vpop.f32.mrf.mxu1 }
 0x447   :  { %v5420_v57 = vadd.f32 %v3259_v19, %v2661_v20 }
 0x448   :  { %v2604_v4 = vpop.f32.mrf.mxu2  ;;  %v2657_v60 = vpop.f32.mrf.mxu3 }
 0x449   :  { %v2605_v21 = vadd.f32 %v2604_v4, %v2522_v52  ;;  %v2696_v36 = vmul.f32 %v5420_v57, %v5420_v57 }
 0x44b   :  { %v2654_v34 = vadd.f32 %v2653_v32, %v2605_v21  ;;  %v2699_v43 = vadd.f32 %v2696_v36, %v2695_v0  ;;  %v2888_v21 = vadd.f32 %v5409_v51, %v2811_v17 }
 0x44c   :  { %v3038_v27 = vpop.f32.mrf.mxu0 }
 0x44d   :  { %v2662_v48 = vadd.f32 %v2654_v34, %v2191_v38  ;;  %v2674_v38 = vadd.f32 %v5420_v57, %v5422_v40 }
 0x44e   :  { %v3079_v18 = vpop.f32.mrf.mxu1 }
 0x44f   :  { %v5424_v6 = vadd.f32 %v3259_v19, %v2662_v48 }
 0x450   :  { %v2608_v46 = vpop.f32.mrf.mxu2  ;;  %v2975_v53 = vpop.f32.mrf.mxu3 }
 0x451   :  { %v2609_v58 = vadd.f32 %v2608_v46, %v2528_v42  ;;  %v2697_v26 = vmul.f32 %v5424_v6, %v5424_v6  ;;  %v2675_v12 = vadd.f32 %v2674_v38, %v5424_v6  ;;  %v2892_v42 = vadd.f32 %v5413_v56, %v2819_v9 }
 0x453   :  { %v2658_v37 = vadd.f32 %v2657_v60, %v2609_v58  ;;  %v2700_v3 = vadd.f32 %v2699_v43, %v2697_v26 }
 0x454   :  { %v3042_v31 = vpop.f32.mrf.mxu0 }
 0x455   :  { %v2663_v28 = vadd.f32 %v2658_v37, %v2195_v54 }
 0x456   :  { %v3083_v25 = vpop.f32.mrf.mxu1 }
 0x457   :  { %v5436_v35 = vadd.f32 %v3259_v19, %v2663_v28 }
 0x458   :  { %v2929_v10 = vpop.f32.mrf.mxu2  ;;  %v2981_v59 = vpop.f32.mrf.mxu3 }
 0x459   :  { %v2698_v13 = vmul.f32 %v5436_v35, %v5436_v35  ;;  %v2676_v22 = vadd.f32 %v2675_v12, %v5436_v35  ;;  %v2930_v52 = vadd.f32 %v2929_v10, %v2880_v49 }
 0x45b   :  { %v2677_v23 = vrot.slane %v2676_v22, 4  ;;  %v2701_v15 = vadd.f32 %v2700_v3, %v2698_v13  ;;  %v2976_v20 = vadd.f32 %v2975_v53, %v2930_v52 }
 0x45c   :  { %v3046_v16 = vpop.f32.mrf.mxu0 }
 0x45d   :  { %v2678_v55 = vadd.f32 %v2677_v23, %v2676_v22  ;;  %v2702_v44 = vrot.slane %v2701_v15, 4  ;;  %v3039_v48 = vadd.f32 %v3038_v27, %v2976_v20 }
 0x45e   :  { %v3087_v30 = vpop.f32.mrf.mxu1 }
 0x45f   :  { %v2679_v2 = vrot.slane %v2678_v55, 2  ;;  %v2703_v33 = vadd.f32 %v2702_v44, %v2701_v15  ;;  %v5456_v36 = vadd.f32 %v3079_v18, %v3039_v48 }
 0x460   :  { %v2934_v32 = vpop.f32.mrf.mxu2  ;;  %v2987_v7 = vpop.f32.mrf.mxu3 }
 0x461   :  { %v2680_v11 = vadd.f32 %v2679_v2, %v2678_v55  ;;  %v2704_v24 = vrot.slane %v2703_v33, 2  ;;  %v2935_v29 = vadd.f32 %v2934_v32, %v2884_v41  ;;  %v3117_v27 = vmul.f32 %v5456_v36, %v5456_v36 }
 0x463   :  { %v2681_v50 = vrot.slane %v2680_v11, 1  ;;  %v2705_v39 = vadd.f32 %v2704_v24, %v2703_v33  ;;  %v2982_v60 = vadd.f32 %v2981_v59, %v2935_v29 }
 0x464   :  { %v3050_v37 = vpop.f32.mrf.mxu0 }
 0x465   :  { %v2682_v4 = vadd.f32 %v2681_v50, %v2680_v11  ;;  %v2706_v8 = vrot.slane %v2705_v39, 1  ;;  %v3043_v62 = vadd.f32 %v3042_v31, %v2982_v60 }
 0x466   :  { %v3091_v38 = vpop.f32.mrf.mxu1 }
 0x467   :  { %2683 = vrot.lane.b32.xlu2 %v2682_v4, %s3267_s2  ;;  %v2707_v5 = vadd.f32 %v2706_v8, %v2705_v39  ;;  %v5454_v51 = vadd.f32 %v3083_v25, %v3043_v62 }
 0x468   :  { %v2939_v61 = vpop.f32.mrf.mxu2  ;;  %v2993_v58 = vpop.f32.mrf.mxu3 }
 0x469   :  { %v2940_v34 = vadd.f32 %v2939_v61, %v2888_v21  ;;  %2708 = vrot.lane.b32.xlu1 %v2707_v5, %s3267_s2  ;;  %v3118_v0 = vmul.f32 %v5454_v51, %v5454_v51  ;;  %v3096_v56 = vadd.f32 %v5454_v51, %v5456_v36 }
 0x46b   :  { %v2988_v19 = vadd.f32 %v2987_v7, %v2940_v34  ;;  %v3121_v18 = vadd.f32 %v3118_v0, %v3117_v27 }
 0x46d   :  { %v3047_v47 = vadd.f32 %v3046_v16, %v2988_v19 }
 0x46f   :  { %v5458_v54 = vadd.f32 %v3087_v30, %v3047_v47 }
 0x470   :  { %v2944_v46 = vpop.f32.mrf.mxu2 }
 0x471   :  { %v2945_v53 = vadd.f32 %v2944_v46, %v2892_v42  ;;  %v3119_v26 = vmul.f32 %v5458_v54, %v5458_v54  ;;  %v3097_v43 = vadd.f32 %v3096_v56, %v5458_v54 }
 0x473   :  { %v2994_v45 = vadd.f32 %v2993_v58, %v2945_v53  ;;  %v3122_v10 = vadd.f32 %v3121_v18, %v3119_v26 }
 0x475   :  { %v3051_v28 = vadd.f32 %v3050_v37, %v2994_v45 }
 0x477   :  { %v5469_v12 = vadd.f32 %v3091_v38, %v3051_v28 }
 0x479   :  { %v3098_v13 = vadd.f32 %v3097_v43, %v5469_v12  ;;  %v3120_v22 = vmul.f32 %v5469_v12, %v5469_v12 }
 0x47b   :  { %v3099_v3 = vrot.slane %v3098_v13, 4  ;;  %v3123_v1 = vadd.f32 %v3122_v10, %v3120_v22 }
 0x47d   :  { %v3100_v23 = vadd.f32 %v3099_v3, %v3098_v13  ;;  %v3124_v15 = vrot.slane %v3123_v1, 4 }
 0x47f   :  { %v3101_v59 = vrot.slane %v3100_v23, 2  ;;  %v3125_v14 = vadd.f32 %v3124_v15, %v3123_v1 }
 0x481   :  { %v3102_v55 = vadd.f32 %v3101_v59, %v3100_v23  ;;  %v3126_v44 = vrot.slane %v3125_v14, 2 }
 0x483   :  { %v3103_v63 = vrot.slane %v3102_v55, 1  ;;  %v3127_v31 = vadd.f32 %v3126_v44, %v3125_v14 }
 0x485   :  { %v3104_v2 = vadd.f32 %v3103_v63, %v3102_v55  ;;  %v3128_v33 = vrot.slane %v3127_v31, 1  ;;  %v2672_v55 = vld [vmem:[%s5529_s7] sm:$0x1] }
 0x487   :  { %3105 = vrot.lane.b32.xlu0 %v3104_v2, %s3267_s2  ;;  %v3129_v32 = vadd.f32 %v3128_v33, %v3127_v31 }
 0x489   :  { %3130 = vrot.lane.b32.xlu2 %v3129_v32, %s3267_s2 }
 0x4c1   :  { %v2684_v25 = vpop.permute.xlu2 %2683 }
 0x4c2   :  { %v2685_v41 = vadd.f32 %v2684_v25, %v2682_v4 }
 0x4c4   :  { %2686 = vrot.lane.b32.xlu0 %v2685_v41, %s3268_s29 }
 0x4db   :  { %v2709_v11 = vpop.permute.xlu1 %2708 }
 0x4dc   :  { %v2710_v24 = vadd.f32 %v2709_v11, %v2707_v5  ;;  %v3094_v11 = vld [vmem:[%s5531_s11] sm:$0x1] }
 0x4de   :  { %2711 = vrot.lane.b32.xlu2 %v2710_v24, %s3268_s29 }
 0x4e3   :  { %v3131_v49 = vpop.permute.xlu2 %3130 }
 0x4e4   :  { %v3132_v17 = vadd.f32 %v3131_v49, %v3129_v32 }
 0x4e6   :  { %3133 = vrot.lane.b32.xlu0 %v3132_v17, %s3268_s29 }
 0x4f9   :  { %v3106_v29 = vpop.permute.xlu0 %3105 }
 0x4fa   :  { %v3107_v50 = vadd.f32 %v3106_v29, %v3104_v2 }
 0x4fc   :  { %3108 = vrot.lane.b32.xlu1 %v3107_v50, %s3268_s29 }
 0x536   :  { %v2687_v39 = vpop.permute.xlu0 %2686 }
 0x537   :  { %v2688_v52 = vadd.f32 %v2687_v39, %v2685_v41  ;;  %v2673_v41 = vld [vmem:[%s5530_s8] sm:$0x1] }
 0x538   :  { %v2712_v8 = vpop.permute.xlu2 %2711  ;;  %v3095_v39 = vld [vmem:[%s5532_s12] sm:$0x1] }
 0x539   :  { %v2713_v7 = vadd.f32 %v2712_v8, %v2710_v24  ;;  %2689 = vrot.lane.b32.xlu1 %v2688_v52, %s3269_s30 }
 0x53b   :  { %2714 = vrot.lane.b32.xlu0 %v2713_v7, %s3269_s30 }
 0x558   :  { %v3134_v4 = vpop.permute.xlu0 %3133 }
 0x559   :  { %v3135_v21 = vadd.f32 %v3134_v4, %v3132_v17 }
 0x55b   :  { %3136 = vrot.lane.b32.xlu1 %v3135_v21, %s3269_s30 }
 0x56e   :  { %v3109_v60 = vpop.permute.xlu1 %3108 }
 0x56f   :  { %v3110_v5 = vadd.f32 %v3109_v60, %v3107_v50 }
 0x571   :  { %3111 = vrot.lane.b32.xlu2 %v3110_v5, %s3269_s30 }
 0x5ab   :  { %v2690_v61 = vpop.permute.xlu1 %2689 }
 0x5ac   :  { %v2691_v16 = vadd.f32 %v2690_v61, %v2688_v52 }
 0x5ad   :  { %v2715_v20 = vpop.permute.xlu0 %2714 }
 0x5ae   :  { %v2716_v34 = vadd.f32 %v2715_v20, %v2713_v7  ;;  %2692 = vrot.lane.b32.xlu2 %v2691_v16, %s3270_s14 }
 0x5b0   :  { %2717 = vrot.lane.b32.xlu1 %v2716_v34, %s3270_s14 }
 0x5cb   :  { %v3112_v30 = vpop.permute.xlu2 %3111 }
 0x5cc   :  { %v3113_v9 = vadd.f32 %v3112_v30, %v3110_v5 }
 0x5cd   :  { %v3137_v62 = vpop.permute.xlu1 %3136 }
 0x5ce   :  { %v3138_v19 = vadd.f32 %v3137_v62, %v3135_v21  ;;  %3114 = vrot.lane.b32.xlu0 %v3113_v9, %s3270_s14 }
 0x5d0   :  { %3139 = vrot.lane.b32.xlu2 %v3138_v19, %s3270_s14 }
 0x608   :  { %v2693_v48 = vpop.permute.xlu2 %2692 }
 0x609   :  { %v2694_v42 = vadd.f32 %v2693_v48, %v2691_v16 }
 0x60b   :  { %v2720_v58 = vmul.f32 0.001953125, %v2694_v42 }
 0x60d   :  { %v2722_v37 = vmul.f32 %v2720_v58, %v2720_v58 }
 0x622   :  { %v2718_v47 = vpop.permute.xlu1 %2717 }
 0x623   :  { %v2719_v46 = vadd.f32 %v2718_v47, %v2716_v34 }
 0x625   :  { %v2721_v53 = vmul.f32 0.001953125, %v2719_v46 }
 0x627   :  { %v2723_v0 = vsub.f32 %v2721_v53, %v2722_v37 }
 0x629   :  { %v2724_v45 = vadd.f32 1e-05, %v2723_v0 }
 0x62a   :  { %v3140_v56 = vpop.permute.xlu2 %3139 }
 0x62b   :  { %3263 = vrsqrt.f32 %v2724_v45  ;;  %v3141_v18 = vadd.f32 %v3140_v56, %v3138_v19  ;;  %vm2731_vm11 = vweird.f32 %v2724_v45 }
 0x62d   :  { %v3143_v22 = vmul.f32 0.001953125, %v3141_v18 }
 0x631   :  { %v3264_v38 = vpop.eup %3263 }
 0x632   :  { %v2726_v27 = vmul.f32 %v3264_v38, %v2724_v45  ;;  %vm2732_vm10 = vweird.f32 %v3264_v38 }
 0x633   :  { %vm2733_vm12 = vmor %vm2731_vm11, %vm2732_vm10 }
 0x634   :  { %v2727_v28 = vmul.f32 %v3264_v38, %v2726_v27 }
 0x636   :  { %v2728_v13 = vmul.f32 0.5, %v2727_v28 }
 0x638   :  { %v2729_v23 = vsub.f32 1.5, %v2728_v13 }
 0x63a   :  { %v2730_v59 = vmul.f32 %v3264_v38, %v2729_v23 }
 0x63c   :  { %v2734_v44 = vsel %vm2733_vm12, %v3264_v38, %v2730_v59 }
 0x63d   :  { %v2735_v31 = vmul.f32 %v2734_v44, %v2672_v55 }
 0x63f   :  { %v2736_v32 = vmul.f32 %v2735_v31, %v2720_v58  ;;  %v2739_v29 = vperm.slane %v2735_v31, 0 }
 0x640   :  { %v3115_v26 = vpop.permute.xlu0 %3114 }
 0x641   :  { %v3116_v43 = vadd.f32 %v3115_v26, %v3113_v9  ;;  %v2737_v49 = vsub.f32 %v2673_v41, %v2736_v32  ;;  %v2741_v4 = vmul.f32 %v2739_v29, %v5422_v40  ;;  %v2742_v60 = vmul.f32 %v2739_v29, %v5420_v57 }
 0x642   :  { %v2743_v5 = vmul.f32 %v2739_v29, %v5424_v6  ;;  %v2744_v61 = vmul.f32 %v2739_v29, %v5436_v35 }
 0x643   :  { %v3142_v10 = vmul.f32 0.001953125, %v3116_v43  ;;  %v2746_v7 = vperm.slane %v2737_v49, 0 }
 0x645   :  { %v3144_v3 = vmul.f32 %v3142_v10, %v3142_v10  ;;  %v2748_v62 = vadd.f32 %v2746_v7, %v2741_v4  ;;  %v2749_v19 = vadd.f32 %v2746_v7, %v2742_v60  ;;  %v2750_v48 = vadd.f32 %v2746_v7, %v2743_v5 }
 0x646   :  { %v2751_v40 = vadd.f32 %v2746_v7, %v2744_v61 }
 0x647   :  { %v3145_v1 = vsub.f32 %v3143_v22, %v3144_v3 }
 0x649   :  { %v3146_v15 = vadd.f32 1e-05, %v3145_v1 }
 0x64b   :  { %3265 = vrsqrt.f32 %v3146_v15  ;;  %vm3153_vm14 = vweird.f32 %v3146_v15 }
 0x651   :  { %v3266_v14 = vpop.eup %3265 }
 0x652   :  { %v3148_v63 = vmul.f32 %v3266_v14, %v3146_v15  ;;  %vm3154_vm13 = vweird.f32 %v3266_v14 }
 0x653   :  { %vm3155_vm15 = vmor %vm3153_vm14, %vm3154_vm13 }
 0x654   :  { %v3149_v2 = vmul.f32 %v3266_v14, %v3148_v63 }
 0x656   :  { %v3150_v33 = vmul.f32 0.5, %v3149_v2 }
 0x658   :  { %v3151_v25 = vsub.f32 1.5, %v3150_v33 }
 0x65a   :  { %v3152_v24 = vmul.f32 %v3266_v14, %v3151_v25 }
 0x65c   :  { %v3156_v17 = vsel %vm3155_vm15, %v3266_v14, %v3152_v24 }
 0x65d   :  { %v3157_v50 = vmul.f32 %v3156_v17, %v3094_v11 }
 0x65f   :  { %v3158_v52 = vmul.f32 %v3157_v50, %v3142_v10  ;;  %v3161_v8 = vperm.slane %v3157_v50, 0 }
 0x661   :  { %v3159_v21 = vsub.f32 %v3095_v39, %v3158_v52  ;;  %v3163_v16 = vmul.f32 %v3161_v8, %v5456_v36  ;;  %v3164_v20 = vmul.f32 %v3161_v8, %v5454_v51  ;;  %v3165_v34 = vmul.f32 %v3161_v8, %v5458_v54 }
 0x662   :  { %v3166_v30 = vmul.f32 %v3161_v8, %v5469_v12 }
 0x663   :  { %v3168_v9 = vperm.slane %v3159_v21, 0 }
 0x665   :  { %v3170_v47 = vadd.f32 %v3168_v9, %v3163_v16  ;;  %v3171_v42 = vadd.f32 %v3168_v9, %v3164_v20  ;;  %v3172_v57 = vadd.f32 %v3168_v9, %v3165_v34  ;;  %v3173_v46 = vadd.f32 %v3168_v9, %v3166_v30 }
 0x667   :  { %v3174_v6 = vadd.f32 %v3170_v47, %v2748_v62  ;;  %v3175_v58 = vadd.f32 %v3171_v42, %v2749_v19  ;;  %v3176_v35 = vadd.f32 %v3172_v57, %v2750_v48  ;;  %v3177_v53 = vadd.f32 %v3173_v46, %v2751_v40 }
 0x669   :  { %v3178_v36 = vmax.f32 %v3174_v6, 0.0  ;;  %v3179_v37 = vmax.f32 %v3175_v58, 0.0  ;;  %v3180_v51 = vmax.f32 %v3176_v35, 0.0  ;;  %v3181_v0 = vmax.f32 %v3177_v53, 0.0 }
 0x66b   :  { %3182 = vst [vmem:[%s5533_s13] sm:$0xff] %v3178_v36 }
 0x66c   :  { %3183 = vst [vmem:[%s5533_s13 + $0x8] sm:$0xff] %v3179_v37 }
 0x66d   :  { %3184 = vst [vmem:[%s5533_s13 + $0x10] sm:$0xff] %v3180_v51 }
 0x66e   :  { %3185 = vst [vmem:[%s5533_s13 + $0x18] sm:$0xff] %v3181_v0 }

</bundles_post_ra>
